<compile_context>
chip_gen: v6e
topology: v6e:2x2x1
jax: 0.10.0
libtpu: 0.0.40
codegen_flags: <defaults>
</compile_context>

<pallas_src>
import jax
import jax.numpy as jnp
from jax.experimental import pallas as pl
from jax.experimental.pallas import tpu as pltpu


def _lstm_cell(gx, h, c, w_hh, b, H):
    """PyTorch nn.LSTMCell semantics (gate order i, f, g, o).
    gx = x @ W_ih^T precomputed by the caller. w_hh: [H, 4H], b = b_ih+b_hh: [1, 4H]."""
    gates = gx + jnp.dot(h, w_hh, preferred_element_type=jnp.float32) + b
    i_g = jax.nn.sigmoid(gates[:, 0 * H:1 * H])
    f_g = jax.nn.sigmoid(gates[:, 1 * H:2 * H])
    g_g = jnp.tanh(gates[:, 2 * H:3 * H])
    o_g = jax.nn.sigmoid(gates[:, 3 * H:4 * H])
    c_new = f_g * c + i_g * g_g
    h_new = o_g * jnp.tanh(c_new)
    return h_new, c_new


def ptrnet_kernel(x_ref,
                  enc_wih_ref, enc_whh_ref, enc_b_ref,
                  dec_wih_ref, dec_whh_ref, dec_b_ref,
                  wenc_w_ref, wenc_b_ref,
                  wdec_w_ref, wdec_b_ref,
                  v_w_ref, v_b_ref,
                  out_ref):
    B, S = x_ref.shape
    H = enc_whh_ref.shape[1]          # enc_whh: [S, H, 4H]

    # ---- hoist loop-invariant loads out of the unrolled loops ----
    x_all = x_ref[...]                # [B, S]
    enc_wih = enc_wih_ref[...]        # [S, 1, 4H]   (input_dim == 1)
    enc_b = enc_b_ref[...]            # [S, 4H]
    dec_b = dec_b_ref[...]            # [S, 4H]
    wenc_w = wenc_w_ref[...]          # [H, H]
    wenc_b = wenc_b_ref[...]          # [1, H]
    wdec_w = wdec_w_ref[...]          # [H, H]
    wdec_b = wdec_b_ref[...]          # [1, H]
    v_row = v_w_ref[...].reshape(1, 1, H)   # [1, 1, H]
    v_b = v_b_ref[...]                # [1, 1]

    h = jnp.zeros((B, H), jnp.float32)
    c = jnp.zeros((B, H), jnp.float32)

    # ---- encoder: one LSTMCell (own weights) per timestep ----
    encoded = []
    for i in range(S):
        inp = x_all[:, i:i + 1]                       # [B, 1]
        # input_dim == 1 -> x @ W_ih^T is a plain broadcast multiply (VPU)
        gx = inp * enc_wih[i]                         # [B,1]*[1,4H] -> [B,4H]
        h, c = _lstm_cell(gx, h, c, enc_whh_ref[i], enc_b[i:i + 1, :], H)
        encoded.append(h)

    enc_bsh = jnp.stack(encoded, axis=1)              # [B, S, H]

    # W_encoder(encoded[j]) identical for every decoder step -> one fused matmul.
    e_proj = (jnp.dot(enc_bsh.reshape(B * S, H), wenc_w,
                      preferred_element_type=jnp.float32)
              + wenc_b).reshape(B, S, H)              # [B, S, H]

    # ---- decoder + pointer attention ----
    d_i = jnp.full((B, H), -1.0, dtype=jnp.float32)
    a_rows = []
    for i in range(S):
        gx = jnp.dot(d_i, dec_wih_ref[i], preferred_element_type=jnp.float32)
        h, c = _lstm_cell(gx, h, c, dec_whh_ref[i], dec_b[i:i + 1, :], H)

        # NOTE: reference model projects the *cell* state c here (model quirk) — keep it.
        c_proj = (jnp.dot(c, wdec_w, preferred_element_type=jnp.float32)
                  + wdec_b)                           # [B, H]

        # All S pointer scores at once: tanh + VPU mul + lane reduce (no MXU N=1 dots).
        t = jnp.tanh(c_proj[:, None, :] + e_proj)     # [B, S, H]
        u_i = jnp.sum(t * v_row, axis=-1) + v_b       # [B, S]

        # F.softmax on a 2-D tensor -> softmax over dim=1 (encoder positions).
        m = jnp.max(u_i, axis=1, keepdims=True)
        e = jnp.exp(u_i - m)
        a_i = e / jnp.sum(e, axis=1, keepdims=True)   # [B, S]
        a_rows.append(a_i)

        # next decoder input: attention-weighted sum of encoder states
        d_i = jnp.sum(a_i[:, :, None] * enc_bsh, axis=1)   # [B, H]

    # single store instead of S masked partial stores
    out_ref[...] = jnp.stack(a_rows, axis=0)          # [S, B, S]


def ptrnet_forward(x, params):
    B, S = x.shape
    args = (x,
            params["enc_wih"], params["enc_whh"], params["enc_b"],
            params["dec_wih"], params["dec_whh"], params["dec_b"],
            params["wenc_w"], params["wenc_b"],
            params["wdec_w"], params["wdec_b"],
            params["v_w"], params["v_b"])

    # All-VMEM residency: fine at this size (<1 MiB). Guard against scaled-up
    # configs against v7x's budget (64 MiB physical / 32 MiB scoped default),
    # not v6e/v5e's 128 MiB.
    total_bytes = sum(int(a.size) * a.dtype.itemsize for a in args) + S * B * S * 4
    assert total_bytes < 24 * 1024 * 1024, (
        "PtrNet config too large for whole-array VMEM residency; stream the "
        "per-step LSTM weights instead (memory_space=pl.ANY + make_async_copy).")
    # TODO(synk): for large S/H, switch enc_whh/dec_wih/dec_whh to pl.ANY with a
    # double-buffered per-timestep DMA rather than whole-array VMEM BlockSpecs.

    return pl.pallas_call(
        ptrnet_kernel,
        out_shape=jax.ShapeDtypeStruct((S, B, S), jnp.float32),
        in_specs=[pl.BlockSpec(memory_space=pltpu.MemorySpace.VMEM)] * len(args),
        out_specs=pl.BlockSpec(memory_space=pltpu.MemorySpace.VMEM),
    )(*args)


def init_params(key, seq_len, input_dim, hidden_dim):
    """Deterministic init mirroring nn.LSTMCell / nn.Linear shapes.
    LSTM / W_encoder / W_decoder matrices are stored transposed ([in, out]);
    V is stored in its native [out=1, in=H] row layout.
    NOTE: the reference forward is only well-formed for input_dim == 1."""
    assert input_dim == 1, "PtrNet reference forward requires input_dim == 1"
    H = hidden_dim
    bound = 1.0 / float(H) ** 0.5
    keys = jax.random.split(key, 14)
    u = lambda k, shape: jax.random.uniform(k, shape, jnp.float32, -bound, bound)
    return dict(
        enc_wih=u(keys[0], (seq_len, input_dim, 4 * H)),
        enc_whh=u(keys[1], (seq_len, H, 4 * H)),
        enc_b=u(keys[2], (seq_len, 4 * H)) + u(keys[3], (seq_len, 4 * H)),   # b_ih + b_hh
        dec_wih=u(keys[4], (seq_len, H, 4 * H)),
        dec_whh=u(keys[5], (seq_len, H, 4 * H)),
        dec_b=u(keys[6], (seq_len, 4 * H)) + u(keys[7], (seq_len, 4 * H)),
        wenc_w=u(keys[8], (H, H)),
        wenc_b=u(keys[9], (1, H)),
        wdec_w=u(keys[10], (H, H)),
        wdec_b=u(keys[11], (1, H)),
        v_w=u(keys[12], (input_dim, H)),     # [1, H] row vector for mul+reduce
        v_b=u(keys[13], (1, input_dim)),     # [1, 1]
    )


if __name__ == "__main__":
    B, S, I, H = 2, 8, 1, 32   # input_dim must be 1 for the reference forward
    key = jax.random.PRNGKey(0)
    kx, kp = jax.random.split(key)
    x = jax.random.normal(kx, (B, S), dtype=jnp.float32)
    params = init_params(kp, S, I, H)

    out = jax.block_until_ready(ptrnet_forward(x, params))

    assert out.shape == (S, B, S), out.shape
    row_sums = jnp.sum(out, axis=-1)
    assert bool(jnp.all(jnp.isfinite(out)))
    assert bool(jnp.all(jnp.abs(row_sums - 1.0) < 1e-4))
    print("KERNEL_OK")
</pallas_src>

<mosaic_0001>
module attributes {stable_mosaic.version = 11 : i64} {
  func.func @ptrnet_kernel(%arg0: memref<2x8xf32, #tpu.memory_space<vmem>>, %arg1: memref<8x1x128xf32, #tpu.memory_space<vmem>>, %arg2: memref<8x32x128xf32, #tpu.memory_space<vmem>>, %arg3: memref<8x128xf32, #tpu.memory_space<vmem>>, %arg4: memref<8x32x128xf32, #tpu.memory_space<vmem>>, %arg5: memref<8x32x128xf32, #tpu.memory_space<vmem>>, %arg6: memref<8x128xf32, #tpu.memory_space<vmem>>, %arg7: memref<32x32xf32, #tpu.memory_space<vmem>>, %arg8: memref<1x32xf32, #tpu.memory_space<vmem>>, %arg9: memref<32x32xf32, #tpu.memory_space<vmem>>, %arg10: memref<1x32xf32, #tpu.memory_space<vmem>>, %arg11: memref<1x32xf32, #tpu.memory_space<vmem>>, %arg12: memref<1x1xf32, #tpu.memory_space<vmem>>, %arg13: memref<8x2x8xf32, #tpu.memory_space<vmem>>) attributes {dimension_semantics = [], scalar_prefetch = 0 : i64, scratch_operands = 0 : i64, tpu.core_type = #tpu.core_type<tc>} {
    %c0 = arith.constant 0 : index
    %c0_0 = arith.constant 0 : index
    %0 = vector.load %arg0[%c0, %c0_0] : memref<2x8xf32, #tpu.memory_space<vmem>>, vector<2x8xf32>
    %c0_1 = arith.constant 0 : index
    %c0_2 = arith.constant 0 : index
    %c0_3 = arith.constant 0 : index
    %1 = vector.load %arg1[%c0_1, %c0_2, %c0_3] : memref<8x1x128xf32, #tpu.memory_space<vmem>>, vector<8x1x128xf32>
    %c0_4 = arith.constant 0 : index
    %c0_5 = arith.constant 0 : index
    %2 = vector.load %arg3[%c0_4, %c0_5] : memref<8x128xf32, #tpu.memory_space<vmem>>, vector<8x128xf32>
    %c0_6 = arith.constant 0 : index
    %c0_7 = arith.constant 0 : index
    %3 = vector.load %arg6[%c0_6, %c0_7] : memref<8x128xf32, #tpu.memory_space<vmem>>, vector<8x128xf32>
    %c0_8 = arith.constant 0 : index
    %c0_9 = arith.constant 0 : index
    %4 = vector.load %arg7[%c0_8, %c0_9] : memref<32x32xf32, #tpu.memory_space<vmem>>, vector<32x32xf32>
    %c0_10 = arith.constant 0 : index
    %c0_11 = arith.constant 0 : index
    %5 = vector.load %arg8[%c0_10, %c0_11] : memref<1x32xf32, #tpu.memory_space<vmem>>, vector<1x32xf32>
    %c0_12 = arith.constant 0 : index
    %c0_13 = arith.constant 0 : index
    %6 = vector.load %arg9[%c0_12, %c0_13] : memref<32x32xf32, #tpu.memory_space<vmem>>, vector<32x32xf32>
    %c0_14 = arith.constant 0 : index
    %c0_15 = arith.constant 0 : index
    %7 = vector.load %arg10[%c0_14, %c0_15] : memref<1x32xf32, #tpu.memory_space<vmem>>, vector<1x32xf32>
    %c0_16 = arith.constant 0 : index
    %c0_17 = arith.constant 0 : index
    %8 = vector.load %arg11[%c0_16, %c0_17] : memref<1x32xf32, #tpu.memory_space<vmem>>, vector<1x32xf32>
    %9 = vector.shape_cast %8 : vector<1x32xf32> to vector<1x1x32xf32>
    %c0_18 = arith.constant 0 : index
    %c0_19 = arith.constant 0 : index
    %10 = vector.load %arg12[%c0_18, %c0_19] : memref<1x1xf32, #tpu.memory_space<vmem>>, vector<1x1xf32>
    %cst = arith.constant 0.000000e+00 : f32
    %11 = vector.broadcast %cst : f32 to vector<2x32xf32>
    %cst_20 = arith.constant 0.000000e+00 : f32
    %12 = vector.broadcast %cst_20 : f32 to vector<2x32xf32>
    %13 = vector.extract_strided_slice %0 {offsets = [0, 0], sizes = [2, 1], strides = [1, 1]} : vector<2x8xf32> to vector<2x1xf32>
    %14 = vector.extract_strided_slice %1 {offsets = [0, 0, 0], sizes = [1, 1, 128], strides = [1, 1, 1]} : vector<8x1x128xf32> to vector<1x1x128xf32>
    %15 = vector.shape_cast %14 : vector<1x1x128xf32> to vector<1x128xf32>
    %16 = vector.broadcast %13 : vector<2x1xf32> to vector<2x128xf32>
    %17 = vector.broadcast %15 : vector<1x128xf32> to vector<2x128xf32>
    %18 = arith.mulf %16, %17 : vector<2x128xf32>
    %c0_21 = arith.constant 0 : index
    %c0_22 = arith.constant 0 : index
    %c0_23 = arith.constant 0 : index
    %19 = vector.load %arg2[%c0_21, %c0_22, %c0_23] : memref<8x32x128xf32, #tpu.memory_space<vmem>>, vector<1x32x128xf32>
    %20 = vector.shape_cast %19 : vector<1x32x128xf32> to vector<32x128xf32>
    %21 = vector.extract_strided_slice %2 {offsets = [0, 0], sizes = [1, 128], strides = [1, 1]} : vector<8x128xf32> to vector<1x128xf32>
    %cst_24 = arith.constant dense<0.000000e+00> : vector<2x128xf32>
    %22 = tpu.matmul %11, %20, %cst_24 {dimension_numbers = #tpu.dot_dimension_numbers<[1], [0], [0], [1], [0, 0, 1, 1], [], []>} : vector<2x32xf32>, vector<32x128xf32>, vector<2x128xf32> -> vector<2x128xf32>
    %23 = arith.addf %18, %22 : vector<2x128xf32>
    %24 = vector.broadcast %21 : vector<1x128xf32> to vector<2x128xf32>
    %25 = arith.addf %23, %24 : vector<2x128xf32>
    %26 = vector.extract_strided_slice %25 {offsets = [0, 0], sizes = [2, 32], strides = [1, 1]} : vector<2x128xf32> to vector<2x32xf32>
    %27 = arith.negf %26 : vector<2x32xf32>
    %28 = math.exp %27 : vector<2x32xf32>
    %cst_25 = arith.constant 1.000000e+00 : f32
    %29 = vector.broadcast %cst_25 : f32 to vector<2x32xf32>
    %30 = arith.addf %29, %28 : vector<2x32xf32>
    %31 = arith.divf %29, %30 : vector<2x32xf32>
    %32 = vector.extract_strided_slice %25 {offsets = [0, 32], sizes = [2, 32], strides = [1, 1]} : vector<2x128xf32> to vector<2x32xf32>
    %33 = arith.negf %32 : vector<2x32xf32>
    %34 = math.exp %33 : vector<2x32xf32>
    %cst_26 = arith.constant 1.000000e+00 : f32
    %35 = vector.broadcast %cst_26 : f32 to vector<2x32xf32>
    %36 = arith.addf %35, %34 : vector<2x32xf32>
    %37 = arith.divf %35, %36 : vector<2x32xf32>
    %38 = vector.extract_strided_slice %25 {offsets = [0, 64], sizes = [2, 32], strides = [1, 1]} : vector<2x128xf32> to vector<2x32xf32>
    %39 = math.tanh %38 : vector<2x32xf32>
    %40 = vector.extract_strided_slice %25 {offsets = [0, 96], sizes = [2, 32], strides = [1, 1]} : vector<2x128xf32> to vector<2x32xf32>
    %41 = arith.negf %40 : vector<2x32xf32>
    %42 = math.exp %41 : vector<2x32xf32>
    %cst_27 = arith.constant 1.000000e+00 : f32
    %43 = vector.broadcast %cst_27 : f32 to vector<2x32xf32>
    %44 = arith.addf %43, %42 : vector<2x32xf32>
    %45 = arith.divf %43, %44 : vector<2x32xf32>
    %46 = arith.mulf %37, %12 : vector<2x32xf32>
    %47 = arith.mulf %31, %39 : vector<2x32xf32>
    %48 = arith.addf %46, %47 : vector<2x32xf32>
    %49 = math.tanh %48 : vector<2x32xf32>
    %50 = arith.mulf %45, %49 : vector<2x32xf32>
    %51 = vector.extract_strided_slice %0 {offsets = [0, 1], sizes = [2, 1], strides = [1, 1]} : vector<2x8xf32> to vector<2x1xf32>
    %52 = vector.extract_strided_slice %1 {offsets = [1, 0, 0], sizes = [1, 1, 128], strides = [1, 1, 1]} : vector<8x1x128xf32> to vector<1x1x128xf32>
    %53 = vector.shape_cast %52 : vector<1x1x128xf32> to vector<1x128xf32>
    %54 = vector.broadcast %51 : vector<2x1xf32> to vector<2x128xf32>
    %55 = vector.broadcast %53 : vector<1x128xf32> to vector<2x128xf32>
    %56 = arith.mulf %54, %55 : vector<2x128xf32>
    %c1 = arith.constant 1 : index
    %c0_28 = arith.constant 0 : index
    %c0_29 = arith.constant 0 : index
    %57 = vector.load %arg2[%c1, %c0_28, %c0_29] : memref<8x32x128xf32, #tpu.memory_space<vmem>>, vector<1x32x128xf32>
    %58 = vector.shape_cast %57 : vector<1x32x128xf32> to vector<32x128xf32>
    %59 = vector.extract_strided_slice %2 {offsets = [1, 0], sizes = [1, 128], strides = [1, 1]} : vector<8x128xf32> to vector<1x128xf32>
    %cst_30 = arith.constant dense<0.000000e+00> : vector<2x128xf32>
    %60 = tpu.matmul %50, %58, %cst_30 {dimension_numbers = #tpu.dot_dimension_numbers<[1], [0], [0], [1], [0, 0, 1, 1], [], []>} : vector<2x32xf32>, vector<32x128xf32>, vector<2x128xf32> -> vector<2x128xf32>
    %61 = arith.addf %56, %60 : vector<2x128xf32>
    %62 = vector.broadcast %59 : vector<1x128xf32> to vector<2x128xf32>
    %63 = arith.addf %61, %62 : vector<2x128xf32>
    %64 = vector.extract_strided_slice %63 {offsets = [0, 0], sizes = [2, 32], strides = [1, 1]} : vector<2x128xf32> to vector<2x32xf32>
    %65 = arith.negf %64 : vector<2x32xf32>
    %66 = math.exp %65 : vector<2x32xf32>
    %cst_31 = arith.constant 1.000000e+00 : f32
    %67 = vector.broadcast %cst_31 : f32 to vector<2x32xf32>
    %68 = arith.addf %67, %66 : vector<2x32xf32>
    %69 = arith.divf %67, %68 : vector<2x32xf32>
    %70 = vector.extract_strided_slice %63 {offsets = [0, 32], sizes = [2, 32], strides = [1, 1]} : vector<2x128xf32> to vector<2x32xf32>
    %71 = arith.negf %70 : vector<2x32xf32>
    %72 = math.exp %71 : vector<2x32xf32>
    %cst_32 = arith.constant 1.000000e+00 : f32
    %73 = vector.broadcast %cst_32 : f32 to vector<2x32xf32>
    %74 = arith.addf %73, %72 : vector<2x32xf32>
    %75 = arith.divf %73, %74 : vector<2x32xf32>
    %76 = vector.extract_strided_slice %63 {offsets = [0, 64], sizes = [2, 32], strides = [1, 1]} : vector<2x128xf32> to vector<2x32xf32>
    %77 = math.tanh %76 : vector<2x32xf32>
    %78 = vector.extract_strided_slice %63 {offsets = [0, 96], sizes = [2, 32], strides = [1, 1]} : vector<2x128xf32> to vector<2x32xf32>
    %79 = arith.negf %78 : vector<2x32xf32>
    %80 = math.exp %79 : vector<2x32xf32>
    %cst_33 = arith.constant 1.000000e+00 : f32
    %81 = vector.broadcast %cst_33 : f32 to vector<2x32xf32>
    %82 = arith.addf %81, %80 : vector<2x32xf32>
    %83 = arith.divf %81, %82 : vector<2x32xf32>
    %84 = arith.mulf %75, %48 : vector<2x32xf32>
    %85 = arith.mulf %69, %77 : vector<2x32xf32>
    %86 = arith.addf %84, %85 : vector<2x32xf32>
    %87 = math.tanh %86 : vector<2x32xf32>
    %88 = arith.mulf %83, %87 : vector<2x32xf32>
    %89 = vector.extract_strided_slice %0 {offsets = [0, 2], sizes = [2, 1], strides = [1, 1]} : vector<2x8xf32> to vector<2x1xf32>
    %90 = vector.extract_strided_slice %1 {offsets = [2, 0, 0], sizes = [1, 1, 128], strides = [1, 1, 1]} : vector<8x1x128xf32> to vector<1x1x128xf32>
    %91 = vector.shape_cast %90 : vector<1x1x128xf32> to vector<1x128xf32>
    %92 = vector.broadcast %89 : vector<2x1xf32> to vector<2x128xf32>
    %93 = vector.broadcast %91 : vector<1x128xf32> to vector<2x128xf32>
    %94 = arith.mulf %92, %93 : vector<2x128xf32>
    %c2 = arith.constant 2 : index
    %c0_34 = arith.constant 0 : index
    %c0_35 = arith.constant 0 : index
    %95 = vector.load %arg2[%c2, %c0_34, %c0_35] : memref<8x32x128xf32, #tpu.memory_space<vmem>>, vector<1x32x128xf32>
    %96 = vector.shape_cast %95 : vector<1x32x128xf32> to vector<32x128xf32>
    %97 = vector.extract_strided_slice %2 {offsets = [2, 0], sizes = [1, 128], strides = [1, 1]} : vector<8x128xf32> to vector<1x128xf32>
    %cst_36 = arith.constant dense<0.000000e+00> : vector<2x128xf32>
    %98 = tpu.matmul %88, %96, %cst_36 {dimension_numbers = #tpu.dot_dimension_numbers<[1], [0], [0], [1], [0, 0, 1, 1], [], []>} : vector<2x32xf32>, vector<32x128xf32>, vector<2x128xf32> -> vector<2x128xf32>
    %99 = arith.addf %94, %98 : vector<2x128xf32>
    %100 = vector.broadcast %97 : vector<1x128xf32> to vector<2x128xf32>
    %101 = arith.addf %99, %100 : vector<2x128xf32>
    %102 = vector.extract_strided_slice %101 {offsets = [0, 0], sizes = [2, 32], strides = [1, 1]} : vector<2x128xf32> to vector<2x32xf32>
    %103 = arith.negf %102 : vector<2x32xf32>
    %104 = math.exp %103 : vector<2x32xf32>
    %cst_37 = arith.constant 1.000000e+00 : f32
    %105 = vector.broadcast %cst_37 : f32 to vector<2x32xf32>
    %106 = arith.addf %105, %104 : vector<2x32xf32>
    %107 = arith.divf %105, %106 : vector<2x32xf32>
    %108 = vector.extract_strided_slice %101 {offsets = [0, 32], sizes = [2, 32], strides = [1, 1]} : vector<2x128xf32> to vector<2x32xf32>
    %109 = arith.negf %108 : vector<2x32xf32>
    %110 = math.exp %109 : vector<2x32xf32>
    %cst_38 = arith.constant 1.000000e+00 : f32
    %111 = vector.broadcast %cst_38 : f32 to vector<2x32xf32>
    %112 = arith.addf %111, %110 : vector<2x32xf32>
    %113 = arith.divf %111, %112 : vector<2x32xf32>
    %114 = vector.extract_strided_slice %101 {offsets = [0, 64], sizes = [2, 32], strides = [1, 1]} : vector<2x128xf32> to vector<2x32xf32>
    %115 = math.tanh %114 : vector<2x32xf32>
    %116 = vector.extract_strided_slice %101 {offsets = [0, 96], sizes = [2, 32], strides = [1, 1]} : vector<2x128xf32> to vector<2x32xf32>
    %117 = arith.negf %116 : vector<2x32xf32>
    %118 = math.exp %117 : vector<2x32xf32>
    %cst_39 = arith.constant 1.000000e+00 : f32
    %119 = vector.broadcast %cst_39 : f32 to vector<2x32xf32>
    %120 = arith.addf %119, %118 : vector<2x32xf32>
    %121 = arith.divf %119, %120 : vector<2x32xf32>
    %122 = arith.mulf %113, %86 : vector<2x32xf32>
    %123 = arith.mulf %107, %115 : vector<2x32xf32>
    %124 = arith.addf %122, %123 : vector<2x32xf32>
    %125 = math.tanh %124 : vector<2x32xf32>
    %126 = arith.mulf %121, %125 : vector<2x32xf32>
    %127 = vector.extract_strided_slice %0 {offsets = [0, 3], sizes = [2, 1], strides = [1, 1]} : vector<2x8xf32> to vector<2x1xf32>
    %128 = vector.extract_strided_slice %1 {offsets = [3, 0, 0], sizes = [1, 1, 128], strides = [1, 1, 1]} : vector<8x1x128xf32> to vector<1x1x128xf32>
    %129 = vector.shape_cast %128 : vector<1x1x128xf32> to vector<1x128xf32>
    %130 = vector.broadcast %127 : vector<2x1xf32> to vector<2x128xf32>
    %131 = vector.broadcast %129 : vector<1x128xf32> to vector<2x128xf32>
    %132 = arith.mulf %130, %131 : vector<2x128xf32>
    %c3 = arith.constant 3 : index
    %c0_40 = arith.constant 0 : index
    %c0_41 = arith.constant 0 : index
    %133 = vector.load %arg2[%c3, %c0_40, %c0_41] : memref<8x32x128xf32, #tpu.memory_space<vmem>>, vector<1x32x128xf32>
    %134 = vector.shape_cast %133 : vector<1x32x128xf32> to vector<32x128xf32>
    %135 = vector.extract_strided_slice %2 {offsets = [3, 0], sizes = [1, 128], strides = [1, 1]} : vector<8x128xf32> to vector<1x128xf32>
    %cst_42 = arith.constant dense<0.000000e+00> : vector<2x128xf32>
    %136 = tpu.matmul %126, %134, %cst_42 {dimension_numbers = #tpu.dot_dimension_numbers<[1], [0], [0], [1], [0, 0, 1, 1], [], []>} : vector<2x32xf32>, vector<32x128xf32>, vector<2x128xf32> -> vector<2x128xf32>
    %137 = arith.addf %132, %136 : vector<2x128xf32>
    %138 = vector.broadcast %135 : vector<1x128xf32> to vector<2x128xf32>
    %139 = arith.addf %137, %138 : vector<2x128xf32>
    %140 = vector.extract_strided_slice %139 {offsets = [0, 0], sizes = [2, 32], strides = [1, 1]} : vector<2x128xf32> to vector<2x32xf32>
    %141 = arith.negf %140 : vector<2x32xf32>
    %142 = math.exp %141 : vector<2x32xf32>
    %cst_43 = arith.constant 1.000000e+00 : f32
    %143 = vector.broadcast %cst_43 : f32 to vector<2x32xf32>
    %144 = arith.addf %143, %142 : vector<2x32xf32>
    %145 = arith.divf %143, %144 : vector<2x32xf32>
    %146 = vector.extract_strided_slice %139 {offsets = [0, 32], sizes = [2, 32], strides = [1, 1]} : vector<2x128xf32> to vector<2x32xf32>
    %147 = arith.negf %146 : vector<2x32xf32>
    %148 = math.exp %147 : vector<2x32xf32>
    %cst_44 = arith.constant 1.000000e+00 : f32
    %149 = vector.broadcast %cst_44 : f32 to vector<2x32xf32>
    %150 = arith.addf %149, %148 : vector<2x32xf32>
    %151 = arith.divf %149, %150 : vector<2x32xf32>
    %152 = vector.extract_strided_slice %139 {offsets = [0, 64], sizes = [2, 32], strides = [1, 1]} : vector<2x128xf32> to vector<2x32xf32>
    %153 = math.tanh %152 : vector<2x32xf32>
    %154 = vector.extract_strided_slice %139 {offsets = [0, 96], sizes = [2, 32], strides = [1, 1]} : vector<2x128xf32> to vector<2x32xf32>
    %155 = arith.negf %154 : vector<2x32xf32>
    %156 = math.exp %155 : vector<2x32xf32>
    %cst_45 = arith.constant 1.000000e+00 : f32
    %157 = vector.broadcast %cst_45 : f32 to vector<2x32xf32>
    %158 = arith.addf %157, %156 : vector<2x32xf32>
    %159 = arith.divf %157, %158 : vector<2x32xf32>
    %160 = arith.mulf %151, %124 : vector<2x32xf32>
    %161 = arith.mulf %145, %153 : vector<2x32xf32>
    %162 = arith.addf %160, %161 : vector<2x32xf32>
    %163 = math.tanh %162 : vector<2x32xf32>
    %164 = arith.mulf %159, %163 : vector<2x32xf32>
    %165 = vector.extract_strided_slice %0 {offsets = [0, 4], sizes = [2, 1], strides = [1, 1]} : vector<2x8xf32> to vector<2x1xf32>
    %166 = vector.extract_strided_slice %1 {offsets = [4, 0, 0], sizes = [1, 1, 128], strides = [1, 1, 1]} : vector<8x1x128xf32> to vector<1x1x128xf32>
    %167 = vector.shape_cast %166 : vector<1x1x128xf32> to vector<1x128xf32>
    %168 = vector.broadcast %165 : vector<2x1xf32> to vector<2x128xf32>
    %169 = vector.broadcast %167 : vector<1x128xf32> to vector<2x128xf32>
    %170 = arith.mulf %168, %169 : vector<2x128xf32>
    %c4 = arith.constant 4 : index
    %c0_46 = arith.constant 0 : index
    %c0_47 = arith.constant 0 : index
    %171 = vector.load %arg2[%c4, %c0_46, %c0_47] : memref<8x32x128xf32, #tpu.memory_space<vmem>>, vector<1x32x128xf32>
    %172 = vector.shape_cast %171 : vector<1x32x128xf32> to vector<32x128xf32>
    %173 = vector.extract_strided_slice %2 {offsets = [4, 0], sizes = [1, 128], strides = [1, 1]} : vector<8x128xf32> to vector<1x128xf32>
    %cst_48 = arith.constant dense<0.000000e+00> : vector<2x128xf32>
    %174 = tpu.matmul %164, %172, %cst_48 {dimension_numbers = #tpu.dot_dimension_numbers<[1], [0], [0], [1], [0, 0, 1, 1], [], []>} : vector<2x32xf32>, vector<32x128xf32>, vector<2x128xf32> -> vector<2x128xf32>
    %175 = arith.addf %170, %174 : vector<2x128xf32>
    %176 = vector.broadcast %173 : vector<1x128xf32> to vector<2x128xf32>
    %177 = arith.addf %175, %176 : vector<2x128xf32>
    %178 = vector.extract_strided_slice %177 {offsets = [0, 0], sizes = [2, 32], strides = [1, 1]} : vector<2x128xf32> to vector<2x32xf32>
    %179 = arith.negf %178 : vector<2x32xf32>
    %180 = math.exp %179 : vector<2x32xf32>
    %cst_49 = arith.constant 1.000000e+00 : f32
    %181 = vector.broadcast %cst_49 : f32 to vector<2x32xf32>
    %182 = arith.addf %181, %180 : vector<2x32xf32>
    %183 = arith.divf %181, %182 : vector<2x32xf32>
    %184 = vector.extract_strided_slice %177 {offsets = [0, 32], sizes = [2, 32], strides = [1, 1]} : vector<2x128xf32> to vector<2x32xf32>
    %185 = arith.negf %184 : vector<2x32xf32>
    %186 = math.exp %185 : vector<2x32xf32>
    %cst_50 = arith.constant 1.000000e+00 : f32
    %187 = vector.broadcast %cst_50 : f32 to vector<2x32xf32>
    %188 = arith.addf %187, %186 : vector<2x32xf32>
    %189 = arith.divf %187, %188 : vector<2x32xf32>
    %190 = vector.extract_strided_slice %177 {offsets = [0, 64], sizes = [2, 32], strides = [1, 1]} : vector<2x128xf32> to vector<2x32xf32>
    %191 = math.tanh %190 : vector<2x32xf32>
    %192 = vector.extract_strided_slice %177 {offsets = [0, 96], sizes = [2, 32], strides = [1, 1]} : vector<2x128xf32> to vector<2x32xf32>
    %193 = arith.negf %192 : vector<2x32xf32>
    %194 = math.exp %193 : vector<2x32xf32>
    %cst_51 = arith.constant 1.000000e+00 : f32
    %195 = vector.broadcast %cst_51 : f32 to vector<2x32xf32>
    %196 = arith.addf %195, %194 : vector<2x32xf32>
    %197 = arith.divf %195, %196 : vector<2x32xf32>
    %198 = arith.mulf %189, %162 : vector<2x32xf32>
    %199 = arith.mulf %183, %191 : vector<2x32xf32>
    %200 = arith.addf %198, %199 : vector<2x32xf32>
    %201 = math.tanh %200 : vector<2x32xf32>
    %202 = arith.mulf %197, %201 : vector<2x32xf32>
    %203 = vector.extract_strided_slice %0 {offsets = [0, 5], sizes = [2, 1], strides = [1, 1]} : vector<2x8xf32> to vector<2x1xf32>
    %204 = vector.extract_strided_slice %1 {offsets = [5, 0, 0], sizes = [1, 1, 128], strides = [1, 1, 1]} : vector<8x1x128xf32> to vector<1x1x128xf32>
    %205 = vector.shape_cast %204 : vector<1x1x128xf32> to vector<1x128xf32>
    %206 = vector.broadcast %203 : vector<2x1xf32> to vector<2x128xf32>
    %207 = vector.broadcast %205 : vector<1x128xf32> to vector<2x128xf32>
    %208 = arith.mulf %206, %207 : vector<2x128xf32>
    %c5 = arith.constant 5 : index
    %c0_52 = arith.constant 0 : index
    %c0_53 = arith.constant 0 : index
    %209 = vector.load %arg2[%c5, %c0_52, %c0_53] : memref<8x32x128xf32, #tpu.memory_space<vmem>>, vector<1x32x128xf32>
    %210 = vector.shape_cast %209 : vector<1x32x128xf32> to vector<32x128xf32>
    %211 = vector.extract_strided_slice %2 {offsets = [5, 0], sizes = [1, 128], strides = [1, 1]} : vector<8x128xf32> to vector<1x128xf32>
    %cst_54 = arith.constant dense<0.000000e+00> : vector<2x128xf32>
    %212 = tpu.matmul %202, %210, %cst_54 {dimension_numbers = #tpu.dot_dimension_numbers<[1], [0], [0], [1], [0, 0, 1, 1], [], []>} : vector<2x32xf32>, vector<32x128xf32>, vector<2x128xf32> -> vector<2x128xf32>
    %213 = arith.addf %208, %212 : vector<2x128xf32>
    %214 = vector.broadcast %211 : vector<1x128xf32> to vector<2x128xf32>
    %215 = arith.addf %213, %214 : vector<2x128xf32>
    %216 = vector.extract_strided_slice %215 {offsets = [0, 0], sizes = [2, 32], strides = [1, 1]} : vector<2x128xf32> to vector<2x32xf32>
    %217 = arith.negf %216 : vector<2x32xf32>
    %218 = math.exp %217 : vector<2x32xf32>
    %cst_55 = arith.constant 1.000000e+00 : f32
    %219 = vector.broadcast %cst_55 : f32 to vector<2x32xf32>
    %220 = arith.addf %219, %218 : vector<2x32xf32>
    %221 = arith.divf %219, %220 : vector<2x32xf32>
    %222 = vector.extract_strided_slice %215 {offsets = [0, 32], sizes = [2, 32], strides = [1, 1]} : vector<2x128xf32> to vector<2x32xf32>
    %223 = arith.negf %222 : vector<2x32xf32>
    %224 = math.exp %223 : vector<2x32xf32>
    %cst_56 = arith.constant 1.000000e+00 : f32
    %225 = vector.broadcast %cst_56 : f32 to vector<2x32xf32>
    %226 = arith.addf %225, %224 : vector<2x32xf32>
    %227 = arith.divf %225, %226 : vector<2x32xf32>
    %228 = vector.extract_strided_slice %215 {offsets = [0, 64], sizes = [2, 32], strides = [1, 1]} : vector<2x128xf32> to vector<2x32xf32>
    %229 = math.tanh %228 : vector<2x32xf32>
    %230 = vector.extract_strided_slice %215 {offsets = [0, 96], sizes = [2, 32], strides = [1, 1]} : vector<2x128xf32> to vector<2x32xf32>
    %231 = arith.negf %230 : vector<2x32xf32>
    %232 = math.exp %231 : vector<2x32xf32>
    %cst_57 = arith.constant 1.000000e+00 : f32
    %233 = vector.broadcast %cst_57 : f32 to vector<2x32xf32>
    %234 = arith.addf %233, %232 : vector<2x32xf32>
    %235 = arith.divf %233, %234 : vector<2x32xf32>
    %236 = arith.mulf %227, %200 : vector<2x32xf32>
    %237 = arith.mulf %221, %229 : vector<2x32xf32>
    %238 = arith.addf %236, %237 : vector<2x32xf32>
    %239 = math.tanh %238 : vector<2x32xf32>
    %240 = arith.mulf %235, %239 : vector<2x32xf32>
    %241 = vector.extract_strided_slice %0 {offsets = [0, 6], sizes = [2, 1], strides = [1, 1]} : vector<2x8xf32> to vector<2x1xf32>
    %242 = vector.extract_strided_slice %1 {offsets = [6, 0, 0], sizes = [1, 1, 128], strides = [1, 1, 1]} : vector<8x1x128xf32> to vector<1x1x128xf32>
    %243 = vector.shape_cast %242 : vector<1x1x128xf32> to vector<1x128xf32>
    %244 = vector.broadcast %241 : vector<2x1xf32> to vector<2x128xf32>
    %245 = vector.broadcast %243 : vector<1x128xf32> to vector<2x128xf32>
    %246 = arith.mulf %244, %245 : vector<2x128xf32>
    %c6 = arith.constant 6 : index
    %c0_58 = arith.constant 0 : index
    %c0_59 = arith.constant 0 : index
    %247 = vector.load %arg2[%c6, %c0_58, %c0_59] : memref<8x32x128xf32, #tpu.memory_space<vmem>>, vector<1x32x128xf32>
    %248 = vector.shape_cast %247 : vector<1x32x128xf32> to vector<32x128xf32>
    %249 = vector.extract_strided_slice %2 {offsets = [6, 0], sizes = [1, 128], strides = [1, 1]} : vector<8x128xf32> to vector<1x128xf32>
    %cst_60 = arith.constant dense<0.000000e+00> : vector<2x128xf32>
    %250 = tpu.matmul %240, %248, %cst_60 {dimension_numbers = #tpu.dot_dimension_numbers<[1], [0], [0], [1], [0, 0, 1, 1], [], []>} : vector<2x32xf32>, vector<32x128xf32>, vector<2x128xf32> -> vector<2x128xf32>
    %251 = arith.addf %246, %250 : vector<2x128xf32>
    %252 = vector.broadcast %249 : vector<1x128xf32> to vector<2x128xf32>
    %253 = arith.addf %251, %252 : vector<2x128xf32>
    %254 = vector.extract_strided_slice %253 {offsets = [0, 0], sizes = [2, 32], strides = [1, 1]} : vector<2x128xf32> to vector<2x32xf32>
    %255 = arith.negf %254 : vector<2x32xf32>
    %256 = math.exp %255 : vector<2x32xf32>
    %cst_61 = arith.constant 1.000000e+00 : f32
    %257 = vector.broadcast %cst_61 : f32 to vector<2x32xf32>
    %258 = arith.addf %257, %256 : vector<2x32xf32>
    %259 = arith.divf %257, %258 : vector<2x32xf32>
    %260 = vector.extract_strided_slice %253 {offsets = [0, 32], sizes = [2, 32], strides = [1, 1]} : vector<2x128xf32> to vector<2x32xf32>
    %261 = arith.negf %260 : vector<2x32xf32>
    %262 = math.exp %261 : vector<2x32xf32>
    %cst_62 = arith.constant 1.000000e+00 : f32
    %263 = vector.broadcast %cst_62 : f32 to vector<2x32xf32>
    %264 = arith.addf %263, %262 : vector<2x32xf32>
    %265 = arith.divf %263, %264 : vector<2x32xf32>
    %266 = vector.extract_strided_slice %253 {offsets = [0, 64], sizes = [2, 32], strides = [1, 1]} : vector<2x128xf32> to vector<2x32xf32>
    %267 = math.tanh %266 : vector<2x32xf32>
    %268 = vector.extract_strided_slice %253 {offsets = [0, 96], sizes = [2, 32], strides = [1, 1]} : vector<2x128xf32> to vector<2x32xf32>
    %269 = arith.negf %268 : vector<2x32xf32>
    %270 = math.exp %269 : vector<2x32xf32>
    %cst_63 = arith.constant 1.000000e+00 : f32
    %271 = vector.broadcast %cst_63 : f32 to vector<2x32xf32>
    %272 = arith.addf %271, %270 : vector<2x32xf32>
    %273 = arith.divf %271, %272 : vector<2x32xf32>
    %274 = arith.mulf %265, %238 : vector<2x32xf32>
    %275 = arith.mulf %259, %267 : vector<2x32xf32>
    %276 = arith.addf %274, %275 : vector<2x32xf32>
    %277 = math.tanh %276 : vector<2x32xf32>
    %278 = arith.mulf %273, %277 : vector<2x32xf32>
    %279 = vector.extract_strided_slice %0 {offsets = [0, 7], sizes = [2, 1], strides = [1, 1]} : vector<2x8xf32> to vector<2x1xf32>
    %280 = vector.extract_strided_slice %1 {offsets = [7, 0, 0], sizes = [1, 1, 128], strides = [1, 1, 1]} : vector<8x1x128xf32> to vector<1x1x128xf32>
    %281 = vector.shape_cast %280 : vector<1x1x128xf32> to vector<1x128xf32>
    %282 = vector.broadcast %279 : vector<2x1xf32> to vector<2x128xf32>
    %283 = vector.broadcast %281 : vector<1x128xf32> to vector<2x128xf32>
    %284 = arith.mulf %282, %283 : vector<2x128xf32>
    %c7 = arith.constant 7 : index
    %c0_64 = arith.constant 0 : index
    %c0_65 = arith.constant 0 : index
    %285 = vector.load %arg2[%c7, %c0_64, %c0_65] : memref<8x32x128xf32, #tpu.memory_space<vmem>>, vector<1x32x128xf32>
    %286 = vector.shape_cast %285 : vector<1x32x128xf32> to vector<32x128xf32>
    %287 = vector.extract_strided_slice %2 {offsets = [7, 0], sizes = [1, 128], strides = [1, 1]} : vector<8x128xf32> to vector<1x128xf32>
    %cst_66 = arith.constant dense<0.000000e+00> : vector<2x128xf32>
    %288 = tpu.matmul %278, %286, %cst_66 {dimension_numbers = #tpu.dot_dimension_numbers<[1], [0], [0], [1], [0, 0, 1, 1], [], []>} : vector<2x32xf32>, vector<32x128xf32>, vector<2x128xf32> -> vector<2x128xf32>
    %289 = arith.addf %284, %288 : vector<2x128xf32>
    %290 = vector.broadcast %287 : vector<1x128xf32> to vector<2x128xf32>
    %291 = arith.addf %289, %290 : vector<2x128xf32>
    %292 = vector.extract_strided_slice %291 {offsets = [0, 0], sizes = [2, 32], strides = [1, 1]} : vector<2x128xf32> to vector<2x32xf32>
    %293 = arith.negf %292 : vector<2x32xf32>
    %294 = math.exp %293 : vector<2x32xf32>
    %cst_67 = arith.constant 1.000000e+00 : f32
    %295 = vector.broadcast %cst_67 : f32 to vector<2x32xf32>
    %296 = arith.addf %295, %294 : vector<2x32xf32>
    %297 = arith.divf %295, %296 : vector<2x32xf32>
    %298 = vector.extract_strided_slice %291 {offsets = [0, 32], sizes = [2, 32], strides = [1, 1]} : vector<2x128xf32> to vector<2x32xf32>
    %299 = arith.negf %298 : vector<2x32xf32>
    %300 = math.exp %299 : vector<2x32xf32>
    %cst_68 = arith.constant 1.000000e+00 : f32
    %301 = vector.broadcast %cst_68 : f32 to vector<2x32xf32>
    %302 = arith.addf %301, %300 : vector<2x32xf32>
    %303 = arith.divf %301, %302 : vector<2x32xf32>
    %304 = vector.extract_strided_slice %291 {offsets = [0, 64], sizes = [2, 32], strides = [1, 1]} : vector<2x128xf32> to vector<2x32xf32>
    %305 = math.tanh %304 : vector<2x32xf32>
    %306 = vector.extract_strided_slice %291 {offsets = [0, 96], sizes = [2, 32], strides = [1, 1]} : vector<2x128xf32> to vector<2x32xf32>
    %307 = arith.negf %306 : vector<2x32xf32>
    %308 = math.exp %307 : vector<2x32xf32>
    %cst_69 = arith.constant 1.000000e+00 : f32
    %309 = vector.broadcast %cst_69 : f32 to vector<2x32xf32>
    %310 = arith.addf %309, %308 : vector<2x32xf32>
    %311 = arith.divf %309, %310 : vector<2x32xf32>
    %312 = arith.mulf %303, %276 : vector<2x32xf32>
    %313 = arith.mulf %297, %305 : vector<2x32xf32>
    %314 = arith.addf %312, %313 : vector<2x32xf32>
    %315 = math.tanh %314 : vector<2x32xf32>
    %316 = arith.mulf %311, %315 : vector<2x32xf32>
    %317 = vector.shape_cast %50 : vector<2x32xf32> to vector<2x1x32xf32>
    %318 = vector.shape_cast %88 : vector<2x32xf32> to vector<2x1x32xf32>
    %319 = vector.shape_cast %126 : vector<2x32xf32> to vector<2x1x32xf32>
    %320 = vector.shape_cast %164 : vector<2x32xf32> to vector<2x1x32xf32>
    %321 = vector.shape_cast %202 : vector<2x32xf32> to vector<2x1x32xf32>
    %322 = vector.shape_cast %240 : vector<2x32xf32> to vector<2x1x32xf32>
    %323 = vector.shape_cast %278 : vector<2x32xf32> to vector<2x1x32xf32>
    %324 = vector.shape_cast %316 : vector<2x32xf32> to vector<2x1x32xf32>
    %325 = tpu.concatenate %317, %318, %319, %320, %321, %322, %323, %324 in 1 : vector<2x1x32xf32>, vector<2x1x32xf32>, vector<2x1x32xf32>, vector<2x1x32xf32>, vector<2x1x32xf32>, vector<2x1x32xf32>, vector<2x1x32xf32>, vector<2x1x32xf32> -> vector<2x8x32xf32>
    %326 = vector.shape_cast %325 : vector<2x8x32xf32> to vector<16x32xf32>
    %cst_70 = arith.constant dense<0.000000e+00> : vector<16x32xf32>
    %327 = tpu.matmul %326, %4, %cst_70 {dimension_numbers = #tpu.dot_dimension_numbers<[1], [0], [0], [1], [0, 0, 1, 1], [], []>} : vector<16x32xf32>, vector<32x32xf32>, vector<16x32xf32> -> vector<16x32xf32>
    %328 = vector.broadcast %5 : vector<1x32xf32> to vector<16x32xf32>
    %329 = arith.addf %327, %328 : vector<16x32xf32>
    %330 = vector.shape_cast %329 : vector<16x32xf32> to vector<2x8x32xf32>
    %cst_71 = arith.constant -1.000000e+00 : f32
    %331 = vector.broadcast %cst_71 : f32 to vector<2x32xf32>
    %c0_72 = arith.constant 0 : index
    %c0_73 = arith.constant 0 : index
    %c0_74 = arith.constant 0 : index
    %332 = vector.load %arg4[%c0_72, %c0_73, %c0_74] : memref<8x32x128xf32, #tpu.memory_space<vmem>>, vector<1x32x128xf32>
    %333 = vector.shape_cast %332 : vector<1x32x128xf32> to vector<32x128xf32>
    %cst_75 = arith.constant dense<0.000000e+00> : vector<2x128xf32>
    %334 = tpu.matmul %331, %333, %cst_75 {dimension_numbers = #tpu.dot_dimension_numbers<[1], [0], [0], [1], [0, 0, 1, 1], [], []>} : vector<2x32xf32>, vector<32x128xf32>, vector<2x128xf32> -> vector<2x128xf32>
    %c0_76 = arith.constant 0 : index
    %c0_77 = arith.constant 0 : index
    %c0_78 = arith.constant 0 : index
    %335 = vector.load %arg5[%c0_76, %c0_77, %c0_78] : memref<8x32x128xf32, #tpu.memory_space<vmem>>, vector<1x32x128xf32>
    %336 = vector.shape_cast %335 : vector<1x32x128xf32> to vector<32x128xf32>
    %337 = vector.extract_strided_slice %3 {offsets = [0, 0], sizes = [1, 128], strides = [1, 1]} : vector<8x128xf32> to vector<1x128xf32>
    %cst_79 = arith.constant dense<0.000000e+00> : vector<2x128xf32>
    %338 = tpu.matmul %316, %336, %cst_79 {dimension_numbers = #tpu.dot_dimension_numbers<[1], [0], [0], [1], [0, 0, 1, 1], [], []>} : vector<2x32xf32>, vector<32x128xf32>, vector<2x128xf32> -> vector<2x128xf32>
    %339 = arith.addf %334, %338 : vector<2x128xf32>
    %340 = vector.broadcast %337 : vector<1x128xf32> to vector<2x128xf32>
    %341 = arith.addf %339, %340 : vector<2x128xf32>
    %342 = vector.extract_strided_slice %341 {offsets = [0, 0], sizes = [2, 32], strides = [1, 1]} : vector<2x128xf32> to vector<2x32xf32>
    %343 = arith.negf %342 : vector<2x32xf32>
    %344 = math.exp %343 : vector<2x32xf32>
    %cst_80 = arith.constant 1.000000e+00 : f32
    %345 = vector.broadcast %cst_80 : f32 to vector<2x32xf32>
    %346 = arith.addf %345, %344 : vector<2x32xf32>
    %347 = arith.divf %345, %346 : vector<2x32xf32>
    %348 = vector.extract_strided_slice %341 {offsets = [0, 32], sizes = [2, 32], strides = [1, 1]} : vector<2x128xf32> to vector<2x32xf32>
    %349 = arith.negf %348 : vector<2x32xf32>
    %350 = math.exp %349 : vector<2x32xf32>
    %cst_81 = arith.constant 1.000000e+00 : f32
    %351 = vector.broadcast %cst_81 : f32 to vector<2x32xf32>
    %352 = arith.addf %351, %350 : vector<2x32xf32>
    %353 = arith.divf %351, %352 : vector<2x32xf32>
    %354 = vector.extract_strided_slice %341 {offsets = [0, 64], sizes = [2, 32], strides = [1, 1]} : vector<2x128xf32> to vector<2x32xf32>
    %355 = math.tanh %354 : vector<2x32xf32>
    %356 = vector.extract_strided_slice %341 {offsets = [0, 96], sizes = [2, 32], strides = [1, 1]} : vector<2x128xf32> to vector<2x32xf32>
    %357 = arith.negf %356 : vector<2x32xf32>
    %358 = math.exp %357 : vector<2x32xf32>
    %cst_82 = arith.constant 1.000000e+00 : f32
    %359 = vector.broadcast %cst_82 : f32 to vector<2x32xf32>
    %360 = arith.addf %359, %358 : vector<2x32xf32>
    %361 = arith.divf %359, %360 : vector<2x32xf32>
    %362 = arith.mulf %353, %314 : vector<2x32xf32>
    %363 = arith.mulf %347, %355 : vector<2x32xf32>
    %364 = arith.addf %362, %363 : vector<2x32xf32>
    %365 = math.tanh %364 : vector<2x32xf32>
    %366 = arith.mulf %361, %365 : vector<2x32xf32>
    %cst_83 = arith.constant dense<0.000000e+00> : vector<2x32xf32>
    %367 = tpu.matmul %364, %6, %cst_83 {dimension_numbers = #tpu.dot_dimension_numbers<[1], [0], [0], [1], [0, 0, 1, 1], [], []>} : vector<2x32xf32>, vector<32x32xf32>, vector<2x32xf32> -> vector<2x32xf32>
    %368 = vector.broadcast %7 : vector<1x32xf32> to vector<2x32xf32>
    %369 = arith.addf %367, %368 : vector<2x32xf32>
    %370 = vector.shape_cast %369 : vector<2x32xf32> to vector<2x1x32xf32>
    %371 = vector.broadcast %370 : vector<2x1x32xf32> to vector<2x8x32xf32>
    %372 = arith.addf %371, %330 : vector<2x8x32xf32>
    %373 = math.tanh %372 : vector<2x8x32xf32>
    %374 = vector.broadcast %9 : vector<1x1x32xf32> to vector<2x8x32xf32>
    %375 = arith.mulf %373, %374 : vector<2x8x32xf32>
    %cst_84 = arith.constant dense<0.000000e+00> : vector<2x8xf32>
    %376 = vector.multi_reduction <add>, %375, %cst_84 [2] : vector<2x8x32xf32> to vector<2x8xf32>
    %377 = vector.broadcast %10 : vector<1x1xf32> to vector<2x8xf32>
    %378 = arith.addf %376, %377 : vector<2x8xf32>
    %cst_85 = arith.constant dense<0xFF800000> : vector<2xf32>
    %379 = vector.multi_reduction <maximumf>, %378, %cst_85 [1] : vector<2x8xf32> to vector<2xf32>
    %380 = vector.shape_cast %379 : vector<2xf32> to vector<2x1xf32>
    %381 = vector.broadcast %380 : vector<2x1xf32> to vector<2x8xf32>
    %382 = arith.subf %378, %381 : vector<2x8xf32>
    %383 = math.exp %382 : vector<2x8xf32>
    %cst_86 = arith.constant dense<0.000000e+00> : vector<2xf32>
    %384 = vector.multi_reduction <add>, %383, %cst_86 [1] : vector<2x8xf32> to vector<2xf32>
    %385 = vector.shape_cast %384 : vector<2xf32> to vector<2x1xf32>
    %386 = vector.broadcast %385 : vector<2x1xf32> to vector<2x8xf32>
    %387 = arith.divf %383, %386 : vector<2x8xf32>
    %388 = vector.shape_cast %387 : vector<2x8xf32> to vector<2x8x1xf32>
    %389 = vector.broadcast %388 : vector<2x8x1xf32> to vector<2x8x32xf32>
    %390 = arith.mulf %389, %325 : vector<2x8x32xf32>
    %cst_87 = arith.constant dense<0.000000e+00> : vector<2x32xf32>
    %391 = vector.multi_reduction <add>, %390, %cst_87 [1] : vector<2x8x32xf32> to vector<2x32xf32>
    %c1_88 = arith.constant 1 : index
    %c0_89 = arith.constant 0 : index
    %c0_90 = arith.constant 0 : index
    %392 = vector.load %arg4[%c1_88, %c0_89, %c0_90] : memref<8x32x128xf32, #tpu.memory_space<vmem>>, vector<1x32x128xf32>
    %393 = vector.shape_cast %392 : vector<1x32x128xf32> to vector<32x128xf32>
    %cst_91 = arith.constant dense<0.000000e+00> : vector<2x128xf32>
    %394 = tpu.matmul %391, %393, %cst_91 {dimension_numbers = #tpu.dot_dimension_numbers<[1], [0], [0], [1], [0, 0, 1, 1], [], []>} : vector<2x32xf32>, vector<32x128xf32>, vector<2x128xf32> -> vector<2x128xf32>
    %c1_92 = arith.constant 1 : index
    %c0_93 = arith.constant 0 : index
    %c0_94 = arith.constant 0 : index
    %395 = vector.load %arg5[%c1_92, %c0_93, %c0_94] : memref<8x32x128xf32, #tpu.memory_space<vmem>>, vector<1x32x128xf32>
    %396 = vector.shape_cast %395 : vector<1x32x128xf32> to vector<32x128xf32>
    %397 = vector.extract_strided_slice %3 {offsets = [1, 0], sizes = [1, 128], strides = [1, 1]} : vector<8x128xf32> to vector<1x128xf32>
    %cst_95 = arith.constant dense<0.000000e+00> : vector<2x128xf32>
    %398 = tpu.matmul %366, %396, %cst_95 {dimension_numbers = #tpu.dot_dimension_numbers<[1], [0], [0], [1], [0, 0, 1, 1], [], []>} : vector<2x32xf32>, vector<32x128xf32>, vector<2x128xf32> -> vector<2x128xf32>
    %399 = arith.addf %394, %398 : vector<2x128xf32>
    %400 = vector.broadcast %397 : vector<1x128xf32> to vector<2x128xf32>
    %401 = arith.addf %399, %400 : vector<2x128xf32>
    %402 = vector.extract_strided_slice %401 {offsets = [0, 0], sizes = [2, 32], strides = [1, 1]} : vector<2x128xf32> to vector<2x32xf32>
    %403 = arith.negf %402 : vector<2x32xf32>
    %404 = math.exp %403 : vector<2x32xf32>
    %cst_96 = arith.constant 1.000000e+00 : f32
    %405 = vector.broadcast %cst_96 : f32 to vector<2x32xf32>
    %406 = arith.addf %405, %404 : vector<2x32xf32>
    %407 = arith.divf %405, %406 : vector<2x32xf32>
    %408 = vector.extract_strided_slice %401 {offsets = [0, 32], sizes = [2, 32], strides = [1, 1]} : vector<2x128xf32> to vector<2x32xf32>
    %409 = arith.negf %408 : vector<2x32xf32>
    %410 = math.exp %409 : vector<2x32xf32>
    %cst_97 = arith.constant 1.000000e+00 : f32
    %411 = vector.broadcast %cst_97 : f32 to vector<2x32xf32>
    %412 = arith.addf %411, %410 : vector<2x32xf32>
    %413 = arith.divf %411, %412 : vector<2x32xf32>
    %414 = vector.extract_strided_slice %401 {offsets = [0, 64], sizes = [2, 32], strides = [1, 1]} : vector<2x128xf32> to vector<2x32xf32>
    %415 = math.tanh %414 : vector<2x32xf32>
    %416 = vector.extract_strided_slice %401 {offsets = [0, 96], sizes = [2, 32], strides = [1, 1]} : vector<2x128xf32> to vector<2x32xf32>
    %417 = arith.negf %416 : vector<2x32xf32>
    %418 = math.exp %417 : vector<2x32xf32>
    %cst_98 = arith.constant 1.000000e+00 : f32
    %419 = vector.broadcast %cst_98 : f32 to vector<2x32xf32>
    %420 = arith.addf %419, %418 : vector<2x32xf32>
    %421 = arith.divf %419, %420 : vector<2x32xf32>
    %422 = arith.mulf %413, %364 : vector<2x32xf32>
    %423 = arith.mulf %407, %415 : vector<2x32xf32>
    %424 = arith.addf %422, %423 : vector<2x32xf32>
    %425 = math.tanh %424 : vector<2x32xf32>
    %426 = arith.mulf %421, %425 : vector<2x32xf32>
    %cst_99 = arith.constant dense<0.000000e+00> : vector<2x32xf32>
    %427 = tpu.matmul %424, %6, %cst_99 {dimension_numbers = #tpu.dot_dimension_numbers<[1], [0], [0], [1], [0, 0, 1, 1], [], []>} : vector<2x32xf32>, vector<32x32xf32>, vector<2x32xf32> -> vector<2x32xf32>
    %428 = vector.broadcast %7 : vector<1x32xf32> to vector<2x32xf32>
    %429 = arith.addf %427, %428 : vector<2x32xf32>
    %430 = vector.shape_cast %429 : vector<2x32xf32> to vector<2x1x32xf32>
    %431 = vector.broadcast %430 : vector<2x1x32xf32> to vector<2x8x32xf32>
    %432 = arith.addf %431, %330 : vector<2x8x32xf32>
    %433 = math.tanh %432 : vector<2x8x32xf32>
    %434 = vector.broadcast %9 : vector<1x1x32xf32> to vector<2x8x32xf32>
    %435 = arith.mulf %433, %434 : vector<2x8x32xf32>
    %cst_100 = arith.constant dense<0.000000e+00> : vector<2x8xf32>
    %436 = vector.multi_reduction <add>, %435, %cst_100 [2] : vector<2x8x32xf32> to vector<2x8xf32>
    %437 = vector.broadcast %10 : vector<1x1xf32> to vector<2x8xf32>
    %438 = arith.addf %436, %437 : vector<2x8xf32>
    %cst_101 = arith.constant dense<0xFF800000> : vector<2xf32>
    %439 = vector.multi_reduction <maximumf>, %438, %cst_101 [1] : vector<2x8xf32> to vector<2xf32>
    %440 = vector.shape_cast %439 : vector<2xf32> to vector<2x1xf32>
    %441 = vector.broadcast %440 : vector<2x1xf32> to vector<2x8xf32>
    %442 = arith.subf %438, %441 : vector<2x8xf32>
    %443 = math.exp %442 : vector<2x8xf32>
    %cst_102 = arith.constant dense<0.000000e+00> : vector<2xf32>
    %444 = vector.multi_reduction <add>, %443, %cst_102 [1] : vector<2x8xf32> to vector<2xf32>
    %445 = vector.shape_cast %444 : vector<2xf32> to vector<2x1xf32>
    %446 = vector.broadcast %445 : vector<2x1xf32> to vector<2x8xf32>
    %447 = arith.divf %443, %446 : vector<2x8xf32>
    %448 = vector.shape_cast %447 : vector<2x8xf32> to vector<2x8x1xf32>
    %449 = vector.broadcast %448 : vector<2x8x1xf32> to vector<2x8x32xf32>
    %450 = arith.mulf %449, %325 : vector<2x8x32xf32>
    %cst_103 = arith.constant dense<0.000000e+00> : vector<2x32xf32>
    %451 = vector.multi_reduction <add>, %450, %cst_103 [1] : vector<2x8x32xf32> to vector<2x32xf32>
    %c2_104 = arith.constant 2 : index
    %c0_105 = arith.constant 0 : index
    %c0_106 = arith.constant 0 : index
    %452 = vector.load %arg4[%c2_104, %c0_105, %c0_106] : memref<8x32x128xf32, #tpu.memory_space<vmem>>, vector<1x32x128xf32>
    %453 = vector.shape_cast %452 : vector<1x32x128xf32> to vector<32x128xf32>
    %cst_107 = arith.constant dense<0.000000e+00> : vector<2x128xf32>
    %454 = tpu.matmul %451, %453, %cst_107 {dimension_numbers = #tpu.dot_dimension_numbers<[1], [0], [0], [1], [0, 0, 1, 1], [], []>} : vector<2x32xf32>, vector<32x128xf32>, vector<2x128xf32> -> vector<2x128xf32>
    %c2_108 = arith.constant 2 : index
    %c0_109 = arith.constant 0 : index
    %c0_110 = arith.constant 0 : index
    %455 = vector.load %arg5[%c2_108, %c0_109, %c0_110] : memref<8x32x128xf32, #tpu.memory_space<vmem>>, vector<1x32x128xf32>
    %456 = vector.shape_cast %455 : vector<1x32x128xf32> to vector<32x128xf32>
    %457 = vector.extract_strided_slice %3 {offsets = [2, 0], sizes = [1, 128], strides = [1, 1]} : vector<8x128xf32> to vector<1x128xf32>
    %cst_111 = arith.constant dense<0.000000e+00> : vector<2x128xf32>
    %458 = tpu.matmul %426, %456, %cst_111 {dimension_numbers = #tpu.dot_dimension_numbers<[1], [0], [0], [1], [0, 0, 1, 1], [], []>} : vector<2x32xf32>, vector<32x128xf32>, vector<2x128xf32> -> vector<2x128xf32>
    %459 = arith.addf %454, %458 : vector<2x128xf32>
    %460 = vector.broadcast %457 : vector<1x128xf32> to vector<2x128xf32>
    %461 = arith.addf %459, %460 : vector<2x128xf32>
    %462 = vector.extract_strided_slice %461 {offsets = [0, 0], sizes = [2, 32], strides = [1, 1]} : vector<2x128xf32> to vector<2x32xf32>
    %463 = arith.negf %462 : vector<2x32xf32>
    %464 = math.exp %463 : vector<2x32xf32>
    %cst_112 = arith.constant 1.000000e+00 : f32
    %465 = vector.broadcast %cst_112 : f32 to vector<2x32xf32>
    %466 = arith.addf %465, %464 : vector<2x32xf32>
    %467 = arith.divf %465, %466 : vector<2x32xf32>
    %468 = vector.extract_strided_slice %461 {offsets = [0, 32], sizes = [2, 32], strides = [1, 1]} : vector<2x128xf32> to vector<2x32xf32>
    %469 = arith.negf %468 : vector<2x32xf32>
    %470 = math.exp %469 : vector<2x32xf32>
    %cst_113 = arith.constant 1.000000e+00 : f32
    %471 = vector.broadcast %cst_113 : f32 to vector<2x32xf32>
    %472 = arith.addf %471, %470 : vector<2x32xf32>
    %473 = arith.divf %471, %472 : vector<2x32xf32>
    %474 = vector.extract_strided_slice %461 {offsets = [0, 64], sizes = [2, 32], strides = [1, 1]} : vector<2x128xf32> to vector<2x32xf32>
    %475 = math.tanh %474 : vector<2x32xf32>
    %476 = vector.extract_strided_slice %461 {offsets = [0, 96], sizes = [2, 32], strides = [1, 1]} : vector<2x128xf32> to vector<2x32xf32>
    %477 = arith.negf %476 : vector<2x32xf32>
    %478 = math.exp %477 : vector<2x32xf32>
    %cst_114 = arith.constant 1.000000e+00 : f32
    %479 = vector.broadcast %cst_114 : f32 to vector<2x32xf32>
    %480 = arith.addf %479, %478 : vector<2x32xf32>
    %481 = arith.divf %479, %480 : vector<2x32xf32>
    %482 = arith.mulf %473, %424 : vector<2x32xf32>
    %483 = arith.mulf %467, %475 : vector<2x32xf32>
    %484 = arith.addf %482, %483 : vector<2x32xf32>
    %485 = math.tanh %484 : vector<2x32xf32>
    %486 = arith.mulf %481, %485 : vector<2x32xf32>
    %cst_115 = arith.constant dense<0.000000e+00> : vector<2x32xf32>
    %487 = tpu.matmul %484, %6, %cst_115 {dimension_numbers = #tpu.dot_dimension_numbers<[1], [0], [0], [1], [0, 0, 1, 1], [], []>} : vector<2x32xf32>, vector<32x32xf32>, vector<2x32xf32> -> vector<2x32xf32>
    %488 = vector.broadcast %7 : vector<1x32xf32> to vector<2x32xf32>
    %489 = arith.addf %487, %488 : vector<2x32xf32>
    %490 = vector.shape_cast %489 : vector<2x32xf32> to vector<2x1x32xf32>
    %491 = vector.broadcast %490 : vector<2x1x32xf32> to vector<2x8x32xf32>
    %492 = arith.addf %491, %330 : vector<2x8x32xf32>
    %493 = math.tanh %492 : vector<2x8x32xf32>
    %494 = vector.broadcast %9 : vector<1x1x32xf32> to vector<2x8x32xf32>
    %495 = arith.mulf %493, %494 : vector<2x8x32xf32>
    %cst_116 = arith.constant dense<0.000000e+00> : vector<2x8xf32>
    %496 = vector.multi_reduction <add>, %495, %cst_116 [2] : vector<2x8x32xf32> to vector<2x8xf32>
    %497 = vector.broadcast %10 : vector<1x1xf32> to vector<2x8xf32>
    %498 = arith.addf %496, %497 : vector<2x8xf32>
    %cst_117 = arith.constant dense<0xFF800000> : vector<2xf32>
    %499 = vector.multi_reduction <maximumf>, %498, %cst_117 [1] : vector<2x8xf32> to vector<2xf32>
    %500 = vector.shape_cast %499 : vector<2xf32> to vector<2x1xf32>
    %501 = vector.broadcast %500 : vector<2x1xf32> to vector<2x8xf32>
    %502 = arith.subf %498, %501 : vector<2x8xf32>
    %503 = math.exp %502 : vector<2x8xf32>
    %cst_118 = arith.constant dense<0.000000e+00> : vector<2xf32>
    %504 = vector.multi_reduction <add>, %503, %cst_118 [1] : vector<2x8xf32> to vector<2xf32>
    %505 = vector.shape_cast %504 : vector<2xf32> to vector<2x1xf32>
    %506 = vector.broadcast %505 : vector<2x1xf32> to vector<2x8xf32>
    %507 = arith.divf %503, %506 : vector<2x8xf32>
    %508 = vector.shape_cast %507 : vector<2x8xf32> to vector<2x8x1xf32>
    %509 = vector.broadcast %508 : vector<2x8x1xf32> to vector<2x8x32xf32>
    %510 = arith.mulf %509, %325 : vector<2x8x32xf32>
    %cst_119 = arith.constant dense<0.000000e+00> : vector<2x32xf32>
    %511 = vector.multi_reduction <add>, %510, %cst_119 [1] : vector<2x8x32xf32> to vector<2x32xf32>
    %c3_120 = arith.constant 3 : index
    %c0_121 = arith.constant 0 : index
    %c0_122 = arith.constant 0 : index
    %512 = vector.load %arg4[%c3_120, %c0_121, %c0_122] : memref<8x32x128xf32, #tpu.memory_space<vmem>>, vector<1x32x128xf32>
    %513 = vector.shape_cast %512 : vector<1x32x128xf32> to vector<32x128xf32>
    %cst_123 = arith.constant dense<0.000000e+00> : vector<2x128xf32>
    %514 = tpu.matmul %511, %513, %cst_123 {dimension_numbers = #tpu.dot_dimension_numbers<[1], [0], [0], [1], [0, 0, 1, 1], [], []>} : vector<2x32xf32>, vector<32x128xf32>, vector<2x128xf32> -> vector<2x128xf32>
    %c3_124 = arith.constant 3 : index
    %c0_125 = arith.constant 0 : index
    %c0_126 = arith.constant 0 : index
    %515 = vector.load %arg5[%c3_124, %c0_125, %c0_126] : memref<8x32x128xf32, #tpu.memory_space<vmem>>, vector<1x32x128xf32>
    %516 = vector.shape_cast %515 : vector<1x32x128xf32> to vector<32x128xf32>
    %517 = vector.extract_strided_slice %3 {offsets = [3, 0], sizes = [1, 128], strides = [1, 1]} : vector<8x128xf32> to vector<1x128xf32>
    %cst_127 = arith.constant dense<0.000000e+00> : vector<2x128xf32>
    %518 = tpu.matmul %486, %516, %cst_127 {dimension_numbers = #tpu.dot_dimension_numbers<[1], [0], [0], [1], [0, 0, 1, 1], [], []>} : vector<2x32xf32>, vector<32x128xf32>, vector<2x128xf32> -> vector<2x128xf32>
    %519 = arith.addf %514, %518 : vector<2x128xf32>
    %520 = vector.broadcast %517 : vector<1x128xf32> to vector<2x128xf32>
    %521 = arith.addf %519, %520 : vector<2x128xf32>
    %522 = vector.extract_strided_slice %521 {offsets = [0, 0], sizes = [2, 32], strides = [1, 1]} : vector<2x128xf32> to vector<2x32xf32>
    %523 = arith.negf %522 : vector<2x32xf32>
    %524 = math.exp %523 : vector<2x32xf32>
    %cst_128 = arith.constant 1.000000e+00 : f32
    %525 = vector.broadcast %cst_128 : f32 to vector<2x32xf32>
    %526 = arith.addf %525, %524 : vector<2x32xf32>
    %527 = arith.divf %525, %526 : vector<2x32xf32>
    %528 = vector.extract_strided_slice %521 {offsets = [0, 32], sizes = [2, 32], strides = [1, 1]} : vector<2x128xf32> to vector<2x32xf32>
    %529 = arith.negf %528 : vector<2x32xf32>
    %530 = math.exp %529 : vector<2x32xf32>
    %cst_129 = arith.constant 1.000000e+00 : f32
    %531 = vector.broadcast %cst_129 : f32 to vector<2x32xf32>
    %532 = arith.addf %531, %530 : vector<2x32xf32>
    %533 = arith.divf %531, %532 : vector<2x32xf32>
    %534 = vector.extract_strided_slice %521 {offsets = [0, 64], sizes = [2, 32], strides = [1, 1]} : vector<2x128xf32> to vector<2x32xf32>
    %535 = math.tanh %534 : vector<2x32xf32>
    %536 = vector.extract_strided_slice %521 {offsets = [0, 96], sizes = [2, 32], strides = [1, 1]} : vector<2x128xf32> to vector<2x32xf32>
    %537 = arith.negf %536 : vector<2x32xf32>
    %538 = math.exp %537 : vector<2x32xf32>
    %cst_130 = arith.constant 1.000000e+00 : f32
    %539 = vector.broadcast %cst_130 : f32 to vector<2x32xf32>
    %540 = arith.addf %539, %538 : vector<2x32xf32>
    %541 = arith.divf %539, %540 : vector<2x32xf32>
    %542 = arith.mulf %533, %484 : vector<2x32xf32>
    %543 = arith.mulf %527, %535 : vector<2x32xf32>
    %544 = arith.addf %542, %543 : vector<2x32xf32>
    %545 = math.tanh %544 : vector<2x32xf32>
    %546 = arith.mulf %541, %545 : vector<2x32xf32>
    %cst_131 = arith.constant dense<0.000000e+00> : vector<2x32xf32>
    %547 = tpu.matmul %544, %6, %cst_131 {dimension_numbers = #tpu.dot_dimension_numbers<[1], [0], [0], [1], [0, 0, 1, 1], [], []>} : vector<2x32xf32>, vector<32x32xf32>, vector<2x32xf32> -> vector<2x32xf32>
    %548 = vector.broadcast %7 : vector<1x32xf32> to vector<2x32xf32>
    %549 = arith.addf %547, %548 : vector<2x32xf32>
    %550 = vector.shape_cast %549 : vector<2x32xf32> to vector<2x1x32xf32>
    %551 = vector.broadcast %550 : vector<2x1x32xf32> to vector<2x8x32xf32>
    %552 = arith.addf %551, %330 : vector<2x8x32xf32>
    %553 = math.tanh %552 : vector<2x8x32xf32>
    %554 = vector.broadcast %9 : vector<1x1x32xf32> to vector<2x8x32xf32>
    %555 = arith.mulf %553, %554 : vector<2x8x32xf32>
    %cst_132 = arith.constant dense<0.000000e+00> : vector<2x8xf32>
    %556 = vector.multi_reduction <add>, %555, %cst_132 [2] : vector<2x8x32xf32> to vector<2x8xf32>
    %557 = vector.broadcast %10 : vector<1x1xf32> to vector<2x8xf32>
    %558 = arith.addf %556, %557 : vector<2x8xf32>
    %cst_133 = arith.constant dense<0xFF800000> : vector<2xf32>
    %559 = vector.multi_reduction <maximumf>, %558, %cst_133 [1] : vector<2x8xf32> to vector<2xf32>
    %560 = vector.shape_cast %559 : vector<2xf32> to vector<2x1xf32>
    %561 = vector.broadcast %560 : vector<2x1xf32> to vector<2x8xf32>
    %562 = arith.subf %558, %561 : vector<2x8xf32>
    %563 = math.exp %562 : vector<2x8xf32>
    %cst_134 = arith.constant dense<0.000000e+00> : vector<2xf32>
    %564 = vector.multi_reduction <add>, %563, %cst_134 [1] : vector<2x8xf32> to vector<2xf32>
    %565 = vector.shape_cast %564 : vector<2xf32> to vector<2x1xf32>
    %566 = vector.broadcast %565 : vector<2x1xf32> to vector<2x8xf32>
    %567 = arith.divf %563, %566 : vector<2x8xf32>
    %568 = vector.shape_cast %567 : vector<2x8xf32> to vector<2x8x1xf32>
    %569 = vector.broadcast %568 : vector<2x8x1xf32> to vector<2x8x32xf32>
    %570 = arith.mulf %569, %325 : vector<2x8x32xf32>
    %cst_135 = arith.constant dense<0.000000e+00> : vector<2x32xf32>
    %571 = vector.multi_reduction <add>, %570, %cst_135 [1] : vector<2x8x32xf32> to vector<2x32xf32>
    %c4_136 = arith.constant 4 : index
    %c0_137 = arith.constant 0 : index
    %c0_138 = arith.constant 0 : index
    %572 = vector.load %arg4[%c4_136, %c0_137, %c0_138] : memref<8x32x128xf32, #tpu.memory_space<vmem>>, vector<1x32x128xf32>
    %573 = vector.shape_cast %572 : vector<1x32x128xf32> to vector<32x128xf32>
    %cst_139 = arith.constant dense<0.000000e+00> : vector<2x128xf32>
    %574 = tpu.matmul %571, %573, %cst_139 {dimension_numbers = #tpu.dot_dimension_numbers<[1], [0], [0], [1], [0, 0, 1, 1], [], []>} : vector<2x32xf32>, vector<32x128xf32>, vector<2x128xf32> -> vector<2x128xf32>
    %c4_140 = arith.constant 4 : index
    %c0_141 = arith.constant 0 : index
    %c0_142 = arith.constant 0 : index
    %575 = vector.load %arg5[%c4_140, %c0_141, %c0_142] : memref<8x32x128xf32, #tpu.memory_space<vmem>>, vector<1x32x128xf32>
    %576 = vector.shape_cast %575 : vector<1x32x128xf32> to vector<32x128xf32>
    %577 = vector.extract_strided_slice %3 {offsets = [4, 0], sizes = [1, 128], strides = [1, 1]} : vector<8x128xf32> to vector<1x128xf32>
    %cst_143 = arith.constant dense<0.000000e+00> : vector<2x128xf32>
    %578 = tpu.matmul %546, %576, %cst_143 {dimension_numbers = #tpu.dot_dimension_numbers<[1], [0], [0], [1], [0, 0, 1, 1], [], []>} : vector<2x32xf32>, vector<32x128xf32>, vector<2x128xf32> -> vector<2x128xf32>
    %579 = arith.addf %574, %578 : vector<2x128xf32>
    %580 = vector.broadcast %577 : vector<1x128xf32> to vector<2x128xf32>
    %581 = arith.addf %579, %580 : vector<2x128xf32>
    %582 = vector.extract_strided_slice %581 {offsets = [0, 0], sizes = [2, 32], strides = [1, 1]} : vector<2x128xf32> to vector<2x32xf32>
    %583 = arith.negf %582 : vector<2x32xf32>
    %584 = math.exp %583 : vector<2x32xf32>
    %cst_144 = arith.constant 1.000000e+00 : f32
    %585 = vector.broadcast %cst_144 : f32 to vector<2x32xf32>
    %586 = arith.addf %585, %584 : vector<2x32xf32>
    %587 = arith.divf %585, %586 : vector<2x32xf32>
    %588 = vector.extract_strided_slice %581 {offsets = [0, 32], sizes = [2, 32], strides = [1, 1]} : vector<2x128xf32> to vector<2x32xf32>
    %589 = arith.negf %588 : vector<2x32xf32>
    %590 = math.exp %589 : vector<2x32xf32>
    %cst_145 = arith.constant 1.000000e+00 : f32
    %591 = vector.broadcast %cst_145 : f32 to vector<2x32xf32>
    %592 = arith.addf %591, %590 : vector<2x32xf32>
    %593 = arith.divf %591, %592 : vector<2x32xf32>
    %594 = vector.extract_strided_slice %581 {offsets = [0, 64], sizes = [2, 32], strides = [1, 1]} : vector<2x128xf32> to vector<2x32xf32>
    %595 = math.tanh %594 : vector<2x32xf32>
    %596 = vector.extract_strided_slice %581 {offsets = [0, 96], sizes = [2, 32], strides = [1, 1]} : vector<2x128xf32> to vector<2x32xf32>
    %597 = arith.negf %596 : vector<2x32xf32>
    %598 = math.exp %597 : vector<2x32xf32>
    %cst_146 = arith.constant 1.000000e+00 : f32
    %599 = vector.broadcast %cst_146 : f32 to vector<2x32xf32>
    %600 = arith.addf %599, %598 : vector<2x32xf32>
    %601 = arith.divf %599, %600 : vector<2x32xf32>
    %602 = arith.mulf %593, %544 : vector<2x32xf32>
    %603 = arith.mulf %587, %595 : vector<2x32xf32>
    %604 = arith.addf %602, %603 : vector<2x32xf32>
    %605 = math.tanh %604 : vector<2x32xf32>
    %606 = arith.mulf %601, %605 : vector<2x32xf32>
    %cst_147 = arith.constant dense<0.000000e+00> : vector<2x32xf32>
    %607 = tpu.matmul %604, %6, %cst_147 {dimension_numbers = #tpu.dot_dimension_numbers<[1], [0], [0], [1], [0, 0, 1, 1], [], []>} : vector<2x32xf32>, vector<32x32xf32>, vector<2x32xf32> -> vector<2x32xf32>
    %608 = vector.broadcast %7 : vector<1x32xf32> to vector<2x32xf32>
    %609 = arith.addf %607, %608 : vector<2x32xf32>
    %610 = vector.shape_cast %609 : vector<2x32xf32> to vector<2x1x32xf32>
    %611 = vector.broadcast %610 : vector<2x1x32xf32> to vector<2x8x32xf32>
    %612 = arith.addf %611, %330 : vector<2x8x32xf32>
    %613 = math.tanh %612 : vector<2x8x32xf32>
    %614 = vector.broadcast %9 : vector<1x1x32xf32> to vector<2x8x32xf32>
    %615 = arith.mulf %613, %614 : vector<2x8x32xf32>
    %cst_148 = arith.constant dense<0.000000e+00> : vector<2x8xf32>
    %616 = vector.multi_reduction <add>, %615, %cst_148 [2] : vector<2x8x32xf32> to vector<2x8xf32>
    %617 = vector.broadcast %10 : vector<1x1xf32> to vector<2x8xf32>
    %618 = arith.addf %616, %617 : vector<2x8xf32>
    %cst_149 = arith.constant dense<0xFF800000> : vector<2xf32>
    %619 = vector.multi_reduction <maximumf>, %618, %cst_149 [1] : vector<2x8xf32> to vector<2xf32>
    %620 = vector.shape_cast %619 : vector<2xf32> to vector<2x1xf32>
    %621 = vector.broadcast %620 : vector<2x1xf32> to vector<2x8xf32>
    %622 = arith.subf %618, %621 : vector<2x8xf32>
    %623 = math.exp %622 : vector<2x8xf32>
    %cst_150 = arith.constant dense<0.000000e+00> : vector<2xf32>
    %624 = vector.multi_reduction <add>, %623, %cst_150 [1] : vector<2x8xf32> to vector<2xf32>
    %625 = vector.shape_cast %624 : vector<2xf32> to vector<2x1xf32>
    %626 = vector.broadcast %625 : vector<2x1xf32> to vector<2x8xf32>
    %627 = arith.divf %623, %626 : vector<2x8xf32>
    %628 = vector.shape_cast %627 : vector<2x8xf32> to vector<2x8x1xf32>
    %629 = vector.broadcast %628 : vector<2x8x1xf32> to vector<2x8x32xf32>
    %630 = arith.mulf %629, %325 : vector<2x8x32xf32>
    %cst_151 = arith.constant dense<0.000000e+00> : vector<2x32xf32>
    %631 = vector.multi_reduction <add>, %630, %cst_151 [1] : vector<2x8x32xf32> to vector<2x32xf32>
    %c5_152 = arith.constant 5 : index
    %c0_153 = arith.constant 0 : index
    %c0_154 = arith.constant 0 : index
    %632 = vector.load %arg4[%c5_152, %c0_153, %c0_154] : memref<8x32x128xf32, #tpu.memory_space<vmem>>, vector<1x32x128xf32>
    %633 = vector.shape_cast %632 : vector<1x32x128xf32> to vector<32x128xf32>
    %cst_155 = arith.constant dense<0.000000e+00> : vector<2x128xf32>
    %634 = tpu.matmul %631, %633, %cst_155 {dimension_numbers = #tpu.dot_dimension_numbers<[1], [0], [0], [1], [0, 0, 1, 1], [], []>} : vector<2x32xf32>, vector<32x128xf32>, vector<2x128xf32> -> vector<2x128xf32>
    %c5_156 = arith.constant 5 : index
    %c0_157 = arith.constant 0 : index
    %c0_158 = arith.constant 0 : index
    %635 = vector.load %arg5[%c5_156, %c0_157, %c0_158] : memref<8x32x128xf32, #tpu.memory_space<vmem>>, vector<1x32x128xf32>
    %636 = vector.shape_cast %635 : vector<1x32x128xf32> to vector<32x128xf32>
    %637 = vector.extract_strided_slice %3 {offsets = [5, 0], sizes = [1, 128], strides = [1, 1]} : vector<8x128xf32> to vector<1x128xf32>
    %cst_159 = arith.constant dense<0.000000e+00> : vector<2x128xf32>
    %638 = tpu.matmul %606, %636, %cst_159 {dimension_numbers = #tpu.dot_dimension_numbers<[1], [0], [0], [1], [0, 0, 1, 1], [], []>} : vector<2x32xf32>, vector<32x128xf32>, vector<2x128xf32> -> vector<2x128xf32>
    %639 = arith.addf %634, %638 : vector<2x128xf32>
    %640 = vector.broadcast %637 : vector<1x128xf32> to vector<2x128xf32>
    %641 = arith.addf %639, %640 : vector<2x128xf32>
    %642 = vector.extract_strided_slice %641 {offsets = [0, 0], sizes = [2, 32], strides = [1, 1]} : vector<2x128xf32> to vector<2x32xf32>
    %643 = arith.negf %642 : vector<2x32xf32>
    %644 = math.exp %643 : vector<2x32xf32>
    %cst_160 = arith.constant 1.000000e+00 : f32
    %645 = vector.broadcast %cst_160 : f32 to vector<2x32xf32>
    %646 = arith.addf %645, %644 : vector<2x32xf32>
    %647 = arith.divf %645, %646 : vector<2x32xf32>
    %648 = vector.extract_strided_slice %641 {offsets = [0, 32], sizes = [2, 32], strides = [1, 1]} : vector<2x128xf32> to vector<2x32xf32>
    %649 = arith.negf %648 : vector<2x32xf32>
    %650 = math.exp %649 : vector<2x32xf32>
    %cst_161 = arith.constant 1.000000e+00 : f32
    %651 = vector.broadcast %cst_161 : f32 to vector<2x32xf32>
    %652 = arith.addf %651, %650 : vector<2x32xf32>
    %653 = arith.divf %651, %652 : vector<2x32xf32>
    %654 = vector.extract_strided_slice %641 {offsets = [0, 64], sizes = [2, 32], strides = [1, 1]} : vector<2x128xf32> to vector<2x32xf32>
    %655 = math.tanh %654 : vector<2x32xf32>
    %656 = vector.extract_strided_slice %641 {offsets = [0, 96], sizes = [2, 32], strides = [1, 1]} : vector<2x128xf32> to vector<2x32xf32>
    %657 = arith.negf %656 : vector<2x32xf32>
    %658 = math.exp %657 : vector<2x32xf32>
    %cst_162 = arith.constant 1.000000e+00 : f32
    %659 = vector.broadcast %cst_162 : f32 to vector<2x32xf32>
    %660 = arith.addf %659, %658 : vector<2x32xf32>
    %661 = arith.divf %659, %660 : vector<2x32xf32>
    %662 = arith.mulf %653, %604 : vector<2x32xf32>
    %663 = arith.mulf %647, %655 : vector<2x32xf32>
    %664 = arith.addf %662, %663 : vector<2x32xf32>
    %665 = math.tanh %664 : vector<2x32xf32>
    %666 = arith.mulf %661, %665 : vector<2x32xf32>
    %cst_163 = arith.constant dense<0.000000e+00> : vector<2x32xf32>
    %667 = tpu.matmul %664, %6, %cst_163 {dimension_numbers = #tpu.dot_dimension_numbers<[1], [0], [0], [1], [0, 0, 1, 1], [], []>} : vector<2x32xf32>, vector<32x32xf32>, vector<2x32xf32> -> vector<2x32xf32>
    %668 = vector.broadcast %7 : vector<1x32xf32> to vector<2x32xf32>
    %669 = arith.addf %667, %668 : vector<2x32xf32>
    %670 = vector.shape_cast %669 : vector<2x32xf32> to vector<2x1x32xf32>
    %671 = vector.broadcast %670 : vector<2x1x32xf32> to vector<2x8x32xf32>
    %672 = arith.addf %671, %330 : vector<2x8x32xf32>
    %673 = math.tanh %672 : vector<2x8x32xf32>
    %674 = vector.broadcast %9 : vector<1x1x32xf32> to vector<2x8x32xf32>
    %675 = arith.mulf %673, %674 : vector<2x8x32xf32>
    %cst_164 = arith.constant dense<0.000000e+00> : vector<2x8xf32>
    %676 = vector.multi_reduction <add>, %675, %cst_164 [2] : vector<2x8x32xf32> to vector<2x8xf32>
    %677 = vector.broadcast %10 : vector<1x1xf32> to vector<2x8xf32>
    %678 = arith.addf %676, %677 : vector<2x8xf32>
    %cst_165 = arith.constant dense<0xFF800000> : vector<2xf32>
    %679 = vector.multi_reduction <maximumf>, %678, %cst_165 [1] : vector<2x8xf32> to vector<2xf32>
    %680 = vector.shape_cast %679 : vector<2xf32> to vector<2x1xf32>
    %681 = vector.broadcast %680 : vector<2x1xf32> to vector<2x8xf32>
    %682 = arith.subf %678, %681 : vector<2x8xf32>
    %683 = math.exp %682 : vector<2x8xf32>
    %cst_166 = arith.constant dense<0.000000e+00> : vector<2xf32>
    %684 = vector.multi_reduction <add>, %683, %cst_166 [1] : vector<2x8xf32> to vector<2xf32>
    %685 = vector.shape_cast %684 : vector<2xf32> to vector<2x1xf32>
    %686 = vector.broadcast %685 : vector<2x1xf32> to vector<2x8xf32>
    %687 = arith.divf %683, %686 : vector<2x8xf32>
    %688 = vector.shape_cast %687 : vector<2x8xf32> to vector<2x8x1xf32>
    %689 = vector.broadcast %688 : vector<2x8x1xf32> to vector<2x8x32xf32>
    %690 = arith.mulf %689, %325 : vector<2x8x32xf32>
    %cst_167 = arith.constant dense<0.000000e+00> : vector<2x32xf32>
    %691 = vector.multi_reduction <add>, %690, %cst_167 [1] : vector<2x8x32xf32> to vector<2x32xf32>
    %c6_168 = arith.constant 6 : index
    %c0_169 = arith.constant 0 : index
    %c0_170 = arith.constant 0 : index
    %692 = vector.load %arg4[%c6_168, %c0_169, %c0_170] : memref<8x32x128xf32, #tpu.memory_space<vmem>>, vector<1x32x128xf32>
    %693 = vector.shape_cast %692 : vector<1x32x128xf32> to vector<32x128xf32>
    %cst_171 = arith.constant dense<0.000000e+00> : vector<2x128xf32>
    %694 = tpu.matmul %691, %693, %cst_171 {dimension_numbers = #tpu.dot_dimension_numbers<[1], [0], [0], [1], [0, 0, 1, 1], [], []>} : vector<2x32xf32>, vector<32x128xf32>, vector<2x128xf32> -> vector<2x128xf32>
    %c6_172 = arith.constant 6 : index
    %c0_173 = arith.constant 0 : index
    %c0_174 = arith.constant 0 : index
    %695 = vector.load %arg5[%c6_172, %c0_173, %c0_174] : memref<8x32x128xf32, #tpu.memory_space<vmem>>, vector<1x32x128xf32>
    %696 = vector.shape_cast %695 : vector<1x32x128xf32> to vector<32x128xf32>
    %697 = vector.extract_strided_slice %3 {offsets = [6, 0], sizes = [1, 128], strides = [1, 1]} : vector<8x128xf32> to vector<1x128xf32>
    %cst_175 = arith.constant dense<0.000000e+00> : vector<2x128xf32>
    %698 = tpu.matmul %666, %696, %cst_175 {dimension_numbers = #tpu.dot_dimension_numbers<[1], [0], [0], [1], [0, 0, 1, 1], [], []>} : vector<2x32xf32>, vector<32x128xf32>, vector<2x128xf32> -> vector<2x128xf32>
    %699 = arith.addf %694, %698 : vector<2x128xf32>
    %700 = vector.broadcast %697 : vector<1x128xf32> to vector<2x128xf32>
    %701 = arith.addf %699, %700 : vector<2x128xf32>
    %702 = vector.extract_strided_slice %701 {offsets = [0, 0], sizes = [2, 32], strides = [1, 1]} : vector<2x128xf32> to vector<2x32xf32>
    %703 = arith.negf %702 : vector<2x32xf32>
    %704 = math.exp %703 : vector<2x32xf32>
    %cst_176 = arith.constant 1.000000e+00 : f32
    %705 = vector.broadcast %cst_176 : f32 to vector<2x32xf32>
    %706 = arith.addf %705, %704 : vector<2x32xf32>
    %707 = arith.divf %705, %706 : vector<2x32xf32>
    %708 = vector.extract_strided_slice %701 {offsets = [0, 32], sizes = [2, 32], strides = [1, 1]} : vector<2x128xf32> to vector<2x32xf32>
    %709 = arith.negf %708 : vector<2x32xf32>
    %710 = math.exp %709 : vector<2x32xf32>
    %cst_177 = arith.constant 1.000000e+00 : f32
    %711 = vector.broadcast %cst_177 : f32 to vector<2x32xf32>
    %712 = arith.addf %711, %710 : vector<2x32xf32>
    %713 = arith.divf %711, %712 : vector<2x32xf32>
    %714 = vector.extract_strided_slice %701 {offsets = [0, 64], sizes = [2, 32], strides = [1, 1]} : vector<2x128xf32> to vector<2x32xf32>
    %715 = math.tanh %714 : vector<2x32xf32>
    %716 = vector.extract_strided_slice %701 {offsets = [0, 96], sizes = [2, 32], strides = [1, 1]} : vector<2x128xf32> to vector<2x32xf32>
    %717 = arith.negf %716 : vector<2x32xf32>
    %718 = math.exp %717 : vector<2x32xf32>
    %cst_178 = arith.constant 1.000000e+00 : f32
    %719 = vector.broadcast %cst_178 : f32 to vector<2x32xf32>
    %720 = arith.addf %719, %718 : vector<2x32xf32>
    %721 = arith.divf %719, %720 : vector<2x32xf32>
    %722 = arith.mulf %713, %664 : vector<2x32xf32>
    %723 = arith.mulf %707, %715 : vector<2x32xf32>
    %724 = arith.addf %722, %723 : vector<2x32xf32>
    %725 = math.tanh %724 : vector<2x32xf32>
    %726 = arith.mulf %721, %725 : vector<2x32xf32>
    %cst_179 = arith.constant dense<0.000000e+00> : vector<2x32xf32>
    %727 = tpu.matmul %724, %6, %cst_179 {dimension_numbers = #tpu.dot_dimension_numbers<[1], [0], [0], [1], [0, 0, 1, 1], [], []>} : vector<2x32xf32>, vector<32x32xf32>, vector<2x32xf32> -> vector<2x32xf32>
    %728 = vector.broadcast %7 : vector<1x32xf32> to vector<2x32xf32>
    %729 = arith.addf %727, %728 : vector<2x32xf32>
    %730 = vector.shape_cast %729 : vector<2x32xf32> to vector<2x1x32xf32>
    %731 = vector.broadcast %730 : vector<2x1x32xf32> to vector<2x8x32xf32>
    %732 = arith.addf %731, %330 : vector<2x8x32xf32>
    %733 = math.tanh %732 : vector<2x8x32xf32>
    %734 = vector.broadcast %9 : vector<1x1x32xf32> to vector<2x8x32xf32>
    %735 = arith.mulf %733, %734 : vector<2x8x32xf32>
    %cst_180 = arith.constant dense<0.000000e+00> : vector<2x8xf32>
    %736 = vector.multi_reduction <add>, %735, %cst_180 [2] : vector<2x8x32xf32> to vector<2x8xf32>
    %737 = vector.broadcast %10 : vector<1x1xf32> to vector<2x8xf32>
    %738 = arith.addf %736, %737 : vector<2x8xf32>
    %cst_181 = arith.constant dense<0xFF800000> : vector<2xf32>
    %739 = vector.multi_reduction <maximumf>, %738, %cst_181 [1] : vector<2x8xf32> to vector<2xf32>
    %740 = vector.shape_cast %739 : vector<2xf32> to vector<2x1xf32>
    %741 = vector.broadcast %740 : vector<2x1xf32> to vector<2x8xf32>
    %742 = arith.subf %738, %741 : vector<2x8xf32>
    %743 = math.exp %742 : vector<2x8xf32>
    %cst_182 = arith.constant dense<0.000000e+00> : vector<2xf32>
    %744 = vector.multi_reduction <add>, %743, %cst_182 [1] : vector<2x8xf32> to vector<2xf32>
    %745 = vector.shape_cast %744 : vector<2xf32> to vector<2x1xf32>
    %746 = vector.broadcast %745 : vector<2x1xf32> to vector<2x8xf32>
    %747 = arith.divf %743, %746 : vector<2x8xf32>
    %748 = vector.shape_cast %747 : vector<2x8xf32> to vector<2x8x1xf32>
    %749 = vector.broadcast %748 : vector<2x8x1xf32> to vector<2x8x32xf32>
    %750 = arith.mulf %749, %325 : vector<2x8x32xf32>
    %cst_183 = arith.constant dense<0.000000e+00> : vector<2x32xf32>
    %751 = vector.multi_reduction <add>, %750, %cst_183 [1] : vector<2x8x32xf32> to vector<2x32xf32>
    %c7_184 = arith.constant 7 : index
    %c0_185 = arith.constant 0 : index
    %c0_186 = arith.constant 0 : index
    %752 = vector.load %arg4[%c7_184, %c0_185, %c0_186] : memref<8x32x128xf32, #tpu.memory_space<vmem>>, vector<1x32x128xf32>
    %753 = vector.shape_cast %752 : vector<1x32x128xf32> to vector<32x128xf32>
    %cst_187 = arith.constant dense<0.000000e+00> : vector<2x128xf32>
    %754 = tpu.matmul %751, %753, %cst_187 {dimension_numbers = #tpu.dot_dimension_numbers<[1], [0], [0], [1], [0, 0, 1, 1], [], []>} : vector<2x32xf32>, vector<32x128xf32>, vector<2x128xf32> -> vector<2x128xf32>
    %c7_188 = arith.constant 7 : index
    %c0_189 = arith.constant 0 : index
    %c0_190 = arith.constant 0 : index
    %755 = vector.load %arg5[%c7_188, %c0_189, %c0_190] : memref<8x32x128xf32, #tpu.memory_space<vmem>>, vector<1x32x128xf32>
    %756 = vector.shape_cast %755 : vector<1x32x128xf32> to vector<32x128xf32>
    %757 = vector.extract_strided_slice %3 {offsets = [7, 0], sizes = [1, 128], strides = [1, 1]} : vector<8x128xf32> to vector<1x128xf32>
    %cst_191 = arith.constant dense<0.000000e+00> : vector<2x128xf32>
    %758 = tpu.matmul %726, %756, %cst_191 {dimension_numbers = #tpu.dot_dimension_numbers<[1], [0], [0], [1], [0, 0, 1, 1], [], []>} : vector<2x32xf32>, vector<32x128xf32>, vector<2x128xf32> -> vector<2x128xf32>
    %759 = arith.addf %754, %758 : vector<2x128xf32>
    %760 = vector.broadcast %757 : vector<1x128xf32> to vector<2x128xf32>
    %761 = arith.addf %759, %760 : vector<2x128xf32>
    %762 = vector.extract_strided_slice %761 {offsets = [0, 0], sizes = [2, 32], strides = [1, 1]} : vector<2x128xf32> to vector<2x32xf32>
    %763 = arith.negf %762 : vector<2x32xf32>
    %764 = math.exp %763 : vector<2x32xf32>
    %cst_192 = arith.constant 1.000000e+00 : f32
    %765 = vector.broadcast %cst_192 : f32 to vector<2x32xf32>
    %766 = arith.addf %765, %764 : vector<2x32xf32>
    %767 = arith.divf %765, %766 : vector<2x32xf32>
    %768 = vector.extract_strided_slice %761 {offsets = [0, 32], sizes = [2, 32], strides = [1, 1]} : vector<2x128xf32> to vector<2x32xf32>
    %769 = arith.negf %768 : vector<2x32xf32>
    %770 = math.exp %769 : vector<2x32xf32>
    %cst_193 = arith.constant 1.000000e+00 : f32
    %771 = vector.broadcast %cst_193 : f32 to vector<2x32xf32>
    %772 = arith.addf %771, %770 : vector<2x32xf32>
    %773 = arith.divf %771, %772 : vector<2x32xf32>
    %774 = vector.extract_strided_slice %761 {offsets = [0, 64], sizes = [2, 32], strides = [1, 1]} : vector<2x128xf32> to vector<2x32xf32>
    %775 = math.tanh %774 : vector<2x32xf32>
    %776 = arith.mulf %773, %724 : vector<2x32xf32>
    %777 = arith.mulf %767, %775 : vector<2x32xf32>
    %778 = arith.addf %776, %777 : vector<2x32xf32>
    %cst_194 = arith.constant dense<0.000000e+00> : vector<2x32xf32>
    %779 = tpu.matmul %778, %6, %cst_194 {dimension_numbers = #tpu.dot_dimension_numbers<[1], [0], [0], [1], [0, 0, 1, 1], [], []>} : vector<2x32xf32>, vector<32x32xf32>, vector<2x32xf32> -> vector<2x32xf32>
    %780 = vector.broadcast %7 : vector<1x32xf32> to vector<2x32xf32>
    %781 = arith.addf %779, %780 : vector<2x32xf32>
    %782 = vector.shape_cast %781 : vector<2x32xf32> to vector<2x1x32xf32>
    %783 = vector.broadcast %782 : vector<2x1x32xf32> to vector<2x8x32xf32>
    %784 = arith.addf %783, %330 : vector<2x8x32xf32>
    %785 = math.tanh %784 : vector<2x8x32xf32>
    %786 = vector.broadcast %9 : vector<1x1x32xf32> to vector<2x8x32xf32>
    %787 = arith.mulf %785, %786 : vector<2x8x32xf32>
    %cst_195 = arith.constant dense<0.000000e+00> : vector<2x8xf32>
    %788 = vector.multi_reduction <add>, %787, %cst_195 [2] : vector<2x8x32xf32> to vector<2x8xf32>
    %789 = vector.broadcast %10 : vector<1x1xf32> to vector<2x8xf32>
    %790 = arith.addf %788, %789 : vector<2x8xf32>
    %cst_196 = arith.constant dense<0xFF800000> : vector<2xf32>
    %791 = vector.multi_reduction <maximumf>, %790, %cst_196 [1] : vector<2x8xf32> to vector<2xf32>
    %792 = vector.shape_cast %791 : vector<2xf32> to vector<2x1xf32>
    %793 = vector.broadcast %792 : vector<2x1xf32> to vector<2x8xf32>
    %794 = arith.subf %790, %793 : vector<2x8xf32>
    %795 = math.exp %794 : vector<2x8xf32>
    %cst_197 = arith.constant dense<0.000000e+00> : vector<2xf32>
    %796 = vector.multi_reduction <add>, %795, %cst_197 [1] : vector<2x8xf32> to vector<2xf32>
    %797 = vector.shape_cast %796 : vector<2xf32> to vector<2x1xf32>
    %798 = vector.broadcast %797 : vector<2x1xf32> to vector<2x8xf32>
    %799 = arith.divf %795, %798 : vector<2x8xf32>
    %800 = vector.shape_cast %387 : vector<2x8xf32> to vector<1x2x8xf32>
    %801 = vector.shape_cast %447 : vector<2x8xf32> to vector<1x2x8xf32>
    %802 = vector.shape_cast %507 : vector<2x8xf32> to vector<1x2x8xf32>
    %803 = vector.shape_cast %567 : vector<2x8xf32> to vector<1x2x8xf32>
    %804 = vector.shape_cast %627 : vector<2x8xf32> to vector<1x2x8xf32>
    %805 = vector.shape_cast %687 : vector<2x8xf32> to vector<1x2x8xf32>
    %806 = vector.shape_cast %747 : vector<2x8xf32> to vector<1x2x8xf32>
    %807 = vector.shape_cast %799 : vector<2x8xf32> to vector<1x2x8xf32>
    %808 = tpu.concatenate %800, %801, %802, %803, %804, %805, %806, %807 in 0 : vector<1x2x8xf32>, vector<1x2x8xf32>, vector<1x2x8xf32>, vector<1x2x8xf32>, vector<1x2x8xf32>, vector<1x2x8xf32>, vector<1x2x8xf32>, vector<1x2x8xf32> -> vector<8x2x8xf32>
    %c0_198 = arith.constant 0 : index
    %c0_199 = arith.constant 0 : index
    %c0_200 = arith.constant 0 : index
    %809 = vector.load %arg13[%c0_198, %c0_199, %c0_200] : memref<8x2x8xf32, #tpu.memory_space<vmem>>, vector<8x2x8xf32>
    tpu.vector_store %arg13[%c0_198, %c0_199, %c0_200], %808 {strides = array<i32>} : memref<8x2x8xf32, #tpu.memory_space<vmem>>, vector<8x2x8xf32>,
    return
  }
}

</mosaic_0001>

<bundles_post_ra>
// kernel: tpu_custom_call.1
= control target key start
LH: loop header
LB: loop body
LE: loop exit
PB: predicated region body
PF: predicated region fallthrough
CT: control target
= control target key end

     0   :  { %s6898_s0 = inlined_call_operand.vmem [shape: f32[2,8], index: 0, kind: input, shape index: {}]   ;;  %s6899_s1 = inlined_call_operand.hbm [shape: f32[8,1,128], index: 1, kind: input, shape index: {}]   ;;  %s6900_s2 = inlined_call_operand.hbm [shape: f32[8,32,128], index: 2, kind: input, shape index: {}]   ;;  %s6901_s3 = inlined_call_operand.hbm [shape: f32[8,128], index: 3, kind: input, shape index: {}]   ;;  %s6902_s4 = inlined_call_operand.hbm [shape: f32[8,32,128], index: 4, kind: input, shape index: {}]   ;;  %s6903_s5 = inlined_call_operand.hbm [shape: f32[8,32,128], index: 5, kind: input, shape index: {}]   ;;  %s6904_s6 = inlined_call_operand.vmem [shape: f32[8,128], index: 6, kind: input, shape index: {}]   ;;  %s6905_s7 = inlined_call_operand.hbm [shape: f32[32,32], index: 7, kind: input, shape index: {}]   ;;  %s6906_s8 = inlined_call_operand.vmem [shape: f32[1,32], index: 8, kind: input, shape index: {}]   ;;  %s6907_s9 = inlined_call_operand.hbm [shape: f32[32,32], index: 9, kind: input, shape index: {}]   ;;  %s6908_s10 = inlined_call_operand.vmem [shape: f32[1,32], index: 10, kind: input, shape index: {}]   ;;  %s6909_s11 = inlined_call_operand.vmem [shape: f32[1,32], index: 11, kind: input, shape index: {}]   ;;  %s6910_s12 = inlined_call_operand.<no memory space> [shape: f32[1,1], index: 12, kind: input, shape index: {}]   ;;  %s6911_s13 = inlined_call_operand.hbm [shape: f32[8,2,8], index: 13, kind: output, shape index: {}]  }
   0x1   :  { %v18_v0 = vstv %s6910_s12 }
   0x2   :  { %19 = vst [vmem:[#allocation2] sm:$0x1] %v18_v0 }
   0x3   :  { %20 = vsyncpa [#allocation4], 0 }
   0x4   :  { %21 = vsyncpa [#allocation7], 0 }
   0x5   :  { %22 = vsyncpa [#allocation10], 0 }
   0x6   :  { %23 = vsyncpa [#allocation13], 0 }
   0x7   :  { %24 = vsyncpa [#allocation5], 0  ;;  %s5877_s27 = smov [#allocation6]  }
   0x8   :  { %s44_s28 = sshll.u32 %s5877_s27, 4  ;;  %s45_s28 = int_to_ptr.vmem [resolvable:$true] %s44_s28 }
   0x9   :  { %s5715_s29 = scalar_lea.vmem %s45_s28, 4096  ;;  %p5720_p1 = scmp.lt.s32.totalorder %s45_s28, %s45_s28 }
   0xa   :  { %p5716_p0 = scmp.ne.s32.totalorder %s45_s28, %s5715_s29  ;;  %p5721_p2 = scmp.lt.s32.totalorder %s5715_s29, %s5715_s29 }
   0xc   :  { %p5722_p3 = por %p5721_p2, %p5720_p1 }
   0xe   :  { %p5723_p4 = pnand %p5722_p3, %p5716_p0 }
  0x10   :  { %5726 = shalt.err (!%p5723_p4)
}
  0x11   :  { %s5878_s30 = smov 128   ;;  %s5879_s14 = smov 8  }
  0x12   :  { %50 = dma.hbm_to_vmem [thread:$0]  %s6900_s2, 4096, %s45_s28, [#allocation7], %s5878_s30, %s5878_s30, %s5879_s14  }
  0x13   :  { %s5880_s16 = smov [#allocation9]   ;;  %s5881_s18 = smov [#allocation12]  }
  0x14   :  { %s66_s17 = sshll.u32 %s5880_s16, 4  ;;  %s92_s19 = sshll.u32 %s5881_s18, 4  ;;  %s67_s17 = int_to_ptr.vmem [resolvable:$true] %s66_s17  ;;  %s93_s19 = int_to_ptr.vmem [resolvable:$true] %s92_s19 }
  0x15   :  { %s5735_s20 = scalar_lea.vmem %s67_s17, 4096  ;;  %p5740_p6 = scmp.lt.s32.totalorder %s67_s17, %s67_s17 }
  0x16   :  { %p5736_p5 = scmp.ne.s32.totalorder %s67_s17, %s5735_s20  ;;  %p5741_p7 = scmp.lt.s32.totalorder %s5735_s20, %s5735_s20 }
  0x18   :  { %p5742_p8 = por %p5741_p7, %p5740_p6 }
  0x1a   :  { %p5743_p9 = pnand %p5742_p8, %p5736_p5 }
  0x1c   :  { %5746 = shalt.err (!%p5743_p9)
}
  0x1d   :  { %72 = dma.hbm_to_vmem [thread:$0]  %s6902_s4, 4096, %s67_s17, [#allocation10], %s5878_s30, %s5878_s30, %s5879_s14  }
  0x1e   :  { %s5755_s2 = scalar_lea.vmem %s93_s19, 512  ;;  %p5760_p11 = scmp.lt.s32.totalorder %s93_s19, %s93_s19 }
  0x1f   :  { %p5756_p10 = scmp.ne.s32.totalorder %s93_s19, %s5755_s2  ;;  %p5761_p12 = scmp.lt.s32.totalorder %s5755_s2, %s5755_s2 }
  0x21   :  { %p5762_p13 = por %p5761_p12, %p5760_p11 }
  0x23   :  { %p5763_p0 = pnand %p5762_p13, %p5756_p10 }
  0x25   :  { %5766 = shalt.err (!%p5763_p0)
}
  0x26   :  { %98 = dma.hbm_to_vmem [thread:$0]  %s6905_s7, 512, %s93_s19, [#allocation13], %s5878_s30, %s5878_s30, %s5879_s14  }
  0x27   :  { %s5882_s25 = smov [#allocation3]  }
  0x28   :  { %s32_s26 = sshll.u32 %s5882_s25, 4  ;;  %s33_s26 = int_to_ptr.vmem [resolvable:$true] %s32_s26 }
  0x29   :  { %s5775_s27 = scalar_lea.vmem %s33_s26, 128  ;;  %p5780_p2 = scmp.lt.s32.totalorder %s33_s26, %s33_s26 }
  0x2a   :  { %p5776_p1 = scmp.ne.s32.totalorder %s33_s26, %s5775_s27  ;;  %p5781_p3 = scmp.lt.s32.totalorder %s5775_s27, %s5775_s27 }
  0x2c   :  { %p5782_p4 = por %p5781_p3, %p5780_p2 }
  0x2e   :  { %p5783_p5 = pnand %p5782_p4, %p5776_p1 }
  0x30   :  { %5786 = shalt.err (!%p5783_p5)
}
  0x31   :  { %s5883_s4 = smov 16   ;;  %s5884_s28 = smov 1  }
  0x32   :  { %38 = dma.hbm_to_vmem [thread:$0]  %s6899_s1, 128, %s33_s26, [#allocation4], %s5883_s4, %s5883_s4, %s5884_s28  }
  0x33   :  { %s5885_s15 = smov [#allocation8]   ;;  %s5886_s17 = smov [#allocation11]  }
  0x34   :  { %s57_s16 = sshll.u32 %s5885_s15, 4  ;;  %s78_s7 = sshll.u32 %s5886_s17, 4  ;;  %s58_s16 = int_to_ptr.vmem [resolvable:$true] %s57_s16  ;;  %s79_s7 = int_to_ptr.vmem [resolvable:$true] %s78_s7 }
  0x35   :  { %s5795_s18 = scalar_lea.vmem %s58_s16, 128  ;;  %p5800_p7 = scmp.lt.s32.totalorder %s58_s16, %s58_s16 }
  0x36   :  { %p5796_p6 = scmp.ne.s32.totalorder %s58_s16, %s5795_s18  ;;  %p5801_p8 = scmp.lt.s32.totalorder %s5795_s18, %s5795_s18 }
  0x38   :  { %p5802_p9 = por %p5801_p8, %p5800_p7 }
  0x3a   :  { %p5803_p10 = pnand %p5802_p9, %p5796_p6 }
  0x3c   :  { %5806 = shalt.err (!%p5803_p10)
}
  0x3d   :  { %60 = dma.hbm_to_vmem [thread:$0]  %s6901_s3, 128, %s58_s16, [#allocation7]  }
  0x3e   :  { %s5815_s21 = scalar_lea.vmem %s79_s7, 4096  ;;  %p5820_p12 = scmp.lt.s32.totalorder %s79_s7, %s79_s7 }
  0x3f   :  { %p5816_p11 = scmp.ne.s32.totalorder %s79_s7, %s5815_s21  ;;  %p5821_p13 = scmp.lt.s32.totalorder %s5815_s21, %s5815_s21 }
  0x41   :  { %p5822_p0 = por %p5821_p13, %p5820_p12 }
  0x43   :  { %p5823_p1 = pnand %p5822_p0, %p5816_p11 }
  0x45   :  { %5826 = shalt.err (!%p5823_p1)
}
  0x46   :  { %84 = dma.hbm_to_vmem [thread:$0]  %s6903_s5, 4096, %s79_s7, [#allocation10], %s5878_s30, %s5878_s30, %s5879_s14  }
  0x47   :  { %s5887_s2 = smov [#allocation14]  }
  0x48   :  { %s106_s23 = sshll.u32 %s5887_s2, 4  ;;  %s107_s23 = int_to_ptr.vmem [resolvable:$true] %s106_s23 }
  0x49   :  { %s5835_s24 = scalar_lea.vmem %s107_s23, 512  ;;  %p5840_p3 = scmp.lt.s32.totalorder %s107_s23, %s107_s23 }
  0x4a   :  { %p5836_p2 = scmp.ne.s32.totalorder %s107_s23, %s5835_s24  ;;  %p5841_p4 = scmp.lt.s32.totalorder %s5835_s24, %s5835_s24 }
  0x4c   :  { %p5842_p5 = por %p5841_p4, %p5840_p3 }
  0x4e   :  { %p5843_p6 = pnand %p5842_p5, %p5836_p2 }
  0x50   :  { %5846 = shalt.err (!%p5843_p6)
}
  0x51   :  { %112 = dma.hbm_to_vmem [thread:$0]  %s6907_s9, 512, %s107_s23, [#allocation13], %s5878_s30, %s5878_s30, %s5879_s14  }
  0x52   :  { %5867 = dma.done.wait [#allocation4], 128  }
  0x53   :  { %5868 = vsyncadd [#allocation4], 4294967168 }
  0x54   :  { %5869 = dma.done.wait [#allocation7], 4224  }
  0x55   :  { %5870 = vsyncadd [#allocation7], 4294963072 }
  0x56   :  { %5871 = dma.done.wait [#allocation10], 8192  }
  0x57   :  { %5872 = vsyncadd [#allocation10], 4294959104 }
  0x58   :  { %5873 = dma.done.wait [#allocation13], 1024  }
  0x59   :  { %5874 = vsyncadd [#allocation13], 4294966272  ;;  %v5888_v1 = vmov 0.0   ;;  %vm5889_vm0 = vmmov 0   ;;  %v5890_v2 = vmov 0   ;;  %v178_v3 = vld [vmem:[#allocation6 + $0x18] sm:$0xff]  ;;  %v254_v8 = vlaneseq }
  0x5a   :  { %5077 = vmatprep.subr.mxu0 %v5888_v1  ;;  %5085 = vmatprep.mubr.msk.f32.mxu0 %vm5889_vm0, %v5888_v1  ;;  %v177_v4 = vld [vmem:[#allocation6 + $0x10] sm:$0xff]  ;;  %v176_v6 = vld [vmem:[#allocation6 + $0x8] sm:$0xff]  ;;  %v175_v7 = vld [vmem:[#allocation6] sm:$0xff]  ;;  %s5892_s30 = smov 32   ;;  %v5893_v35 = vmov 1   ;;  %vm179_vm1 = vcmask 261120  }
  0x5b   :  { %5468 = vset.pattern.permute.xlu0 %v5890_v2  ;;  %5088 = vmatprep.subr.mxu1 %v5888_v1  ;;  %v6024_v5 = vld [vmem:[%s6898_s0] sm:$0x3]  ;;  %v6035_v9 = vshrl.u32 %v254_v8, 7  ;;  %v6040_v13 = vld [vmem:[#allocation8] sm:$0xff]  ;;  %s5891_s0 = smov 64   ;;  %v296_v32 = vld [vmem:[#allocation6 + $0x28] sm:$0xff] }
  0x5c   :  { %5096 = vmatprep.mubr.msk.f32.mxu1 %vm5889_vm0, %v5888_v1  ;;  %5078 = vmatpush3.msra.mxu0 %v178_v3  ;;  %v4850_v10 = vld [vmem:[#allocation3] ss:$0 sm:$0xff]  ;;  %v297_v31 = vld [vmem:[#allocation6 + $0x30] sm:$0xff]  ;;  %v295_v33 = vld [vmem:[#allocation6 + $0x20] sm:$0xff]  ;;  %v5894_v63 = vmov 1966171168  }
  0x5d   :  { %5079 = vmatprep.subr.mxu0 %v5888_v1  ;;  %165 = vperm.xlu0 %5468, %v6024_v5   ;;  %v6038_v12 = vsub.s32 0, %v6035_v9  ;;  %v298_v30 = vld [vmem:[#allocation6 + $0x38] sm:$0xff]  ;;  %v6058_v41 = vsub.s32 1, %v6035_v9  ;;  %v418_v59 = vld [vmem:[#allocation6 + $0x50] sm:$0xff]  ;;  %v417_v61 = vld [vmem:[#allocation6 + $0x48] sm:$0xff]  ;;  %v1131_v0 = vunpack.c.l.s4 %v5894_v63  ;;  %v5895_v3 = vmov 2  }
  0x5e   :  { %5080 = vmatpush3.msra.mxu0 %v177_v4  ;;  %5089 = vmatpush3.msra.mxu1 %v298_v30  ;;  %v4852_v39 = vld [vmem:[#allocation3 + $0x1] ss:$0 sm:$0xff]  ;;  %v416_v62 = vld [vmem:[#allocation6 + $0x40] sm:$0xff]  ;;  %vm1379_vm2 = vcmask 1040384   ;;  %vm1382_vm3 = vcmask 1041408   ;;  %vm1385_vm4 = vcmask 1042432  }
  0x5f   :  { %5081 = vmatprep.subr.mxu0 %v5888_v1  ;;  %v257_v15 = vrot.slane %v6040_v13, %v6038_v12  ;;  %5090 = vmatprep.subr.mxu1 %v5888_v1  ;;  %v378_v43 = vrot.slane %v6040_v13, %v6058_v41  ;;  %v419_v58 = vld [vmem:[#allocation6 + $0x58] sm:$0xff]  ;;  %v1132_v4 = vunpack.c.0.s8 %v1131_v0  ;;  %vm1388_vm5 = vcmask 1043456   ;;  %s5902_s27 = smov 96  }
  0x60   :  { %5082 = vmatpush3.msra.mxu0 %v176_v6  ;;  %5091 = vmatpush3.msra.mxu1 %v297_v31  ;;  %v4858_v63 = vld [vmem:[#allocation3 + $0x3] ss:$0 sm:$0xff]  ;;  %vm1391_vm6 = vcmask 1044480   ;;  %vm1394_vm7 = vcmask 1045504   ;;  %vm1397_vm8 = vcmask 1046528   ;;  %vm1830_vm9 = vcmask 1041409  }
  0x61   :  { %5083 = vmatprep.subr.mxu0 %v5888_v1  ;;  %5092 = vmatprep.subr.mxu1 %v5888_v1  ;;  %v6074_v6 = vsub.s32 %v1132_v4, %v6035_v9  ;;  %vm1833_vm10 = vcmask 58368   ;;  %vm1902_vm11 = vcmask 1048320  }
  0x62   :  { %5084 = vmatpush3.msra.mxu0 %v175_v7  ;;  %5093 = vmatpush3.msra.mxu1 %v296_v32 }
  0x63   :  { %5086 = vmatmul.mubr.f32.vlgmr.msra.gmra.mxu0 %v5888_v1  ;;  %5099 = vmatprep.subr.mxu0 %v5888_v1 }
  0x64   :  { %5107 = vmatprep.mubr.msk.f32.mxu0 %vm5889_vm0, %v5888_v1  ;;  %5094 = vmatprep.subr.mxu1 %v5888_v1 }
  0x65   :  { %5095 = vmatpush3.msra.mxu1 %v295_v33  ;;  %5469 = vset.pattern.permute.xlu1 %v5893_v35 }
  0x66   :  { %5110 = vmatprep.subr.mxu1 %v5888_v1  ;;  %5100 = vmatpush3.msra.mxu0 %v419_v58 }
  0x67   :  { %5101 = vmatprep.subr.mxu0 %v5888_v1  ;;  %5470 = vset.pattern.permute.xlu0 %v5895_v3  ;;  %v619_v3 = vsub.s32 3, %v6035_v9 }
  0x68   :  { %5102 = vmatpush3.msra.mxu0 %v418_v59 }
  0x69   :  { %5103 = vmatprep.subr.mxu0 %v5888_v1 }
  0x6a   :  { %5104 = vmatpush3.msra.mxu0 %v417_v61 }
  0x6b   :  { %5105 = vmatprep.subr.mxu0 %v5888_v1 }
  0x6c   :  { %5106 = vmatpush3.msra.mxu0 %v416_v62 }
  0x6d   :  { %5121 = vmatprep.subr.mxu0 %v5888_v1 }
  0xd8   :  { %v166_v11 = vpop.permute.xlu0 %165 }
  0xd9   :  { %v174_v14 = vmul.f32 %v4850_v10, %v166_v11 }
 0x123   :  { %v249_v16 = vpop.f32.mrf.mxu0 }
 0x124   :  { %v253_v17 = vadd.f32 %v249_v16, %v174_v14 }
 0x125   :  { %v5087_v18 = vpop.f32.mrf.mxu0 }
 0x126   :  { %v258_v19 = vadd.f32 %v257_v15, %v253_v17 }
 0x128   :  { %5478 = vtanh.f32 %v258_v19  ;;  %v4851_v21 = vmul.f32 -1.442695, %v258_v19 }
 0x12a   :  { %5480 = vpow2.f32 %v4851_v21 }
 0x135   :  { %v5479_v20 = vpop.eup %5478 }
 0x136   :  { %268 = vrot.lane.b32.xlu0 %v5479_v20, %s5891_s0 }
 0x137   :  { %v5481_v22 = vpop.eup %5480 }
 0x138   :  { %v262_v23 = vadd.f32 1.0, %v5481_v22 }
 0x13a   :  { %5482 = vrcp.f32 %v262_v23 }
 0x147   :  { %v5483_v24 = vpop.eup %5482 }
 0x148   :  { %v266_v27 = vmul.f32 0.0, %v5483_v24 }
 0x1a8   :  { %v269_v25 = vpop.permute.xlu0 %268 }
 0x1a9   :  { %v271_v26 = vmul.f32 %v5483_v24, %v269_v25 }
 0x1ab   :  { %273 = vrot.lane.b32.xlu1 %v271_v26, %s5892_s30  ;;  %v4855_v26 = vld [vmem:[#allocation3 + $0x2] ss:$0 sm:$0xff] }
 0x21d   :  { %v274_v28 = vpop.permute.xlu1 %273 }
 0x21e   :  { %v276_v29 = vadd.f32 %v274_v28, %v266_v27  ;;  %v498_v28 = vsub.s32 2, %v6035_v9 }
 0x220   :  { %5484 = vtanh.f32 %v276_v29  ;;  %v499_v30 = vrot.slane %v6040_v13, %v498_v28 }
 0x22d   :  { %v5485_v34 = vpop.eup %5484 }
 0x22e   :  { %279 = vrot.lane.b32.xlu1 %v5485_v34, %s5891_s0 }
 0x232   :  { %284 = vperm.xlu1 %5469, %v6024_v5  }
 0x236   :  { %5477 = vset.pattern.permute.xlu1 %v5890_v2 }
 0x2a0   :  { %v280_v36 = vpop.permute.xlu1 %279 }
 0x2a1   :  { %v282_v37 = vmul.f32 %v5483_v24, %v280_v36 }
 0x2a3   :  { %300 = vrot.lane.b32.xlu0 %v282_v37, %s5892_s30  ;;  %v1136_v10 = vrot.slane %v282_v37, %v6074_v6 }
 0x2a5   :  { %v1137_v15 = vcombine.high %v1136_v10, %v1136_v10  ;;  %v1144_v18 = vrot.slane %v1136_v10, %v6074_v6 }
 0x2a7   :  { %v1151_v21 = vrot.slane %v1137_v15, %v6074_v6 }
 0x2ad   :  { %v285_v40 = vpop.permute.xlu1 %284 }
 0x2ae   :  { %v293_v42 = vmul.f32 %v4852_v39, %v285_v40 }
 0x315   :  { %v301_v38 = vpop.permute.xlu0 %300 }
 0x316   :  { %5097 = vmatmul.mubr.msk.f32.vlgmr.msra.gmra.mxu1 %vm179_vm1, %v301_v38 }
 0x317   :  { %5118 = vmatprep.mubr.msk.f32.mxu1 %vm5889_vm0, %v5888_v1 }
 0x3d6   :  { %v370_v44 = vpop.f32.mrf.mxu1 }
 0x3d7   :  { %v374_v45 = vadd.f32 %v370_v44, %v293_v42 }
 0x3d8   :  { %v5098_v46 = vpop.f32.mrf.mxu1 }
 0x3d9   :  { %v379_v47 = vadd.f32 %v378_v43, %v374_v45  ;;  %v540_v46 = vld [vmem:[#allocation6 + $0x78] sm:$0xff] }
 0x3da   :  { %5111 = vmatpush3.msra.mxu1 %v540_v46 }
 0x3db   :  { %5486 = vtanh.f32 %v379_v47  ;;  %v4854_v49 = vmul.f32 -1.442695, %v379_v47  ;;  %v539_v47 = vld [vmem:[#allocation6 + $0x70] sm:$0xff]  ;;  %5112 = vmatprep.subr.mxu1 %v5888_v1 }
 0x3dc   :  { %5113 = vmatpush3.msra.mxu1 %v539_v47  ;;  %v740_v47 = vsub.s32 4, %v6035_v9 }
 0x3dd   :  { %5488 = vpow2.f32 %v4854_v49  ;;  %v538_v49 = vld [vmem:[#allocation6 + $0x68] sm:$0xff]  ;;  %5114 = vmatprep.subr.mxu1 %v5888_v1 }
 0x3de   :  { %5115 = vmatpush3.msra.mxu1 %v538_v49  ;;  %v741_v49 = vrot.slane %v6040_v13, %v740_v47 }
 0x3df   :  { %5116 = vmatprep.subr.mxu1 %v5888_v1 }
 0x3e8   :  { %v5487_v48 = vpop.eup %5486 }
 0x3e9   :  { %389 = vrot.lane.b32.xlu0 %v5487_v48, %s5891_s0 }
 0x3ea   :  { %v5489_v50 = vpop.eup %5488 }
 0x3eb   :  { %v383_v51 = vadd.f32 1.0, %v5489_v50  ;;  %v537_v50 = vld [vmem:[#allocation6 + $0x60] sm:$0xff] }
 0x3ec   :  { %5117 = vmatpush3.msra.mxu1 %v537_v50 }
 0x3ed   :  { %5490 = vrcp.f32 %v383_v51  ;;  %5132 = vmatprep.subr.mxu1 %v5888_v1  ;;  %v5896_v51 = vmov 3  }
 0x3fa   :  { %v5491_v52 = vpop.eup %5490 }
 0x3fb   :  { %v387_v55 = vmul.f32 %v5491_v52, %v276_v29 }
 0x45b   :  { %v390_v53 = vpop.permute.xlu0 %389 }
 0x45c   :  { %v392_v54 = vmul.f32 %v5491_v52, %v390_v53 }
 0x45e   :  { %394 = vrot.lane.b32.xlu1 %v392_v54, %s5892_s30 }
 0x4d0   :  { %v395_v56 = vpop.permute.xlu1 %394 }
 0x4d1   :  { %v6064_v57 = vadd.f32 %v395_v56, %v387_v55 }
 0x4d3   :  { %5492 = vtanh.f32 %v6064_v57 }
 0x4e0   :  { %v5493_v60 = vpop.eup %5492 }
 0x4e1   :  { %400 = vrot.lane.b32.xlu0 %v5493_v60, %s5891_s0 }
 0x4e5   :  { %405 = vperm.xlu0 %5470, %v6024_v5  }
 0x4e9   :  { %5471 = vset.pattern.permute.xlu0 %v5896_v51 }
 0x553   :  { %v401_v7 = vpop.permute.xlu0 %400 }
 0x554   :  { %v403_v11 = vmul.f32 %v5491_v52, %v401_v7  ;;  %v620_v7 = vrot.slane %v6040_v13, %v619_v3 }
 0x556   :  { %v1160_v14 = vrot.slane %v403_v11, %v6074_v6  ;;  %421 = vrot.lane.b32.xlu1 %v403_v11, %s5892_s30 }
 0x558   :  { %v1161_v16 = vcombine.high %v1160_v14, %v1160_v14  ;;  %v1168_v17 = vrot.slane %v1160_v14, %v6074_v6 }
 0x55a   :  { %v1175_v19 = vrot.slane %v1161_v16, %v6074_v6  ;;  %v1312_v20 = vrot.slane %v1168_v17, %v6038_v12 }
 0x55c   :  { %v1316_v22 = vrot.slane %v1175_v19, %v6038_v12  ;;  %v1380_v23 = vsel %vm1379_vm2, %v1144_v18, %v1312_v20 }
 0x55e   :  { %v1381_v24 = vsel %vm1379_vm2, %v1151_v21, %v1316_v22 }
 0x560   :  { %v406_v27 = vpop.permute.xlu0 %405 }
 0x561   :  { %v414_v29 = vmul.f32 %v4855_v26, %v406_v27  ;;  %v661_v26 = vld [vmem:[#allocation6 + $0x98] sm:$0xff]  ;;  %v660_v27 = vld [vmem:[#allocation6 + $0x90] sm:$0xff] }
 0x5c8   :  { %v422_v25 = vpop.permute.xlu1 %421 }
 0x5c9   :  { %5108 = vmatmul.mubr.msk.f32.vlgmr.msra.gmra.mxu0 %vm179_vm1, %v422_v25 }
 0x5ca   :  { %5129 = vmatprep.mubr.msk.f32.mxu0 %vm5889_vm0, %v5888_v1  ;;  %5122 = vmatpush3.msra.mxu0 %v661_v26  ;;  %v4864_v26 = vld [vmem:[#allocation3 + $0x5] ss:$0 sm:$0xff] }
 0x5cb   :  { %5123 = vmatprep.subr.mxu0 %v5888_v1 }
 0x5cc   :  { %5124 = vmatpush3.msra.mxu0 %v660_v27 }
 0x5cd   :  { %5125 = vmatprep.subr.mxu0 %v5888_v1 }
 0x689   :  { %v491_v31 = vpop.f32.mrf.mxu0 }
 0x68a   :  { %v495_v32 = vadd.f32 %v491_v31, %v414_v29  ;;  %v658_v31 = vld [vmem:[#allocation6 + $0x80] sm:$0xff] }
 0x68b   :  { %v5109_v33 = vpop.f32.mrf.mxu0 }
 0x68c   :  { %v500_v34 = vadd.f32 %v499_v30, %v495_v32  ;;  %v659_v30 = vld [vmem:[#allocation6 + $0x88] sm:$0xff]  ;;  %v5897_v32 = vmov 4  }
 0x68d   :  { %5126 = vmatpush3.msra.mxu0 %v659_v30 }
 0x68e   :  { %5494 = vtanh.f32 %v500_v34  ;;  %v4857_v36 = vmul.f32 -1.442695, %v500_v34  ;;  %5127 = vmatprep.subr.mxu0 %v5888_v1 }
 0x68f   :  { %5128 = vmatpush3.msra.mxu0 %v658_v31 }
 0x690   :  { %5496 = vpow2.f32 %v4857_v36  ;;  %5143 = vmatprep.subr.mxu0 %v5888_v1 }
 0x69b   :  { %v5495_v35 = vpop.eup %5494 }
 0x69c   :  { %510 = vrot.lane.b32.xlu1 %v5495_v35, %s5891_s0 }
 0x69d   :  { %v5497_v37 = vpop.eup %5496 }
 0x69e   :  { %v504_v38 = vadd.f32 1.0, %v5497_v37 }
 0x6a0   :  { %5498 = vrcp.f32 %v504_v38 }
 0x6ad   :  { %v5499_v39 = vpop.eup %5498 }
 0x6ae   :  { %v508_v43 = vmul.f32 %v5499_v39, %v6064_v57 }
 0x70e   :  { %v511_v40 = vpop.permute.xlu1 %510 }
 0x70f   :  { %v513_v42 = vmul.f32 %v5499_v39, %v511_v40 }
 0x711   :  { %515 = vrot.lane.b32.xlu1 %v513_v42, %s5892_s30 }
 0x783   :  { %v516_v44 = vpop.permute.xlu1 %515 }
 0x784   :  { %v518_v45 = vadd.f32 %v516_v44, %v508_v43 }
 0x786   :  { %5500 = vtanh.f32 %v518_v45 }
 0x793   :  { %v5501_v48 = vpop.eup %5500 }
 0x794   :  { %521 = vrot.lane.b32.xlu0 %v5501_v48, %s5891_s0 }
 0x798   :  { %526 = vperm.xlu0 %5471, %v6024_v5  }
 0x79c   :  { %5472 = vset.pattern.permute.xlu0 %v5897_v32 }
 0x806   :  { %v522_v52 = vpop.permute.xlu0 %521 }
 0x807   :  { %v524_v53 = vmul.f32 %v5499_v39, %v522_v52 }
 0x809   :  { %v1182_v54 = vrot.slane %v524_v53, %v6074_v6  ;;  %542 = vrot.lane.b32.xlu1 %v524_v53, %s5892_s30 }
 0x80b   :  { %v1183_v55 = vcombine.high %v1182_v54, %v1182_v54  ;;  %v1190_v56 = vrot.slane %v1182_v54, %v6074_v6 }
 0x80d   :  { %v1197_v57 = vrot.slane %v1183_v55, %v6074_v6  ;;  %v1322_v58 = vrot.slane %v1190_v56, %v6038_v12 }
 0x80f   :  { %v1326_v59 = vrot.slane %v1197_v57, %v6038_v12  ;;  %v1383_v60 = vsel %vm1382_vm3, %v1380_v23, %v1322_v58 }
 0x811   :  { %v1384_v61 = vsel %vm1382_vm3, %v1381_v24, %v1326_v59 }
 0x813   :  { %v527_v0 = vpop.permute.xlu0 %526 }
 0x814   :  { %v535_v4 = vmul.f32 %v4858_v63, %v527_v0  ;;  %v782_v0 = vld [vmem:[#allocation6 + $0xb8] sm:$0xff] }
 0x87b   :  { %v543_v62 = vpop.permute.xlu1 %542 }
 0x87c   :  { %5119 = vmatmul.mubr.msk.f32.vlgmr.msra.gmra.mxu1 %vm179_vm1, %v543_v62 }
 0x87d   :  { %5140 = vmatprep.mubr.msk.f32.mxu1 %vm5889_vm0, %v5888_v1  ;;  %5133 = vmatpush3.msra.mxu1 %v782_v0 }
 0x87e   :  { %5134 = vmatprep.subr.mxu1 %v5888_v1 }
 0x93c   :  { %v612_v10 = vpop.f32.mrf.mxu1 }
 0x93d   :  { %v616_v11 = vadd.f32 %v612_v10, %v535_v4  ;;  %v781_v4 = vld [vmem:[#allocation6 + $0xb0] sm:$0xff]  ;;  %v780_v10 = vld [vmem:[#allocation6 + $0xa8] sm:$0xff] }
 0x93e   :  { %v5120_v14 = vpop.f32.mrf.mxu1  ;;  %5135 = vmatpush3.msra.mxu1 %v781_v4  ;;  %v4867_v4 = vld [vmem:[#allocation3 + $0x6] ss:$0 sm:$0xff] }
 0x93f   :  { %v621_v15 = vadd.f32 %v620_v7, %v616_v11  ;;  %5136 = vmatprep.subr.mxu1 %v5888_v1  ;;  %v779_v11 = vld [vmem:[#allocation6 + $0xa0] sm:$0xff]  ;;  %v5898_v14 = vmov 5  }
 0x940   :  { %5137 = vmatpush3.msra.mxu1 %v780_v10  ;;  %v982_v10 = vsub.s32 6, %v6035_v9 }
 0x941   :  { %5502 = vtanh.f32 %v621_v15  ;;  %v4860_v17 = vmul.f32 -1.442695, %v621_v15  ;;  %5138 = vmatprep.subr.mxu1 %v5888_v1 }
 0x942   :  { %5139 = vmatpush3.msra.mxu1 %v779_v11 }
 0x943   :  { %5504 = vpow2.f32 %v4860_v17  ;;  %5154 = vmatprep.subr.mxu1 %v5888_v1 }
 0x94e   :  { %v5503_v16 = vpop.eup %5502 }
 0x94f   :  { %631 = vrot.lane.b32.xlu1 %v5503_v16, %s5891_s0 }
 0x950   :  { %v5505_v18 = vpop.eup %5504 }
 0x951   :  { %v625_v19 = vadd.f32 1.0, %v5505_v18 }
 0x953   :  { %5506 = vrcp.f32 %v625_v19 }
 0x960   :  { %v5507_v20 = vpop.eup %5506 }
 0x961   :  { %v629_v23 = vmul.f32 %v5507_v20, %v518_v45  ;;  %v4861_v45 = vld [vmem:[#allocation3 + $0x4] ss:$0 sm:$0xff] }
 0x9c1   :  { %v632_v21 = vpop.permute.xlu1 %631 }
 0x9c2   :  { %v634_v22 = vmul.f32 %v5507_v20, %v632_v21 }
 0x9c4   :  { %636 = vrot.lane.b32.xlu1 %v634_v22, %s5892_s30 }
 0xa36   :  { %v637_v24 = vpop.permute.xlu1 %636 }
 0xa37   :  { %v639_v25 = vadd.f32 %v637_v24, %v629_v23 }
 0xa39   :  { %5508 = vtanh.f32 %v639_v25 }
 0xa46   :  { %v5509_v29 = vpop.eup %5508 }
 0xa47   :  { %642 = vrot.lane.b32.xlu0 %v5509_v29, %s5891_s0  ;;  %v861_v29 = vsub.s32 5, %v6035_v9 }
 0xa49   :  { %v862_v31 = vrot.slane %v6040_v13, %v861_v29 }
 0xa4b   :  { %647 = vperm.xlu0 %5472, %v6024_v5  }
 0xa4f   :  { %5473 = vset.pattern.permute.xlu0 %v5898_v14  ;;  %v983_v14 = vrot.slane %v6040_v13, %v982_v10 }
 0xab9   :  { %v643_v33 = vpop.permute.xlu0 %642 }
 0xaba   :  { %v645_v34 = vmul.f32 %v5507_v20, %v643_v33 }
 0xabc   :  { %v1204_v35 = vrot.slane %v645_v34, %v6074_v6  ;;  %663 = vrot.lane.b32.xlu1 %v645_v34, %s5892_s30 }
 0xabe   :  { %v1205_v36 = vcombine.high %v1204_v35, %v1204_v35  ;;  %v1212_v37 = vrot.slane %v1204_v35, %v6074_v6 }
 0xac0   :  { %v1219_v38 = vrot.slane %v1205_v36, %v6074_v6  ;;  %v1332_v39 = vrot.slane %v1212_v37, %v6038_v12 }
 0xac2   :  { %v1336_v40 = vrot.slane %v1219_v38, %v6038_v12  ;;  %v1386_v42 = vsel %vm1385_vm4, %v1383_v60, %v1332_v39 }
 0xac4   :  { %v1387_v43 = vsel %vm1385_vm4, %v1384_v61, %v1336_v40 }
 0xac6   :  { %v648_v46 = vpop.permute.xlu0 %647 }
 0xac7   :  { %v656_v48 = vmul.f32 %v4861_v45, %v648_v46 }
 0xb2e   :  { %v664_v44 = vpop.permute.xlu1 %663 }
 0xb2f   :  { %5130 = vmatmul.mubr.msk.f32.vlgmr.msra.gmra.mxu0 %vm179_vm1, %v664_v44 }
 0xb30   :  { %5151 = vmatprep.mubr.msk.f32.mxu0 %vm5889_vm0, %v5888_v1 }
 0xbef   :  { %v733_v50 = vpop.f32.mrf.mxu0 }
 0xbf0   :  { %v737_v51 = vadd.f32 %v733_v50, %v656_v48  ;;  %v903_v48 = vld [vmem:[#allocation6 + $0xd8] sm:$0xff] }
 0xbf1   :  { %v5131_v52 = vpop.f32.mrf.mxu0  ;;  %5144 = vmatpush3.msra.mxu0 %v903_v48  ;;  %v4870_v48 = vld [vmem:[#allocation3 + $0x7] ss:$0 sm:$0xff] }
 0xbf2   :  { %v742_v53 = vadd.f32 %v741_v49, %v737_v51  ;;  %v902_v49 = vld [vmem:[#allocation6 + $0xd0] sm:$0xff]  ;;  %5145 = vmatprep.subr.mxu0 %v5888_v1  ;;  %v901_v51 = vld [vmem:[#allocation6 + $0xc8] sm:$0xff]  ;;  %v900_v52 = vld [vmem:[#allocation6 + $0xc0] sm:$0xff] }
 0xbf3   :  { %5146 = vmatpush3.msra.mxu0 %v902_v49 }
 0xbf4   :  { %5510 = vtanh.f32 %v742_v53  ;;  %v4863_v55 = vmul.f32 -1.442695, %v742_v53  ;;  %5147 = vmatprep.subr.mxu0 %v5888_v1  ;;  %v5899_v53 = vmov 6  }
 0xbf5   :  { %5148 = vmatpush3.msra.mxu0 %v901_v51 }
 0xbf6   :  { %5512 = vpow2.f32 %v4863_v55  ;;  %5149 = vmatprep.subr.mxu0 %v5888_v1 }
 0xbf7   :  { %5150 = vmatpush3.msra.mxu0 %v900_v52 }
 0xc01   :  { %v5511_v54 = vpop.eup %5510 }
 0xc02   :  { %752 = vrot.lane.b32.xlu1 %v5511_v54, %s5891_s0 }
 0xc03   :  { %v5513_v56 = vpop.eup %5512 }
 0xc04   :  { %v746_v57 = vadd.f32 1.0, %v5513_v56 }
 0xc06   :  { %5514 = vrcp.f32 %v746_v57 }
 0xc13   :  { %v5515_v58 = vpop.eup %5514 }
 0xc14   :  { %v750_v61 = vmul.f32 %v5515_v58, %v639_v25 }
 0xc74   :  { %v753_v59 = vpop.permute.xlu1 %752 }
 0xc75   :  { %v755_v60 = vmul.f32 %v5515_v58, %v753_v59 }
 0xc77   :  { %757 = vrot.lane.b32.xlu1 %v755_v60, %s5892_s30 }
 0xce9   :  { %v758_v62 = vpop.permute.xlu1 %757 }
 0xcea   :  { %v760_v63 = vadd.f32 %v758_v62, %v750_v61 }
 0xcec   :  { %5516 = vtanh.f32 %v760_v63 }
 0xcf9   :  { %v5517_v7 = vpop.eup %5516 }
 0xcfa   :  { %763 = vrot.lane.b32.xlu0 %v5517_v7, %s5891_s0 }
 0xcfe   :  { %768 = vperm.xlu0 %5473, %v6024_v5  }
 0xd02   :  { %5474 = vset.pattern.permute.xlu0 %v5899_v53 }
 0xd6c   :  { %v764_v15 = vpop.permute.xlu0 %763 }
 0xd6d   :  { %v766_v16 = vmul.f32 %v5515_v58, %v764_v15 }
 0xd6f   :  { %v1226_v17 = vrot.slane %v766_v16, %v6074_v6  ;;  %784 = vrot.lane.b32.xlu1 %v766_v16, %s5892_s30 }
 0xd71   :  { %v1227_v18 = vcombine.high %v1226_v17, %v1226_v17  ;;  %v1234_v19 = vrot.slane %v1226_v17, %v6074_v6 }
 0xd73   :  { %v1241_v20 = vrot.slane %v1227_v18, %v6074_v6  ;;  %v1342_v21 = vrot.slane %v1234_v19, %v6038_v12 }
 0xd75   :  { %v1346_v22 = vrot.slane %v1241_v20, %v6038_v12  ;;  %v1389_v23 = vsel %vm1388_vm5, %v1386_v42, %v1342_v21 }
 0xd77   :  { %v1390_v24 = vsel %vm1388_vm5, %v1387_v43, %v1346_v22 }
 0xd79   :  { %v769_v27 = vpop.permute.xlu0 %768 }
 0xd7a   :  { %v777_v30 = vmul.f32 %v4864_v26, %v769_v27 }
 0xde1   :  { %v785_v25 = vpop.permute.xlu1 %784 }
 0xde2   :  { %5141 = vmatmul.mubr.msk.f32.vlgmr.msra.gmra.mxu1 %vm179_vm1, %v785_v25 }
 0xde3   :  { %5162 = vmatprep.mubr.msk.f32.mxu1 %vm5889_vm0, %v5888_v1 }
 0xea2   :  { %v854_v32 = vpop.f32.mrf.mxu1 }
 0xea3   :  { %v858_v33 = vadd.f32 %v854_v32, %v777_v30  ;;  %v1023_v32 = vld [vmem:[#allocation6 + $0xf0] sm:$0xff] }
 0xea4   :  { %v5142_v34 = vpop.f32.mrf.mxu1 }
 0xea5   :  { %v863_v35 = vadd.f32 %v862_v31, %v858_v33  ;;  %v1024_v31 = vld [vmem:[#allocation6 + $0xf8] sm:$0xff]  ;;  %v1022_v34 = vld [vmem:[#allocation6 + $0xe8] sm:$0xff] }
 0xea6   :  { %5155 = vmatpush3.msra.mxu1 %v1024_v31 }
 0xea7   :  { %5518 = vtanh.f32 %v863_v35  ;;  %v4866_v37 = vmul.f32 -1.442695, %v863_v35  ;;  %5156 = vmatprep.subr.mxu1 %v5888_v1  ;;  %v1021_v35 = vld [vmem:[#allocation6 + $0xe0] sm:$0xff] }
 0xea8   :  { %5157 = vmatpush3.msra.mxu1 %v1023_v32 }
 0xea9   :  { %5520 = vpow2.f32 %v4866_v37  ;;  %5158 = vmatprep.subr.mxu1 %v5888_v1 }
 0xeaa   :  { %5159 = vmatpush3.msra.mxu1 %v1022_v34  ;;  %v1494_v34 = vld [vmem:[#allocation9 + $0x18] sm:$0xff] }
 0xeab   :  { %5160 = vmatprep.subr.mxu1 %v5888_v1 }
 0xeac   :  { %5161 = vmatpush3.msra.mxu1 %v1021_v35 }
 0xead   :  { %5176 = vmatprep.subr.mxu1 %v5888_v1 }
 0xeb4   :  { %v5519_v36 = vpop.eup %5518 }
 0xeb5   :  { %873 = vrot.lane.b32.xlu1 %v5519_v36, %s5891_s0  ;;  %v5900_v36 = vmov 7  }
 0xeb6   :  { %v5521_v38 = vpop.eup %5520 }
 0xeb7   :  { %v867_v39 = vadd.f32 1.0, %v5521_v38 }
 0xeb9   :  { %5522 = vrcp.f32 %v867_v39 }
 0xec6   :  { %v5523_v40 = vpop.eup %5522 }
 0xec7   :  { %v871_v44 = vmul.f32 %v5523_v40, %v760_v63 }
 0xf27   :  { %v874_v42 = vpop.permute.xlu1 %873 }
 0xf28   :  { %v876_v43 = vmul.f32 %v5523_v40, %v874_v42 }
 0xf2a   :  { %878 = vrot.lane.b32.xlu1 %v876_v43, %s5892_s30 }
 0xf9c   :  { %v879_v45 = vpop.permute.xlu1 %878 }
 0xf9d   :  { %v881_v46 = vadd.f32 %v879_v45, %v871_v44 }
 0xf9f   :  { %5524 = vtanh.f32 %v881_v46 }
 0xfac   :  { %v5525_v50 = vpop.eup %5524 }
 0xfad   :  { %884 = vrot.lane.b32.xlu0 %v5525_v50, %s5891_s0  ;;  %v1103_v50 = vsub.s32 7, %v6035_v9 }
 0xfaf   :  { %v1104_v52 = vrot.slane %v6040_v13, %v1103_v50 }
 0xfb1   :  { %889 = vperm.xlu0 %5474, %v6024_v5  }
 0xfb5   :  { %5475 = vset.pattern.permute.xlu0 %v5900_v36  ;;  %v1493_v36 = vld [vmem:[#allocation9 + $0x10] sm:$0xff] }
0x101f   :  { %v885_v54 = vpop.permute.xlu0 %884 }
0x1020   :  { %v887_v55 = vmul.f32 %v5523_v40, %v885_v54 }
0x1022   :  { %v1248_v56 = vrot.slane %v887_v55, %v6074_v6  ;;  %905 = vrot.lane.b32.xlu1 %v887_v55, %s5892_s30 }
0x1024   :  { %v1249_v57 = vcombine.high %v1248_v56, %v1248_v56  ;;  %v1256_v58 = vrot.slane %v1248_v56, %v6074_v6 }
0x1026   :  { %v1263_v59 = vrot.slane %v1249_v57, %v6074_v6  ;;  %v1352_v60 = vrot.slane %v1256_v58, %v6038_v12 }
0x1028   :  { %v1356_v61 = vrot.slane %v1263_v59, %v6038_v12  ;;  %v1392_v62 = vsel %vm1391_vm6, %v1389_v23, %v1352_v60 }
0x102a   :  { %v1393_v63 = vsel %vm1391_vm6, %v1390_v24, %v1356_v61 }
0x102c   :  { %v890_v7 = vpop.permute.xlu0 %889 }
0x102d   :  { %v898_v11 = vmul.f32 %v4867_v4, %v890_v7 }
0x1094   :  { %v906_v0 = vpop.permute.xlu1 %905 }
0x1095   :  { %5152 = vmatmul.mubr.msk.f32.vlgmr.msra.gmra.mxu0 %vm179_vm1, %v906_v0 }
0x1155   :  { %v975_v15 = vpop.f32.mrf.mxu0 }
0x1156   :  { %v979_v16 = vadd.f32 %v975_v15, %v898_v11  ;;  %v154_v11 = vld [vmem:[#allocation12 + $0x18] sm:$0xff] }
0x1157   :  { %v5153_v17 = vpop.f32.mrf.mxu0  ;;  %5165 = vmatprep.subr.mxu0 %v154_v11  ;;  %v1498_v15 = vld [vmem:[#allocation11 + $0x18] sm:$0xff] }
0x1158   :  { %v984_v18 = vadd.f32 %v983_v14, %v979_v16  ;;  %v153_v14 = vld [vmem:[#allocation12 + $0x10] sm:$0xff]  ;;  %5166 = vmatpush3.msra.mxu0 %v154_v11  ;;  %v152_v17 = vld [vmem:[#allocation12 + $0x8] sm:$0xff] }
0x1159   :  { %v1497_v16 = vld [vmem:[#allocation11 + $0x10] sm:$0xff]  ;;  %5167 = vmatprep.subr.mxu0 %v153_v14  ;;  %v6281_v11 = vld [vmem:[%s6908_s10] ss:$0 sm:$0xff] }
0x115a   :  { %5526 = vtanh.f32 %v984_v18  ;;  %v4869_v20 = vmul.f32 -1.442695, %v984_v18  ;;  %5168 = vmatpush3.msra.mxu0 %v153_v14  ;;  %v151_v18 = vld [vmem:[#allocation12] sm:$0xff] }
0x115b   :  { %5169 = vmatprep.subr.mxu0 %v152_v17 }
0x115c   :  { %5528 = vpow2.f32 %v4869_v20  ;;  %5170 = vmatpush3.msra.mxu0 %v152_v17 }
0x115d   :  { %5171 = vmatprep.subr.mxu0 %v151_v18 }
0x115e   :  { %5172 = vmatpush3.msra.mxu0 %v151_v18 }
0x115f   :  { %5187 = vmatprep.subr.mxu0 %v5888_v1 }
0x1167   :  { %v5527_v19 = vpop.eup %5526 }
0x1168   :  { %994 = vrot.lane.b32.xlu1 %v5527_v19, %s5891_s0  ;;  %v1496_v19 = vld [vmem:[#allocation11 + $0x8] sm:$0xff] }
0x1169   :  { %v5529_v21 = vpop.eup %5528 }
0x116a   :  { %v988_v22 = vadd.f32 1.0, %v5529_v21  ;;  %v1495_v21 = vld [vmem:[#allocation11] sm:$0xff] }
0x116c   :  { %5530 = vrcp.f32 %v988_v22 }
0x1179   :  { %v5531_v23 = vpop.eup %5530 }
0x117a   :  { %v992_v26 = vmul.f32 %v5531_v23, %v881_v46 }
0x11da   :  { %v995_v24 = vpop.permute.xlu1 %994 }
0x11db   :  { %v997_v25 = vmul.f32 %v5531_v23, %v995_v24 }
0x11dd   :  { %999 = vrot.lane.b32.xlu1 %v997_v25, %s5892_s30 }
0x124f   :  { %v1000_v27 = vpop.permute.xlu1 %999 }
0x1250   :  { %v1002_v30 = vadd.f32 %v1000_v27, %v992_v26 }
0x1252   :  { %5532 = vtanh.f32 %v1002_v30 }
0x125f   :  { %v5533_v33 = vpop.eup %5532 }
0x1260   :  { %1005 = vrot.lane.b32.xlu0 %v5533_v33, %s5891_s0 }
0x1264   :  { %1010 = vperm.xlu0 %5475, %v6024_v5  }
0x1268   :  { %5476 = vset.pattern.permute.xlu0 %v5890_v2 }
0x12d2   :  { %v1006_v37 = vpop.permute.xlu0 %1005 }
0x12d3   :  { %v1008_v38 = vmul.f32 %v5531_v23, %v1006_v37 }
0x12d5   :  { %v1270_v39 = vrot.slane %v1008_v38, %v6074_v6  ;;  %1026 = vrot.lane.b32.xlu1 %v1008_v38, %s5892_s30  ;;  %v1492_v38 = vld [vmem:[#allocation9 + $0x8] sm:$0xff] }
0x12d7   :  { %v1271_v40 = vcombine.high %v1270_v39, %v1270_v39  ;;  %v1278_v42 = vrot.slane %v1270_v39, %v6074_v6  ;;  %v1491_v39 = vld [vmem:[#allocation9] sm:$0xff] }
0x12d9   :  { %v1285_v43 = vrot.slane %v1271_v40, %v6074_v6  ;;  %v1362_v44 = vrot.slane %v1278_v42, %v6038_v12  ;;  %v5901_v40 = vmov -1.0  }
0x12db   :  { %v1366_v45 = vrot.slane %v1285_v43, %v6038_v12  ;;  %v6189_v46 = vsel %vm1394_vm7, %v1392_v62, %v1362_v44 }
0x12dd   :  { %v6191_v5 = vsel %vm1394_vm7, %v1393_v63, %v1366_v45  ;;  %v6244_v45 = vld [vmem:[%s6904_s6] sm:$0xff] }
0x12df   :  { %v1011_v49 = vpop.permute.xlu0 %1010 }
0x12e0   :  { %v1019_v51 = vmul.f32 %v4870_v48, %v1011_v49 }
0x1347   :  { %v1027_v2 = vpop.permute.xlu1 %1026 }
0x1348   :  { %5163 = vmatmul.mubr.msk.f32.vlgmr.msra.gmra.mxu1 %vm179_vm1, %v1027_v2 }
0x1349   :  { %5184 = vmatprep.mubr.msk.f32.mxu1 %vm5889_vm0, %v5888_v1  ;;  %5177 = vmatpush3.msra.mxu1 %v1498_v15 }
0x134a   :  { %5178 = vmatprep.subr.mxu1 %v5888_v1 }
0x134b   :  { %5179 = vmatpush3.msra.mxu1 %v1497_v16 }
0x134c   :  { %5180 = vmatprep.subr.mxu1 %v5888_v1 }
0x134d   :  { %5181 = vmatpush3.msra.mxu1 %v1496_v19  ;;  %v4873_v19 = vld [vmem:[%s6906_s8] ss:$0 sm:$0xff] }
0x134e   :  { %5182 = vmatprep.subr.mxu1 %v5888_v1 }
0x134f   :  { %5183 = vmatpush3.msra.mxu1 %v1495_v21 }
0x1350   :  { %5198 = vmatprep.subr.mxu1 %v5888_v1 }
0x1408   :  { %v1096_v53 = vpop.f32.mrf.mxu1 }
0x1409   :  { %v1100_v54 = vadd.f32 %v1096_v53, %v1019_v51 }
0x140a   :  { %v5164_v55 = vpop.f32.mrf.mxu1 }
0x140b   :  { %v1105_v56 = vadd.f32 %v1104_v52, %v1100_v54 }
0x140d   :  { %5534 = vtanh.f32 %v1105_v56  ;;  %v4872_v58 = vmul.f32 -1.442695, %v1105_v56  ;;  %v6249_v56 = vld [vmem:[#allocation14 + $0x18] sm:$0xff] }
0x140f   :  { %5536 = vpow2.f32 %v4872_v58  ;;  %v6255_v58 = vld [vmem:[#allocation14 + $0x8] sm:$0xff] }
0x141a   :  { %v5535_v57 = vpop.eup %5534 }
0x141b   :  { %1115 = vrot.lane.b32.xlu1 %v5535_v57, %s5891_s0  ;;  %v6251_v57 = vld [vmem:[#allocation14 + $0x10] sm:$0xff] }
0x141c   :  { %v5537_v59 = vpop.eup %5536 }
0x141d   :  { %v1109_v60 = vadd.f32 1.0, %v5537_v59  ;;  %v6259_v59 = vld [vmem:[#allocation14] sm:$0xff] }
0x141f   :  { %5538 = vrcp.f32 %v1109_v60 }
0x142c   :  { %v5539_v61 = vpop.eup %5538 }
0x142d   :  { %v1113_v0 = vmul.f32 %v5539_v61, %v1002_v30 }
0x148d   :  { %v1116_v62 = vpop.permute.xlu1 %1115 }
0x148e   :  { %v1118_v63 = vmul.f32 %v5539_v61, %v1116_v62 }
0x1490   :  { %1120 = vrot.lane.b32.xlu1 %v1118_v63, %s5892_s30 }
0x1502   :  { %v1121_v13 = vpop.permute.xlu1 %1120 }
0x1503   :  { %v6202_v4 = vadd.f32 %v1121_v13, %v1113_v0 }
0x1505   :  { %5540 = vtanh.f32 %v6202_v4 }
0x1512   :  { %v5541_v7 = vpop.eup %5540 }
0x1513   :  { %1126 = vrot.lane.b32.xlu0 %v5541_v7, %s5891_s0 }
0x1585   :  { %v1127_v20 = vpop.permute.xlu0 %1126 }
0x1586   :  { %v1129_v22 = vmul.f32 %v5539_v61, %v1127_v20 }
0x1588   :  { %v1293_v23 = vrot.slane %v1129_v22, %v6074_v6 }
0x158a   :  { %v1294_v24 = vcombine.high %v1293_v23, %v1293_v23  ;;  %v1301_v25 = vrot.slane %v1293_v23, %v6074_v6 }
0x158c   :  { %v1308_v26 = vrot.slane %v1294_v24, %v6074_v6  ;;  %v1372_v27 = vrot.slane %v1301_v25, %v6038_v12 }
0x158e   :  { %v1376_v30 = vrot.slane %v1308_v26, %v6038_v12  ;;  %v6217_v31 = vsel %vm1397_vm8, %v6189_v46, %v1372_v27  ;;  %v6301_v27 = vld [vmem:[%s6909_s11] ss:$0 sm:$0xff] }
0x158f   :  { %1408 = vrot.lane.b32.xlu1 %v6217_v31, %s5892_s30 }
0x1590   :  { %v6222_v32 = vsel %vm1397_vm8, %v6191_v5, %v1376_v30  ;;  %v1649_v5 = vrot.slane %v6244_v45, %v6038_v12 }
0x1591   :  { %1410 = vrot.lane.b32.xlu0 %v6222_v32, %s5892_s30 }
0x1593   :  { %1499 = vrot.lane.b32.xlu1 %v1129_v22, %s5892_s30 }
0x1601   :  { %v1409_v33 = vpop.permute.xlu1 %1408 }
0x1602   :  { %5173 = vmatprep.mubr.msk.f32.mxu0 %vm179_vm1, %v1409_v33 }
0x1603   :  { %v1411_v35 = vpop.permute.xlu0 %1410 }
0x1604   :  { %5174 = vmatmul.mubr.msk.f32.vlgmr.msra.gmra.mxu0 %vm179_vm1, %v1411_v35 }
0x1605   :  { %5188 = vmatpush3.msra.mxu0 %v1494_v34  ;;  %v1500_v37 = vpop.permute.xlu1 %1499  ;;  %5195 = vmatprep.mubr.msk.f32.mxu0 %vm5889_vm0, %v5888_v1 }
0x1606   :  { %5189 = vmatprep.subr.mxu0 %v5888_v1  ;;  %5185 = vmatmul.mubr.msk.f32.vlgmr.msra.gmra.mxu1 %vm179_vm1, %v1500_v37 }
0x1607   :  { %5190 = vmatpush3.msra.mxu0 %v1493_v36  ;;  %5206 = vmatprep.mubr.msk.f32.mxu1 %vm5889_vm0, %v5888_v1 }
0x1608   :  { %5191 = vmatprep.subr.mxu0 %v5888_v1  ;;  %5199 = vmatpush3.msra.mxu1 %v6249_v56 }
0x1609   :  { %5192 = vmatpush3.msra.mxu0 %v1492_v38  ;;  %5200 = vmatprep.subr.mxu1 %v5888_v1  ;;  %v4882_v38 = vld [vmem:[#allocation2] ss:$0 sm:$0xff] }
0x160a   :  { %5193 = vmatprep.subr.mxu0 %v5888_v1  ;;  %5201 = vmatpush3.msra.mxu1 %v6251_v57 }
0x160b   :  { %5194 = vmatpush3.msra.mxu0 %v1491_v39  ;;  %5202 = vmatprep.subr.mxu1 %v5888_v1  ;;  %v1821_v39 = vand.u32 127, %v254_v8 }
0x160c   :  { %5196 = vmatmul.mubr.msk.f32.vlgmr.msra.gmra.mxu0 %vm179_vm1, %v5901_v40  ;;  %5209 = vmatprep.subr.mxu0 %v5888_v1 }
0x160d   :  { %5217 = vmatprep.mubr.msk.f32.mxu0 %vm5889_vm0, %v5888_v1  ;;  %5203 = vmatpush3.msra.mxu1 %v6255_v58 }
0x160e   :  { %5204 = vmatprep.subr.mxu1 %v5888_v1 }
0x160f   :  { %5205 = vmatpush3.msra.mxu1 %v6259_v59 }
0x1610   :  { %5220 = vmatprep.subr.mxu1 %v5888_v1 }
0x16c4   :  { %v5175_v42 = vpop.f32.mrf.mxu0 }
0x16c5   :  { %v6293_v23 = vadd.f32 %v5175_v42, %v4873_v19  ;;  %v6309_v42 = vsub.s32 %v1821_v39, %v6035_v9 }
0x16c6   :  { %v1569_v43 = vpop.f32.mrf.mxu1  ;;  %v1482_v46 = vpop.f32.mrf.mxu0 }
0x16c7   :  { %v6289_v20 = vadd.f32 %v4873_v19, %v1482_v46 }
0x16c8   :  { %v5186_v44 = vpop.f32.mrf.mxu1 }
0x16cc   :  { %v1642_v2 = vpop.f32.mrf.mxu0 }
0x16cd   :  { %v1643_v48 = vadd.f32 %v1642_v2, %v1569_v43 }
0x16ce   :  { %v5197_v49 = vpop.f32.mrf.mxu0 }
0x16cf   :  { %v1650_v51 = vadd.f32 %v1649_v5, %v1643_v48 }
0x16d1   :  { %5542 = vtanh.f32 %v1650_v51  ;;  %v4878_v53 = vmul.f32 -1.442695, %v1650_v51 }
0x16d3   :  { %5544 = vpow2.f32 %v4878_v53 }
0x16de   :  { %v5543_v52 = vpop.eup %5542 }
0x16df   :  { %1660 = vrot.lane.b32.xlu0 %v5543_v52, %s5891_s0 }
0x16e0   :  { %v5545_v54 = vpop.eup %5544 }
0x16e1   :  { %v1654_v55 = vadd.f32 1.0, %v5545_v54 }
0x16e3   :  { %5546 = vrcp.f32 %v1654_v55 }
0x16f0   :  { %v6264_v60 = vpop.eup %5546 }
0x16f1   :  { %v1658_v63 = vmul.f32 %v6264_v60, %v6202_v4 }
0x1751   :  { %v1661_v61 = vpop.permute.xlu0 %1660 }
0x1752   :  { %v1663_v62 = vmul.f32 %v6264_v60, %v1661_v61 }
0x1754   :  { %1665 = vrot.lane.b32.xlu1 %v1663_v62, %s5892_s30 }
0x17c6   :  { %v1666_v0 = vpop.permute.xlu1 %1665 }
0x17c7   :  { %v6271_v13 = vadd.f32 %v1666_v0, %v1658_v63 }
0x17c9   :  { %1682 = vrot.lane.b32.xlu0 %v6271_v13, %s5902_s27 }
0x183b   :  { %v1683_v7 = vpop.permute.xlu0 %1682 }
0x183c   :  { %5207 = vmatmul.mubr.msk.f32.vlgmr.msra.gmra.mxu1 %vm179_vm1, %v1683_v7 }
0x183d   :  { %5228 = vmatprep.mubr.msk.f32.mxu1 %vm5889_vm0, %v5888_v1 }
0x18fc   :  { %v1752_v14 = vpop.f32.mrf.mxu1 }
0x18fd   :  { %v1753_v4 = vadd.f32 %v6281_v11, %v1752_v14 }
0x18fe   :  { %v5208_v15 = vpop.f32.mrf.mxu1 }
0x18ff   :  { %v1763_v16 = vrot.slane %v1753_v4, %v6074_v6 }
0x1901   :  { %v1764_v17 = vcombine.high %v1763_v16, %v1763_v16  ;;  %v1771_v18 = vrot.slane %v1763_v16, %v6074_v6 }
0x1903   :  { %v1778_v21 = vrot.slane %v1764_v17, %v6074_v6  ;;  %v1782_v22 = vrot.slane %v1771_v18, %v6038_v12 }
0x1905   :  { %v1786_v24 = vrot.slane %v1778_v21, %v6038_v12  ;;  %v1789_v25 = vadd.f32 %v1782_v22, %v6289_v20 }
0x1907   :  { %v1790_v26 = vadd.f32 %v1786_v24, %v6293_v23  ;;  %5548 = vtanh.f32 %v1789_v25 }
0x1909   :  { %5550 = vtanh.f32 %v1790_v26 }
0x1914   :  { %v5549_v30 = vpop.eup %5548 }
0x1915   :  { %v1799_v33 = vmul.f32 %v5549_v30, %v6301_v27 }
0x1916   :  { %v5551_v34 = vpop.eup %5550 }
0x1917   :  { %v1801_v35 = vsel %vm179_vm1, %v1799_v33, 0.0  ;;  %v1800_v36 = vmul.f32 %v5551_v34, %v6301_v27  ;;  %v1926_v33 = vld [vmem:[#allocation11 + $0x38] sm:$0xff]  ;;  %v1925_v34 = vld [vmem:[#allocation11 + $0x30] sm:$0xff] }
0x1918   :  { %1802 = vadd.xlane.f32.xlu1 %v1801_v35  ;;  %5210 = vmatpush3.msra.mxu0 %v1926_v33  ;;  %v1924_v35 = vld [vmem:[#allocation11 + $0x28] sm:$0xff] }
0x1919   :  { %v1804_v37 = vsel %vm179_vm1, %v1800_v36, 0.0  ;;  %5211 = vmatprep.subr.mxu0 %v5888_v1  ;;  %v1923_v36 = vld [vmem:[#allocation11 + $0x20] sm:$0xff] }
0x191a   :  { %1805 = vadd.xlane.f32.xlu0 %v1804_v37  ;;  %5212 = vmatpush3.msra.mxu0 %v1925_v34  ;;  %v1921_v37 = vld [vmem:[#allocation9 + $0x38] sm:$0xff] }
0x191b   :  { %5213 = vmatprep.subr.mxu0 %v5888_v1  ;;  %5221 = vmatpush3.msra.mxu1 %v1921_v37 }
0x191c   :  { %5214 = vmatpush3.msra.mxu0 %v1924_v35  ;;  %5222 = vmatprep.subr.mxu1 %v5888_v1 }
0x191d   :  { %5215 = vmatprep.subr.mxu0 %v5888_v1 }
0x191e   :  { %5216 = vmatpush3.msra.mxu0 %v1923_v36 }
0x191f   :  { %5231 = vmatprep.subr.mxu0 %v5888_v1 }
0x1930   :  { %1813 = vperm.xlu0 %5476, %v4882_v38   ;;  %v1920_v38 = vld [vmem:[#allocation9 + $0x30] sm:$0xff] }
0x1931   :  { %5223 = vmatpush3.msra.mxu1 %v1920_v38 }
0x1932   :  { %5224 = vmatprep.subr.mxu1 %v5888_v1 }
0x19a1   :  { %v1803_v43 = vpop.xlane.xlu1 %1802 }
0x19a3   :  { %v1806_v40 = vpop.xlane.xlu0 %1805 }
0x19ab   :  { %v6311_v44 = vpop.permute.xlu0 %1813 }
0x19ac   :  { %v1816_v46 = vadd.f32 %v6311_v44, %v1803_v43  ;;  %v1817_v5 = vadd.f32 %v6311_v44, %v1806_v40  ;;  %v1919_v40 = vld [vmem:[#allocation9 + $0x28] sm:$0xff] }
0x19ad   :  { %5225 = vmatpush3.msra.mxu1 %v1919_v40 }
0x19ae   :  { %v1825_v2 = vrot.slane %v1816_v46, %v6309_v42  ;;  %v1829_v48 = vrot.slane %v1817_v5, %v6309_v42  ;;  %5226 = vmatprep.subr.mxu1 %v5888_v1 }
0x19b0   :  { %v1831_v49 = vsel %vm1830_vm9, %v1829_v48, %v1825_v2 }
0x19b1   :  { %v1834_v8 = vsel %vm1833_vm10, %v1831_v49, -inf }
0x19b2   :  { %1835 = vmax.xlane.f32.xlu1 %v1834_v8 }
0x1a3b   :  { %v1836_v51 = vpop.xlane.xlu1 %1835 }
0x1a3c   :  { %v1841_v52 = vrot.slane %v1836_v51, %v6038_v12  ;;  %v1845_v53 = vrot.slane %v1836_v51, %v6058_v41 }
0x1a3e   :  { %v1848_v54 = vsub.f32 %v1816_v46, %v1841_v52  ;;  %v1849_v55 = vsub.f32 %v1817_v5, %v1845_v53  ;;  %v1918_v46 = vld [vmem:[#allocation9 + $0x20] sm:$0xff] }
0x1a3f   :  { %5227 = vmatpush3.msra.mxu1 %v1918_v46 }
0x1a40   :  { %v1850_v61 = vmul.f32 1.442695, %v1848_v54  ;;  %v1852_v62 = vmul.f32 1.442695, %v1849_v55  ;;  %5242 = vmatprep.subr.mxu1 %v5888_v1 }
0x1a42   :  { %5552 = vpow2.f32 %v1850_v61 }
0x1a43   :  { %5554 = vpow2.f32 %v1852_v62 }
0x1a4f   :  { %v5553_v63 = vpop.eup %5552 }
0x1a50   :  { %1857 = vperm.xlu1 %5477, %v5553_v63   ;;  %v5555_v0 = vpop.eup %5554 }
0x1a54   :  { %1860 = vperm.xlu1 %5477, %v5555_v0  }
0x1acb   :  { %v1858_v7 = vpop.permute.xlu1 %1857 }
0x1acc   :  { %v1865_v4 = vrot.slane %v1858_v7, %v6309_v42 }
0x1acf   :  { %v1861_v14 = vpop.permute.xlu1 %1860 }
0x1ad0   :  { %v1869_v15 = vrot.slane %v1861_v14, %v6309_v42 }
0x1ad2   :  { %v1870_v16 = vsel %vm1830_vm9, %v1869_v15, %v1865_v4 }
0x1ad3   :  { %v1872_v17 = vsel %vm1833_vm10, %v1870_v16, 0.0 }
0x1ad4   :  { %1873 = vadd.xlane.f32.xlu1 %v1872_v17 }
0x1b5d   :  { %v1874_v18 = vpop.xlane.xlu1 %1873 }
0x1b5e   :  { %v1879_v19 = vrot.slane %v1874_v18, %v6038_v12  ;;  %v1883_v21 = vrot.slane %v1874_v18, %v6058_v41 }
0x1b60   :  { %5556 = vrcp.f32 %v1879_v19 }
0x1b61   :  { %5558 = vrcp.f32 %v1883_v21 }
0x1b62   :  { %5560 = vtanh.f32 %v6271_v13 }
0x1b6d   :  { %v5557_v22 = vpop.eup %5556 }
0x1b6e   :  { %v1887_v24 = vmul.f32 %v5557_v22, %v5553_v63  ;;  %v5559_v25 = vpop.eup %5558 }
0x1b6f   :  { %v1889_v26 = vmul.f32 %v5559_v25, %v5555_v0  ;;  %v5561_v30 = vpop.eup %5560  ;;  %v2082_v25 = vrot.slane %v6244_v45, %v6058_v41 }
0x1b70   :  { %1892 = vperm.xlu0 %5476, %v1887_v24  }
0x1b74   :  { %1897 = vperm.xlu0 %5476, %v1889_v26  }
0x1b78   :  { %1671 = vrot.lane.b32.xlu0 %v5561_v30, %s5891_s0 }
0x1beb   :  { %v1893_v39 = vpop.permute.xlu0 %1892 }
0x1bec   :  { %v1900_v43 = vmul.f32 %v1893_v39, %v6217_v31  ;;  %v4745_v49 = vrot.slane %v1893_v39, %v6309_v42 }
0x1bee   :  { %v1903_v5 = vsel %vm1902_vm11, %v1900_v43, 0.0 }
0x1bef   :  { %v1904_v2 = vrot.slane %v1903_v5, 4  ;;  %v1898_v48 = vpop.permute.xlu0 %1897 }
0x1bf0   :  { %v1901_v8 = vmul.f32 %v1898_v48, %v6222_v32  ;;  %v4749_v51 = vrot.slane %v1898_v48, %v6309_v42 }
0x1bf1   :  { %v1905_v52 = vadd.f32 %v1904_v2, %v1903_v5 }
0x1bf2   :  { %v1910_v53 = vsel %vm1902_vm11, %v1901_v8, 0.0  ;;  %v4806_v54 = vsel %vm1830_vm9, %v4749_v51, %v4745_v49 }
0x1bf3   :  { %v1906_v55 = vrot.slane %v1905_v52, 2  ;;  %v1911_v61 = vrot.slane %v1910_v53, 4  ;;  %4822 = vst.msk [vmem:[#allocation15] sm:$0x3] %vm1833_vm10, %v4806_v54  ;;  %v1672_v62 = vpop.permute.xlu0 %1671 }
0x1bf4   :  { %v1674_v63 = vmul.f32 %v6264_v60, %v1672_v62 }
0x1bf5   :  { %v1912_v0 = vadd.f32 %v1911_v61, %v1910_v53  ;;  %v1907_v7 = vadd.f32 %v1906_v55, %v1905_v52 }
0x1bf6   :  { %1928 = vrot.lane.b32.xlu0 %v1674_v63, %s5892_s30 }
0x1bf7   :  { %v1913_v14 = vrot.slane %v1912_v0, 2  ;;  %v1908_v4 = vrot.slane %v1907_v7, 1 }
0x1bf9   :  { %v1914_v15 = vadd.f32 %v1913_v14, %v1912_v0  ;;  %v1909_v17 = vadd.f32 %v1908_v4, %v1907_v7 }
0x1bfb   :  { %v1915_v16 = vrot.slane %v1914_v15, 1 }
0x1bfd   :  { %v1916_v18 = vadd.f32 %v1915_v16, %v1914_v15 }
0x1bff   :  { %v2004_v19 = vsel %vm1830_vm9, %v1916_v18, %v1909_v17 }
0x1c00   :  { %2005 = vrot.lane.b32.xlu0 %v2004_v19, %s5892_s30 }
0x1c68   :  { %v1929_v21 = vpop.permute.xlu0 %1928 }
0x1c69   :  { %5218 = vmatmul.mubr.msk.f32.vlgmr.msra.gmra.mxu0 %vm179_vm1, %v1929_v21 }
0x1c6a   :  { %5232 = vmatpush3.msra.mxu0 %v6249_v56  ;;  %5239 = vmatprep.mubr.msk.f32.mxu0 %vm5889_vm0, %v5888_v1 }
0x1c6b   :  { %5233 = vmatprep.subr.mxu0 %v5888_v1 }
0x1c6c   :  { %5234 = vmatpush3.msra.mxu0 %v6251_v57 }
0x1c6d   :  { %5235 = vmatprep.subr.mxu0 %v5888_v1 }
0x1c6e   :  { %5236 = vmatpush3.msra.mxu0 %v6255_v58 }
0x1c6f   :  { %5237 = vmatprep.subr.mxu0 %v5888_v1 }
0x1c70   :  { %5238 = vmatpush3.msra.mxu0 %v6259_v59 }
0x1c71   :  { %5253 = vmatprep.subr.mxu0 %v5888_v1 }
0x1c72   :  { %v2006_v60 = vpop.permute.xlu0 %2005 }
0x1c73   :  { %5229 = vmatmul.mubr.msk.f32.vlgmr.msra.gmra.mxu1 %vm179_vm1, %v2006_v60 }
0x1c74   :  { %5250 = vmatprep.mubr.msk.f32.mxu1 %vm5889_vm0, %v5888_v1 }
0x1d29   :  { %v1998_v22 = vpop.f32.mrf.mxu0 }
0x1d2b   :  { %v5219_v24 = vpop.f32.mrf.mxu0 }
0x1d33   :  { %v2075_v26 = vpop.f32.mrf.mxu1 }
0x1d34   :  { %v2076_v30 = vadd.f32 %v2075_v26, %v1998_v22 }
0x1d35   :  { %v5230_v33 = vpop.f32.mrf.mxu1 }
0x1d36   :  { %v2083_v34 = vadd.f32 %v2082_v25, %v2076_v30 }
0x1d38   :  { %5562 = vtanh.f32 %v2083_v34  ;;  %v4885_v36 = vmul.f32 -1.442695, %v2083_v34 }
0x1d3a   :  { %5564 = vpow2.f32 %v4885_v36 }
0x1d45   :  { %v5563_v35 = vpop.eup %5562 }
0x1d46   :  { %2093 = vrot.lane.b32.xlu1 %v5563_v35, %s5891_s0 }
0x1d47   :  { %v5565_v37 = vpop.eup %5564 }
0x1d48   :  { %v2087_v38 = vadd.f32 1.0, %v5565_v37 }
0x1d4a   :  { %5566 = vrcp.f32 %v2087_v38 }
0x1d57   :  { %v6366_v39 = vpop.eup %5566 }
0x1d58   :  { %v2091_v46 = vmul.f32 %v6366_v39, %v6271_v13 }
0x1db8   :  { %v2094_v40 = vpop.permute.xlu1 %2093 }
0x1db9   :  { %v2096_v43 = vmul.f32 %v6366_v39, %v2094_v40 }
0x1dbb   :  { %2098 = vrot.lane.b32.xlu0 %v2096_v43, %s5892_s30 }
0x1e2d   :  { %v2099_v5 = vpop.permute.xlu0 %2098 }
0x1e2e   :  { %v6372_v2 = vadd.f32 %v2099_v5, %v2091_v46 }
0x1e30   :  { %2109 = vrot.lane.b32.xlu0 %v6372_v2, %s5902_s27 }
0x1ea2   :  { %v2110_v48 = vpop.permute.xlu0 %2109 }
0x1ea3   :  { %5240 = vmatmul.mubr.msk.f32.vlgmr.msra.gmra.mxu0 %vm179_vm1, %v2110_v48 }
0x1ea4   :  { %5261 = vmatprep.mubr.msk.f32.mxu0 %vm5889_vm0, %v5888_v1 }
0x1f63   :  { %v2179_v49 = vpop.f32.mrf.mxu0 }
0x1f64   :  { %v2180_v8 = vadd.f32 %v6281_v11, %v2179_v49 }
0x1f65   :  { %v5241_v51 = vpop.f32.mrf.mxu0 }
0x1f66   :  { %v2190_v52 = vrot.slane %v2180_v8, %v6074_v6 }
0x1f68   :  { %v2191_v53 = vcombine.high %v2190_v52, %v2190_v52  ;;  %v2198_v13 = vrot.slane %v2190_v52, %v6074_v6 }
0x1f6a   :  { %v2205_v54 = vrot.slane %v2191_v53, %v6074_v6  ;;  %v2209_v55 = vrot.slane %v2198_v13, %v6038_v12 }
0x1f6c   :  { %v2213_v61 = vrot.slane %v2205_v54, %v6038_v12  ;;  %v2216_v62 = vadd.f32 %v2209_v55, %v6289_v20 }
0x1f6e   :  { %v2217_v63 = vadd.f32 %v2213_v61, %v6293_v23  ;;  %5568 = vtanh.f32 %v2216_v62 }
0x1f70   :  { %5570 = vtanh.f32 %v2217_v63  ;;  %v2333_v63 = vld [vmem:[#allocation11 + $0x58] sm:$0xff] }
0x1f71   :  { %5243 = vmatpush3.msra.mxu1 %v2333_v63 }
0x1f72   :  { %5244 = vmatprep.subr.mxu1 %v5888_v1 }
0x1f7b   :  { %v5569_v0 = vpop.eup %5568 }
0x1f7c   :  { %v2220_v7 = vmul.f32 %v5569_v0, %v6301_v27  ;;  %v2332_v0 = vld [vmem:[#allocation11 + $0x50] sm:$0xff] }
0x1f7d   :  { %v5571_v14 = vpop.eup %5570  ;;  %5245 = vmatpush3.msra.mxu1 %v2332_v0 }
0x1f7e   :  { %v2222_v4 = vsel %vm179_vm1, %v2220_v7, 0.0  ;;  %v2221_v15 = vmul.f32 %v5571_v14, %v6301_v27  ;;  %v2331_v7 = vld [vmem:[#allocation11 + $0x48] sm:$0xff]  ;;  %5246 = vmatprep.subr.mxu1 %v5888_v1  ;;  %v2330_v14 = vld [vmem:[#allocation11 + $0x40] sm:$0xff] }
0x1f7f   :  { %2223 = vadd.xlane.f32.xlu0 %v2222_v4  ;;  %5247 = vmatpush3.msra.mxu1 %v2331_v7  ;;  %v2328_v4 = vld [vmem:[#allocation9 + $0x58] sm:$0xff] }
0x1f80   :  { %v2225_v16 = vsel %vm179_vm1, %v2221_v15, 0.0  ;;  %5248 = vmatprep.subr.mxu1 %v5888_v1  ;;  %v2327_v15 = vld [vmem:[#allocation9 + $0x50] sm:$0xff]  ;;  %5254 = vmatpush3.msra.mxu0 %v2328_v4 }
0x1f81   :  { %2226 = vadd.xlane.f32.xlu1 %v2225_v16  ;;  %5249 = vmatpush3.msra.mxu1 %v2330_v14 }
0x1f82   :  { %5264 = vmatprep.subr.mxu1 %v5888_v1  ;;  %5255 = vmatprep.subr.mxu0 %v5888_v1 }
0x1f83   :  { %5256 = vmatpush3.msra.mxu0 %v2327_v15 }
0x1f84   :  { %5257 = vmatprep.subr.mxu0 %v5888_v1 }
0x2008   :  { %v2224_v17 = vpop.xlane.xlu0 %2223 }
0x2009   :  { %v2228_v18 = vadd.f32 %v2224_v17, %v6311_v44  ;;  %v2326_v17 = vld [vmem:[#allocation9 + $0x48] sm:$0xff] }
0x200a   :  { %v2227_v19 = vpop.xlane.xlu1 %2226  ;;  %5258 = vmatpush3.msra.mxu0 %v2326_v17 }
0x200b   :  { %v2229_v21 = vadd.f32 %v2227_v19, %v6311_v44  ;;  %v2235_v60 = vrot.slane %v2228_v18, %v6309_v42  ;;  %v2325_v19 = vld [vmem:[#allocation9 + $0x40] sm:$0xff]  ;;  %5259 = vmatprep.subr.mxu0 %v5888_v1 }
0x200c   :  { %5260 = vmatpush3.msra.mxu0 %v2325_v19 }
0x200d   :  { %v2239_v22 = vrot.slane %v2229_v21, %v6309_v42  ;;  %5275 = vmatprep.subr.mxu0 %v5888_v1 }
0x200f   :  { %v2240_v24 = vsel %vm1830_vm9, %v2239_v22, %v2235_v60 }
0x2010   :  { %v2242_v25 = vsel %vm1833_vm10, %v2240_v24, -inf }
0x2011   :  { %2243 = vmax.xlane.f32.xlu0 %v2242_v25 }
0x209a   :  { %v2244_v26 = vpop.xlane.xlu0 %2243 }
0x209b   :  { %v2249_v30 = vrot.slane %v2244_v26, %v6038_v12  ;;  %v2253_v33 = vrot.slane %v2244_v26, %v6058_v41 }
0x209d   :  { %v2256_v34 = vsub.f32 %v2228_v18, %v2249_v30  ;;  %v2257_v35 = vsub.f32 %v2229_v21, %v2253_v33 }
0x209f   :  { %v2258_v36 = vmul.f32 1.442695, %v2256_v34  ;;  %v2260_v37 = vmul.f32 1.442695, %v2257_v35 }
0x20a1   :  { %5572 = vpow2.f32 %v2258_v36 }
0x20a2   :  { %5574 = vpow2.f32 %v2260_v37 }
0x20ae   :  { %v5573_v38 = vpop.eup %5572 }
0x20af   :  { %v5575_v40 = vpop.eup %5574  ;;  %2265 = vperm.xlu0 %5476, %v5573_v38  }
0x20b0   :  { %2268 = vperm.xlu1 %5477, %v5575_v40  }
0x212a   :  { %v2266_v43 = vpop.permute.xlu0 %2265 }
0x212b   :  { %v2269_v46 = vpop.permute.xlu1 %2268  ;;  %v2273_v5 = vrot.slane %v2266_v43, %v6309_v42 }
0x212c   :  { %v2277_v48 = vrot.slane %v2269_v46, %v6309_v42 }
0x212e   :  { %v2278_v49 = vsel %vm1830_vm9, %v2277_v48, %v2273_v5 }
0x212f   :  { %v2280_v8 = vsel %vm1833_vm10, %v2278_v49, 0.0 }
0x2130   :  { %2281 = vadd.xlane.f32.xlu0 %v2280_v8 }
0x21b9   :  { %v2282_v51 = vpop.xlane.xlu0 %2281 }
0x21ba   :  { %v2287_v52 = vrot.slane %v2282_v51, %v6038_v12  ;;  %v2291_v53 = vrot.slane %v2282_v51, %v6058_v41 }
0x21bc   :  { %5576 = vrcp.f32 %v2287_v52 }
0x21bd   :  { %5578 = vrcp.f32 %v2291_v53 }
0x21be   :  { %5580 = vtanh.f32 %v6372_v2 }
0x21c9   :  { %v5577_v13 = vpop.eup %5576 }
0x21ca   :  { %v2295_v54 = vmul.f32 %v5577_v13, %v5573_v38  ;;  %v5579_v55 = vpop.eup %5578 }
0x21cb   :  { %v2297_v61 = vmul.f32 %v5579_v55, %v5575_v40  ;;  %v5581_v62 = vpop.eup %5580  ;;  %v2489_v55 = vrot.slane %v6244_v45, %v498_v28 }
0x21cc   :  { %2300 = vperm.xlu1 %5477, %v2295_v54  }
0x21d0   :  { %2305 = vperm.xlu1 %5477, %v2297_v61  }
0x21d4   :  { %2104 = vrot.lane.b32.xlu1 %v5581_v62, %s5891_s0 }
0x2247   :  { %v2301_v16 = vpop.permute.xlu1 %2300 }
0x2248   :  { %v2308_v18 = vmul.f32 %v2301_v16, %v6217_v31  ;;  %v4753_v24 = vrot.slane %v2301_v16, %v6309_v42 }
0x224a   :  { %v2310_v21 = vsel %vm1902_vm11, %v2308_v18, 0.0 }
0x224b   :  { %v2311_v60 = vrot.slane %v2310_v21, 4  ;;  %v2306_v22 = vpop.permute.xlu1 %2305 }
0x224c   :  { %v2309_v25 = vmul.f32 %v2306_v22, %v6222_v32  ;;  %v4757_v26 = vrot.slane %v2306_v22, %v6309_v42 }
0x224d   :  { %v2312_v30 = vadd.f32 %v2311_v60, %v2310_v21 }
0x224e   :  { %v2317_v33 = vsel %vm1902_vm11, %v2309_v25, 0.0  ;;  %v4807_v34 = vsel %vm1830_vm9, %v4757_v26, %v4753_v24 }
0x224f   :  { %v2313_v35 = vrot.slane %v2312_v30, 2  ;;  %v2318_v36 = vrot.slane %v2317_v33, 4  ;;  %4823 = vst.msk [vmem:[#allocation15 + $0x2] sm:$0x3] %vm1833_vm10, %v4807_v34  ;;  %v2105_v37 = vpop.permute.xlu1 %2104 }
0x2250   :  { %v2107_v38 = vmul.f32 %v6366_v39, %v2105_v37 }
0x2251   :  { %v2314_v40 = vadd.f32 %v2313_v35, %v2312_v30  ;;  %v2319_v43 = vadd.f32 %v2318_v36, %v2317_v33 }
0x2252   :  { %2335 = vrot.lane.b32.xlu1 %v2107_v38, %s5892_s30 }
0x2253   :  { %v2320_v46 = vrot.slane %v2319_v43, 2  ;;  %v2315_v48 = vrot.slane %v2314_v40, 1 }
0x2255   :  { %v2321_v5 = vadd.f32 %v2320_v46, %v2319_v43  ;;  %v2316_v8 = vadd.f32 %v2315_v48, %v2314_v40 }
0x2257   :  { %v2322_v49 = vrot.slane %v2321_v5, 1 }
0x2259   :  { %v2323_v51 = vadd.f32 %v2322_v49, %v2321_v5 }
0x225b   :  { %v2411_v52 = vsel %vm1830_vm9, %v2323_v51, %v2316_v8 }
0x225c   :  { %2412 = vrot.lane.b32.xlu1 %v2411_v52, %s5892_s30 }
0x22c4   :  { %v2336_v53 = vpop.permute.xlu1 %2335 }
0x22c5   :  { %5251 = vmatmul.mubr.msk.f32.vlgmr.msra.gmra.mxu1 %vm179_vm1, %v2336_v53 }
0x22c6   :  { %5265 = vmatpush3.msra.mxu1 %v6249_v56  ;;  %5272 = vmatprep.mubr.msk.f32.mxu1 %vm5889_vm0, %v5888_v1 }
0x22c7   :  { %5266 = vmatprep.subr.mxu1 %v5888_v1 }
0x22c8   :  { %5267 = vmatpush3.msra.mxu1 %v6251_v57 }
0x22c9   :  { %5268 = vmatprep.subr.mxu1 %v5888_v1 }
0x22ca   :  { %5269 = vmatpush3.msra.mxu1 %v6255_v58 }
0x22cb   :  { %5270 = vmatprep.subr.mxu1 %v5888_v1 }
0x22cc   :  { %5271 = vmatpush3.msra.mxu1 %v6259_v59 }
0x22cd   :  { %5286 = vmatprep.subr.mxu1 %v5888_v1 }
0x22ce   :  { %v2413_v39 = vpop.permute.xlu1 %2412 }
0x22cf   :  { %5262 = vmatmul.mubr.msk.f32.vlgmr.msra.gmra.mxu0 %vm179_vm1, %v2413_v39 }
0x22d0   :  { %5283 = vmatprep.mubr.msk.f32.mxu0 %vm5889_vm0, %v5888_v1 }
0x2385   :  { %v2405_v13 = vpop.f32.mrf.mxu1 }
0x2387   :  { %v5252_v54 = vpop.f32.mrf.mxu1 }
0x238f   :  { %v2482_v61 = vpop.f32.mrf.mxu0 }
0x2390   :  { %v2483_v62 = vadd.f32 %v2482_v61, %v2405_v13 }
0x2391   :  { %v5263_v63 = vpop.f32.mrf.mxu0 }
0x2392   :  { %v2490_v0 = vadd.f32 %v2489_v55, %v2483_v62 }
0x2394   :  { %5582 = vtanh.f32 %v2490_v0  ;;  %v4889_v14 = vmul.f32 -1.442695, %v2490_v0 }
0x2396   :  { %5584 = vpow2.f32 %v4889_v14 }
0x23a1   :  { %v5583_v7 = vpop.eup %5582 }
0x23a2   :  { %2500 = vrot.lane.b32.xlu1 %v5583_v7, %s5891_s0 }
0x23a3   :  { %v5585_v4 = vpop.eup %5584 }
0x23a4   :  { %v2494_v15 = vadd.f32 1.0, %v5585_v4 }
0x23a6   :  { %5586 = vrcp.f32 %v2494_v15 }
0x23b3   :  { %v6445_v16 = vpop.eup %5586 }
0x23b4   :  { %v2498_v28 = vmul.f32 %v6445_v16, %v6372_v2 }
0x2414   :  { %v2501_v17 = vpop.permute.xlu1 %2500 }
0x2415   :  { %v2503_v18 = vmul.f32 %v6445_v16, %v2501_v17 }
0x2417   :  { %2505 = vrot.lane.b32.xlu1 %v2503_v18, %s5892_s30 }
0x2489   :  { %v2506_v19 = vpop.permute.xlu1 %2505 }
0x248a   :  { %v6451_v21 = vadd.f32 %v2506_v19, %v2498_v28 }
0x248c   :  { %2516 = vrot.lane.b32.xlu0 %v6451_v21, %s5902_s27 }
0x24fe   :  { %v2517_v60 = vpop.permute.xlu0 %2516 }
0x24ff   :  { %5273 = vmatmul.mubr.msk.f32.vlgmr.msra.gmra.mxu1 %vm179_vm1, %v2517_v60 }
0x2500   :  { %5294 = vmatprep.mubr.msk.f32.mxu1 %vm5889_vm0, %v5888_v1 }
0x25bf   :  { %v2586_v22 = vpop.f32.mrf.mxu1 }
0x25c0   :  { %v2587_v24 = vadd.f32 %v6281_v11, %v2586_v22 }
0x25c1   :  { %v5274_v25 = vpop.f32.mrf.mxu1 }
0x25c2   :  { %v2597_v26 = vrot.slane %v2587_v24, %v6074_v6 }
0x25c4   :  { %v2598_v30 = vcombine.high %v2597_v26, %v2597_v26  ;;  %v2605_v2 = vrot.slane %v2597_v26, %v6074_v6 }
0x25c6   :  { %v2612_v33 = vrot.slane %v2598_v30, %v6074_v6  ;;  %v2616_v34 = vrot.slane %v2605_v2, %v6038_v12 }
0x25c8   :  { %v2620_v35 = vrot.slane %v2612_v33, %v6038_v12  ;;  %v2623_v36 = vadd.f32 %v2616_v34, %v6289_v20 }
0x25ca   :  { %v2624_v37 = vadd.f32 %v2620_v35, %v6293_v23  ;;  %5588 = vtanh.f32 %v2623_v36  ;;  %v2740_v36 = vld [vmem:[#allocation11 + $0x78] sm:$0xff] }
0x25cb   :  { %5276 = vmatpush3.msra.mxu0 %v2740_v36 }
0x25cc   :  { %5590 = vtanh.f32 %v2624_v37  ;;  %v2739_v37 = vld [vmem:[#allocation11 + $0x70] sm:$0xff]  ;;  %5277 = vmatprep.subr.mxu0 %v5888_v1 }
0x25cd   :  { %5278 = vmatpush3.msra.mxu0 %v2739_v37 }
0x25ce   :  { %5279 = vmatprep.subr.mxu0 %v5888_v1 }
0x25d7   :  { %v5589_v38 = vpop.eup %5588 }
0x25d8   :  { %v2627_v40 = vmul.f32 %v5589_v38, %v6301_v27  ;;  %v2738_v38 = vld [vmem:[#allocation11 + $0x68] sm:$0xff] }
0x25d9   :  { %v5591_v43 = vpop.eup %5590  ;;  %5280 = vmatpush3.msra.mxu0 %v2738_v38 }
0x25da   :  { %v2629_v46 = vsel %vm179_vm1, %v2627_v40, 0.0  ;;  %v2628_v5 = vmul.f32 %v5591_v43, %v6301_v27  ;;  %v2737_v40 = vld [vmem:[#allocation11 + $0x60] sm:$0xff]  ;;  %5281 = vmatprep.subr.mxu0 %v5888_v1  ;;  %v2735_v43 = vld [vmem:[#allocation9 + $0x78] sm:$0xff] }
0x25db   :  { %2630 = vadd.xlane.f32.xlu1 %v2629_v46  ;;  %5282 = vmatpush3.msra.mxu0 %v2737_v40  ;;  %v2734_v46 = vld [vmem:[#allocation9 + $0x70] sm:$0xff] }
0x25dc   :  { %v2632_v48 = vsel %vm179_vm1, %v2628_v5, 0.0  ;;  %5297 = vmatprep.subr.mxu0 %v5888_v1  ;;  %5287 = vmatpush3.msra.mxu1 %v2735_v43 }
0x25dd   :  { %2633 = vadd.xlane.f32.xlu0 %v2632_v48  ;;  %5288 = vmatprep.subr.mxu1 %v5888_v1  ;;  %v2733_v48 = vld [vmem:[#allocation9 + $0x68] sm:$0xff] }
0x25de   :  { %5289 = vmatpush3.msra.mxu1 %v2734_v46 }
0x25df   :  { %5290 = vmatprep.subr.mxu1 %v5888_v1 }
0x25e0   :  { %5291 = vmatpush3.msra.mxu1 %v2733_v48 }
0x25e1   :  { %5292 = vmatprep.subr.mxu1 %v5888_v1 }
0x2664   :  { %v2631_v49 = vpop.xlane.xlu1 %2630 }
0x2665   :  { %v2635_v8 = vadd.f32 %v2631_v49, %v6311_v44 }
0x2666   :  { %v2634_v51 = vpop.xlane.xlu0 %2633 }
0x2667   :  { %v2636_v52 = vadd.f32 %v2634_v51, %v6311_v44  ;;  %v2642_v53 = vrot.slane %v2635_v8, %v6309_v42 }
0x2669   :  { %v2646_v39 = vrot.slane %v2636_v52, %v6309_v42 }
0x266b   :  { %v2647_v13 = vsel %vm1830_vm9, %v2646_v39, %v2642_v53 }
0x266c   :  { %v2649_v54 = vsel %vm1833_vm10, %v2647_v13, -inf }
0x266d   :  { %2650 = vmax.xlane.f32.xlu1 %v2649_v54 }
0x26f6   :  { %v2651_v55 = vpop.xlane.xlu1 %2650 }
0x26f7   :  { %v2656_v61 = vrot.slane %v2651_v55, %v6038_v12  ;;  %v2660_v62 = vrot.slane %v2651_v55, %v6058_v41 }
0x26f9   :  { %v2663_v63 = vsub.f32 %v2635_v8, %v2656_v61  ;;  %v2664_v0 = vsub.f32 %v2636_v52, %v2660_v62  ;;  %v2732_v8 = vld [vmem:[#allocation9 + $0x60] sm:$0xff] }
0x26fa   :  { %5293 = vmatpush3.msra.mxu1 %v2732_v8 }
0x26fb   :  { %v2665_v7 = vmul.f32 1.442695, %v2663_v63  ;;  %v2667_v14 = vmul.f32 1.442695, %v2664_v0  ;;  %5308 = vmatprep.subr.mxu1 %v5888_v1 }
0x26fd   :  { %5592 = vpow2.f32 %v2665_v7 }
0x26fe   :  { %5594 = vpow2.f32 %v2667_v14 }
0x270a   :  { %v5593_v4 = vpop.eup %5592 }
0x270b   :  { %v5595_v15 = vpop.eup %5594  ;;  %2672 = vperm.xlu1 %5477, %v5593_v4  }
0x270c   :  { %2675 = vperm.xlu0 %5476, %v5595_v15  }
0x2786   :  { %v2673_v17 = vpop.permute.xlu1 %2672 }
0x2787   :  { %v2676_v18 = vpop.permute.xlu0 %2675  ;;  %v2680_v28 = vrot.slane %v2673_v17, %v6309_v42 }
0x2788   :  { %v2684_v19 = vrot.slane %v2676_v18, %v6309_v42 }
0x278a   :  { %v2685_v60 = vsel %vm1830_vm9, %v2684_v19, %v2680_v28 }
0x278b   :  { %v2687_v22 = vsel %vm1833_vm10, %v2685_v60, 0.0 }
0x278c   :  { %2688 = vadd.xlane.f32.xlu1 %v2687_v22 }
0x2815   :  { %v2689_v24 = vpop.xlane.xlu1 %2688 }
0x2816   :  { %v2694_v25 = vrot.slane %v2689_v24, %v6038_v12  ;;  %v2698_v26 = vrot.slane %v2689_v24, %v6058_v41 }
0x2818   :  { %5596 = vrcp.f32 %v2694_v25 }
0x2819   :  { %5598 = vrcp.f32 %v2698_v26 }
0x281a   :  { %5600 = vtanh.f32 %v6451_v21 }
0x2825   :  { %v5597_v30 = vpop.eup %5596 }
0x2826   :  { %v2702_v2 = vmul.f32 %v5597_v30, %v5593_v4  ;;  %v5599_v33 = vpop.eup %5598 }
0x2827   :  { %v2704_v34 = vmul.f32 %v5599_v33, %v5595_v15  ;;  %v5601_v35 = vpop.eup %5600 }
0x2828   :  { %2707 = vperm.xlu0 %5476, %v2702_v2  }
0x282c   :  { %2712 = vperm.xlu0 %5476, %v2704_v34  }
0x2830   :  { %2511 = vrot.lane.b32.xlu0 %v5601_v35, %s5891_s0 }
0x28a3   :  { %v2708_v5 = vpop.permute.xlu0 %2707 }
0x28a4   :  { %v2715_v49 = vmul.f32 %v2708_v5, %v6217_v31  ;;  %v4761_v39 = vrot.slane %v2708_v5, %v6309_v42 }
0x28a6   :  { %v2717_v51 = vsel %vm1902_vm11, %v2715_v49, 0.0 }
0x28a7   :  { %v2718_v52 = vrot.slane %v2717_v51, 4  ;;  %v2713_v53 = vpop.permute.xlu0 %2712 }
0x28a8   :  { %v2716_v13 = vmul.f32 %v2713_v53, %v6222_v32  ;;  %v4765_v54 = vrot.slane %v2713_v53, %v6309_v42 }
0x28a9   :  { %v2719_v55 = vadd.f32 %v2718_v52, %v2717_v51 }
0x28aa   :  { %v2724_v61 = vsel %vm1902_vm11, %v2716_v13, 0.0  ;;  %v4808_v62 = vsel %vm1830_vm9, %v4765_v54, %v4761_v39 }
0x28ab   :  { %v2720_v63 = vrot.slane %v2719_v55, 2  ;;  %v2725_v0 = vrot.slane %v2724_v61, 4  ;;  %4824 = vst.msk [vmem:[#allocation15 + $0x4] sm:$0x3] %vm1833_vm10, %v4808_v62  ;;  %v2512_v7 = vpop.permute.xlu0 %2511 }
0x28ac   :  { %v2514_v14 = vmul.f32 %v6445_v16, %v2512_v7 }
0x28ad   :  { %v2721_v4 = vadd.f32 %v2720_v63, %v2719_v55  ;;  %v2726_v15 = vadd.f32 %v2725_v0, %v2724_v61 }
0x28ae   :  { %2742 = vrot.lane.b32.xlu0 %v2514_v14, %s5892_s30 }
0x28af   :  { %v2727_v17 = vrot.slane %v2726_v15, 2  ;;  %v2722_v28 = vrot.slane %v2721_v4, 1 }
0x28b1   :  { %v2728_v18 = vadd.f32 %v2727_v17, %v2726_v15  ;;  %v2723_v60 = vadd.f32 %v2722_v28, %v2721_v4 }
0x28b3   :  { %v2729_v19 = vrot.slane %v2728_v18, 1 }
0x28b5   :  { %v2730_v22 = vadd.f32 %v2729_v19, %v2728_v18 }
0x28b7   :  { %v2818_v24 = vsel %vm1830_vm9, %v2730_v22, %v2723_v60 }
0x28b8   :  { %2819 = vrot.lane.b32.xlu0 %v2818_v24, %s5892_s30 }
0x2920   :  { %v2743_v25 = vpop.permute.xlu0 %2742 }
0x2921   :  { %5284 = vmatmul.mubr.msk.f32.vlgmr.msra.gmra.mxu0 %vm179_vm1, %v2743_v25 }
0x2922   :  { %5298 = vmatpush3.msra.mxu0 %v6249_v56  ;;  %5305 = vmatprep.mubr.msk.f32.mxu0 %vm5889_vm0, %v5888_v1 }
0x2923   :  { %5299 = vmatprep.subr.mxu0 %v5888_v1 }
0x2924   :  { %5300 = vmatpush3.msra.mxu0 %v6251_v57  ;;  %v2896_v57 = vrot.slane %v6244_v45, %v619_v3 }
0x2925   :  { %5301 = vmatprep.subr.mxu0 %v5888_v1 }
0x2926   :  { %5302 = vmatpush3.msra.mxu0 %v6255_v58 }
0x2927   :  { %5303 = vmatprep.subr.mxu0 %v5888_v1 }
0x2928   :  { %5304 = vmatpush3.msra.mxu0 %v6259_v59 }
0x2929   :  { %5319 = vmatprep.subr.mxu0 %v5888_v1 }
0x292a   :  { %v2820_v16 = vpop.permute.xlu0 %2819 }
0x292b   :  { %5295 = vmatmul.mubr.msk.f32.vlgmr.msra.gmra.mxu1 %vm179_vm1, %v2820_v16 }
0x292c   :  { %5316 = vmatprep.mubr.msk.f32.mxu1 %vm5889_vm0, %v5888_v1 }
0x29e1   :  { %v2812_v56 = vpop.f32.mrf.mxu0 }
0x29e3   :  { %v5285_v26 = vpop.f32.mrf.mxu0 }
0x29eb   :  { %v2889_v30 = vpop.f32.mrf.mxu1 }
0x29ec   :  { %v2890_v58 = vadd.f32 %v2889_v30, %v2812_v56 }
0x29ed   :  { %v5296_v2 = vpop.f32.mrf.mxu1 }
0x29ee   :  { %v2897_v33 = vadd.f32 %v2896_v57, %v2890_v58 }
0x29f0   :  { %5602 = vtanh.f32 %v2897_v33  ;;  %v4893_v34 = vmul.f32 -1.442695, %v2897_v33 }
0x29f2   :  { %5604 = vpow2.f32 %v4893_v34 }
0x29fd   :  { %v5603_v59 = vpop.eup %5602 }
0x29fe   :  { %2907 = vrot.lane.b32.xlu1 %v5603_v59, %s5891_s0 }
0x29ff   :  { %v5605_v35 = vpop.eup %5604 }
0x2a00   :  { %v2901_v36 = vadd.f32 1.0, %v5605_v35 }
0x2a02   :  { %5606 = vrcp.f32 %v2901_v36 }
0x2a0f   :  { %v6524_v37 = vpop.eup %5606 }
0x2a10   :  { %v2905_v3 = vmul.f32 %v6524_v37, %v6451_v21 }
0x2a70   :  { %v2908_v38 = vpop.permute.xlu1 %2907 }
0x2a71   :  { %v2910_v40 = vmul.f32 %v6524_v37, %v2908_v38 }
0x2a73   :  { %2912 = vrot.lane.b32.xlu0 %v2910_v40, %s5892_s30 }
0x2ae5   :  { %v2913_v45 = vpop.permute.xlu0 %2912 }
0x2ae6   :  { %v6530_v43 = vadd.f32 %v2913_v45, %v2905_v3 }
0x2ae8   :  { %2923 = vrot.lane.b32.xlu0 %v6530_v43, %s5902_s27 }
0x2b5a   :  { %v2924_v46 = vpop.permute.xlu0 %2923 }
0x2b5b   :  { %5306 = vmatmul.mubr.msk.f32.vlgmr.msra.gmra.mxu0 %vm179_vm1, %v2924_v46 }
0x2b5c   :  { %5327 = vmatprep.mubr.msk.f32.mxu0 %vm5889_vm0, %v5888_v1 }
0x2c1b   :  { %v2993_v5 = vpop.f32.mrf.mxu0 }
0x2c1c   :  { %v2994_v48 = vadd.f32 %v6281_v11, %v2993_v5 }
0x2c1d   :  { %v5307_v49 = vpop.f32.mrf.mxu0 }
0x2c1e   :  { %v3004_v8 = vrot.slane %v2994_v48, %v6074_v6  ;;  %v3147_v48 = vld [vmem:[#allocation11 + $0x98] sm:$0xff]  ;;  %v3146_v49 = vld [vmem:[#allocation11 + $0x90] sm:$0xff] }
0x2c1f   :  { %5309 = vmatpush3.msra.mxu1 %v3147_v48 }
0x2c20   :  { %v3005_v51 = vcombine.high %v3004_v8, %v3004_v8  ;;  %v3012_v21 = vrot.slane %v3004_v8, %v6074_v6  ;;  %5310 = vmatprep.subr.mxu1 %v5888_v1  ;;  %v3145_v8 = vld [vmem:[#allocation11 + $0x88] sm:$0xff] }
0x2c21   :  { %5311 = vmatpush3.msra.mxu1 %v3146_v49 }
0x2c22   :  { %v3019_v52 = vrot.slane %v3005_v51, %v6074_v6  ;;  %v3023_v53 = vrot.slane %v3012_v21, %v6038_v12  ;;  %5312 = vmatprep.subr.mxu1 %v5888_v1  ;;  %v3144_v51 = vld [vmem:[#allocation11 + $0x80] sm:$0xff]  ;;  %v3142_v21 = vld [vmem:[#allocation9 + $0x98] sm:$0xff] }
0x2c23   :  { %5313 = vmatpush3.msra.mxu1 %v3145_v8  ;;  %5320 = vmatpush3.msra.mxu0 %v3142_v21 }
0x2c24   :  { %v3027_v39 = vrot.slane %v3019_v52, %v6038_v12  ;;  %v3030_v13 = vadd.f32 %v3023_v53, %v6289_v20  ;;  %5314 = vmatprep.subr.mxu1 %v5888_v1  ;;  %v3141_v52 = vld [vmem:[#allocation9 + $0x90] sm:$0xff]  ;;  %5321 = vmatprep.subr.mxu0 %v5888_v1 }
0x2c25   :  { %5315 = vmatpush3.msra.mxu1 %v3144_v51  ;;  %5322 = vmatpush3.msra.mxu0 %v3141_v52 }
0x2c26   :  { %v3031_v54 = vadd.f32 %v3027_v39, %v6293_v23  ;;  %5608 = vtanh.f32 %v3030_v13  ;;  %5330 = vmatprep.subr.mxu1 %v5888_v1  ;;  %v3140_v39 = vld [vmem:[#allocation9 + $0x88] sm:$0xff]  ;;  %5323 = vmatprep.subr.mxu0 %v5888_v1 }
0x2c27   :  { %5324 = vmatpush3.msra.mxu0 %v3140_v39 }
0x2c28   :  { %5610 = vtanh.f32 %v3031_v54  ;;  %v3139_v54 = vld [vmem:[#allocation9 + $0x80] sm:$0xff]  ;;  %5325 = vmatprep.subr.mxu0 %v5888_v1 }
0x2c29   :  { %5326 = vmatpush3.msra.mxu0 %v3139_v54  ;;  %v6632_v54 = vld [vmem:[%s6908_s10] ss:$0 sm:$0xff] }
0x2c2a   :  { %5341 = vmatprep.subr.mxu0 %v5888_v1 }
0x2c33   :  { %v5609_v55 = vpop.eup %5608 }
0x2c34   :  { %v3034_v11 = vmul.f32 %v5609_v55, %v6301_v27 }
0x2c35   :  { %v5611_v61 = vpop.eup %5610 }
0x2c36   :  { %v3036_v62 = vsel %vm179_vm1, %v3034_v11, 0.0  ;;  %v3035_v63 = vmul.f32 %v5611_v61, %v6301_v27 }
0x2c37   :  { %3037 = vadd.xlane.f32.xlu0 %v3036_v62 }
0x2c38   :  { %v3039_v0 = vsel %vm179_vm1, %v3035_v63, 0.0 }
0x2c39   :  { %3040 = vadd.xlane.f32.xlu1 %v3039_v0 }
0x2cc0   :  { %v3038_v7 = vpop.xlane.xlu0 %3037 }
0x2cc1   :  { %v3042_v14 = vadd.f32 %v3038_v7, %v6311_v44 }
0x2cc2   :  { %v3041_v4 = vpop.xlane.xlu1 %3040 }
0x2cc3   :  { %v3043_v15 = vadd.f32 %v3041_v4, %v6311_v44  ;;  %v3049_v17 = vrot.slane %v3042_v14, %v6309_v42 }
0x2cc5   :  { %v3053_v18 = vrot.slane %v3043_v15, %v6309_v42 }
0x2cc7   :  { %v3054_v28 = vsel %vm1830_vm9, %v3053_v18, %v3049_v17 }
0x2cc8   :  { %v3056_v19 = vsel %vm1833_vm10, %v3054_v28, -inf }
0x2cc9   :  { %3057 = vmax.xlane.f32.xlu0 %v3056_v19 }
0x2d52   :  { %v3058_v27 = vpop.xlane.xlu0 %3057 }
0x2d53   :  { %v3063_v60 = vrot.slane %v3058_v27, %v6038_v12  ;;  %v3067_v22 = vrot.slane %v3058_v27, %v6058_v41 }
0x2d55   :  { %v3070_v24 = vsub.f32 %v3042_v14, %v3063_v60  ;;  %v3071_v25 = vsub.f32 %v3043_v15, %v3067_v22 }
0x2d57   :  { %v3072_v16 = vmul.f32 1.442695, %v3070_v24  ;;  %v3074_v56 = vmul.f32 1.442695, %v3071_v25 }
0x2d59   :  { %5612 = vpow2.f32 %v3072_v16 }
0x2d5a   :  { %5614 = vpow2.f32 %v3074_v56 }
0x2d66   :  { %v5613_v26 = vpop.eup %5612 }
0x2d67   :  { %v5615_v57 = vpop.eup %5614  ;;  %3079 = vperm.xlu0 %5476, %v5613_v26  }
0x2d68   :  { %3082 = vperm.xlu1 %5477, %v5615_v57  }
0x2de2   :  { %v3080_v30 = vpop.permute.xlu0 %3079 }
0x2de3   :  { %v3083_v58 = vpop.permute.xlu1 %3082  ;;  %v3087_v2 = vrot.slane %v3080_v30, %v6309_v42  ;;  %v6586_v30 = vld [vmem:[#allocation14 + $0x18] sm:$0xff] }
0x2de4   :  { %v3091_v33 = vrot.slane %v3083_v58, %v6309_v42  ;;  %v6596_v58 = vld [vmem:[#allocation14 + $0x8] sm:$0xff] }
0x2de6   :  { %v3092_v59 = vsel %vm1830_vm9, %v3091_v33, %v3087_v2  ;;  %v6600_v2 = vld [vmem:[#allocation14] sm:$0xff] }
0x2de7   :  { %v3094_v34 = vsel %vm1833_vm10, %v3092_v59, 0.0 }
0x2de8   :  { %3095 = vadd.xlane.f32.xlu0 %v3094_v34 }
0x2e71   :  { %v3096_v35 = vpop.xlane.xlu0 %3095 }
0x2e72   :  { %v3101_v36 = vrot.slane %v3096_v35, %v6038_v12  ;;  %v3105_v38 = vrot.slane %v3096_v35, %v6058_v41  ;;  %v6610_v35 = vld [vmem:[%s6904_s6] sm:$0xff] }
0x2e74   :  { %5616 = vrcp.f32 %v3101_v36  ;;  %v3303_v36 = vrot.slane %v6610_v35, %v740_v47 }
0x2e75   :  { %5618 = vrcp.f32 %v3105_v38 }
0x2e76   :  { %5620 = vtanh.f32 %v6530_v43 }
0x2e81   :  { %v5617_v40 = vpop.eup %5616 }
0x2e82   :  { %v3109_v3 = vmul.f32 %v5617_v40, %v5613_v26  ;;  %v5619_v45 = vpop.eup %5618 }
0x2e83   :  { %v3111_v46 = vmul.f32 %v5619_v45, %v5615_v57  ;;  %v5621_v5 = vpop.eup %5620 }
0x2e84   :  { %3114 = vperm.xlu1 %5477, %v3109_v3  }
0x2e88   :  { %3119 = vperm.xlu1 %5477, %v3111_v46  }
0x2e8c   :  { %2918 = vrot.lane.b32.xlu1 %v5621_v5, %s5891_s0 }
0x2eff   :  { %v3115_v53 = vpop.permute.xlu1 %3114 }
0x2f00   :  { %v3122_v13 = vmul.f32 %v3115_v53, %v6217_v31  ;;  %v4769_v62 = vrot.slane %v3115_v53, %v6309_v42 }
0x2f02   :  { %v3124_v55 = vsel %vm1902_vm11, %v3122_v13, 0.0 }
0x2f03   :  { %v3125_v11 = vrot.slane %v3124_v55, 4  ;;  %v3120_v61 = vpop.permute.xlu1 %3119 }
0x2f04   :  { %v3123_v63 = vmul.f32 %v3120_v61, %v6222_v32  ;;  %v4773_v0 = vrot.slane %v3120_v61, %v6309_v42 }
0x2f05   :  { %v3126_v7 = vadd.f32 %v3125_v11, %v3124_v55 }
0x2f06   :  { %v3131_v14 = vsel %vm1902_vm11, %v3123_v63, 0.0  ;;  %v4809_v4 = vsel %vm1830_vm9, %v4773_v0, %v4769_v62 }
0x2f07   :  { %v3127_v15 = vrot.slane %v3126_v7, 2  ;;  %v3132_v17 = vrot.slane %v3131_v14, 4  ;;  %4825 = vst.msk [vmem:[#allocation15 + $0x6] sm:$0x3] %vm1833_vm10, %v4809_v4  ;;  %v2919_v18 = vpop.permute.xlu1 %2918 }
0x2f08   :  { %v2921_v28 = vmul.f32 %v6524_v37, %v2919_v18  ;;  %v6592_v37 = vld [vmem:[#allocation14 + $0x10] sm:$0xff] }
0x2f09   :  { %v3128_v19 = vadd.f32 %v3127_v15, %v3126_v7  ;;  %v3133_v27 = vadd.f32 %v3132_v17, %v3131_v14  ;;  %v6645_v17 = vld [vmem:[%s6909_s11] ss:$0 sm:$0xff]  ;;  %s5903_s11 = smov [#allocation15]  }
0x2f0a   :  { %3149 = vrot.lane.b32.xlu1 %v2921_v28, %s5892_s30  ;;  %s4835_s19 = sshll.u32 %s5903_s11, 4  ;;  %s4836_s19 = int_to_ptr.vmem [resolvable:$true] %s4835_s19 }
0x2f0b   :  { %v3134_v60 = vrot.slane %v3133_v27, 2  ;;  %v3129_v22 = vrot.slane %v3128_v19, 1  ;;  %s5847_s20 = scalar_lea.vmem %s4836_s19, 256  ;;  %p5852_p8 = scmp.lt.s32.totalorder %s4836_s19, %s4836_s19 }
0x2f0c   :  { %p5848_p7 = scmp.ne.s32.totalorder %s4836_s19, %s5847_s20  ;;  %p5853_p9 = scmp.lt.s32.totalorder %s5847_s20, %s5847_s20 }
0x2f0d   :  { %v3135_v24 = vadd.f32 %v3134_v60, %v3133_v27  ;;  %v3130_v16 = vadd.f32 %v3129_v22, %v3128_v19 }
0x2f0e   :  { %p5854_p10 = por %p5853_p9, %p5852_p8 }
0x2f0f   :  { %v3136_v25 = vrot.slane %v3135_v24, 1 }
0x2f10   :  { %p5855_p11 = pnand %p5854_p10, %p5848_p7 }
0x2f11   :  { %v3137_v56 = vadd.f32 %v3136_v25, %v3135_v24 }
0x2f13   :  { %v3225_v26 = vsel %vm1830_vm9, %v3137_v56, %v3130_v16 }
0x2f14   :  { %3226 = vrot.lane.b32.xlu1 %v3225_v26, %s5892_s30 }
0x2f7c   :  { %v3150_v57 = vpop.permute.xlu1 %3149 }
0x2f7d   :  { %5317 = vmatmul.mubr.msk.f32.vlgmr.msra.gmra.mxu1 %vm179_vm1, %v3150_v57 }
0x2f7e   :  { %5331 = vmatpush3.msra.mxu1 %v6586_v30  ;;  %5338 = vmatprep.mubr.msk.f32.mxu1 %vm5889_vm0, %v5888_v1 }
0x2f7f   :  { %5332 = vmatprep.subr.mxu1 %v5888_v1 }
0x2f80   :  { %5333 = vmatpush3.msra.mxu1 %v6592_v37 }
0x2f81   :  { %5334 = vmatprep.subr.mxu1 %v5888_v1 }
0x2f82   :  { %5335 = vmatpush3.msra.mxu1 %v6596_v58 }
0x2f83   :  { %5336 = vmatprep.subr.mxu1 %v5888_v1 }
0x2f84   :  { %5337 = vmatpush3.msra.mxu1 %v6600_v2 }
0x2f85   :  { %5352 = vmatprep.subr.mxu1 %v5888_v1 }
0x2f86   :  { %v3227_v33 = vpop.permute.xlu1 %3226 }
0x2f87   :  { %5328 = vmatmul.mubr.msk.f32.vlgmr.msra.gmra.mxu0 %vm179_vm1, %v3227_v33 }
0x2f88   :  { %5349 = vmatprep.mubr.msk.f32.mxu0 %vm5889_vm0, %v5888_v1 }
0x303d   :  { %v3219_v59 = vpop.f32.mrf.mxu1 }
0x303f   :  { %v5318_v34 = vpop.f32.mrf.mxu1 }
0x3047   :  { %v3296_v38 = vpop.f32.mrf.mxu0 }
0x3048   :  { %v3297_v40 = vadd.f32 %v3296_v38, %v3219_v59 }
0x3049   :  { %v5329_v3 = vpop.f32.mrf.mxu0 }
0x304a   :  { %v3304_v45 = vadd.f32 %v3303_v36, %v3297_v40 }
0x304c   :  { %5622 = vtanh.f32 %v3304_v45  ;;  %v4897_v5 = vmul.f32 -1.442695, %v3304_v45 }
0x304e   :  { %5624 = vpow2.f32 %v4897_v5 }
0x3059   :  { %v5623_v46 = vpop.eup %5622 }
0x305a   :  { %3314 = vrot.lane.b32.xlu1 %v5623_v46, %s5891_s0 }
0x305b   :  { %v5625_v48 = vpop.eup %5624 }
0x305c   :  { %v3308_v49 = vadd.f32 1.0, %v5625_v48 }
0x305e   :  { %5626 = vrcp.f32 %v3308_v49 }
0x306b   :  { %v6616_v8 = vpop.eup %5626 }
0x306c   :  { %v3312_v47 = vmul.f32 %v6616_v8, %v6530_v43 }
0x30cc   :  { %v3315_v51 = vpop.permute.xlu1 %3314 }
0x30cd   :  { %v3317_v21 = vmul.f32 %v6616_v8, %v3315_v51 }
0x30cf   :  { %3319 = vrot.lane.b32.xlu1 %v3317_v21, %s5892_s30 }
0x3141   :  { %v3320_v52 = vpop.permute.xlu1 %3319 }
0x3142   :  { %v6622_v53 = vadd.f32 %v3320_v52, %v3312_v47 }
0x3144   :  { %3330 = vrot.lane.b32.xlu0 %v6622_v53, %s5902_s27 }
0x31b6   :  { %v3331_v39 = vpop.permute.xlu0 %3330 }
0x31b7   :  { %5339 = vmatmul.mubr.msk.f32.vlgmr.msra.gmra.mxu1 %vm179_vm1, %v3331_v39 }
0x31b8   :  { %5360 = vmatprep.mubr.msk.f32.mxu1 %vm5889_vm0, %v5888_v1 }
0x3277   :  { %v3400_v13 = vpop.f32.mrf.mxu1 }
0x3278   :  { %v3401_v43 = vadd.f32 %v6632_v54, %v3400_v13 }
0x3279   :  { %v5340_v55 = vpop.f32.mrf.mxu1 }
0x327a   :  { %v3411_v11 = vrot.slane %v3401_v43, %v6074_v6 }
0x327c   :  { %v3412_v61 = vcombine.high %v3411_v11, %v3411_v11  ;;  %v3419_v62 = vrot.slane %v3411_v11, %v6074_v6 }
0x327e   :  { %v3426_v63 = vrot.slane %v3412_v61, %v6074_v6  ;;  %v3430_v0 = vrot.slane %v3419_v62, %v6038_v12 }
0x3280   :  { %v3434_v7 = vrot.slane %v3426_v63, %v6038_v12  ;;  %v3437_v14 = vadd.f32 %v3430_v0, %v6289_v20  ;;  %v3554_v0 = vld [vmem:[#allocation11 + $0xb8] sm:$0xff] }
0x3281   :  { %5342 = vmatpush3.msra.mxu0 %v3554_v0 }
0x3282   :  { %v3438_v4 = vadd.f32 %v3434_v7, %v6293_v23  ;;  %5628 = vtanh.f32 %v3437_v14  ;;  %v3553_v7 = vld [vmem:[#allocation11 + $0xb0] sm:$0xff]  ;;  %5343 = vmatprep.subr.mxu0 %v5888_v1  ;;  %v3552_v14 = vld [vmem:[#allocation11 + $0xa8] sm:$0xff] }
0x3283   :  { %5344 = vmatpush3.msra.mxu0 %v3553_v7 }
0x3284   :  { %5630 = vtanh.f32 %v3438_v4  ;;  %5345 = vmatprep.subr.mxu0 %v5888_v1  ;;  %v3551_v4 = vld [vmem:[#allocation11 + $0xa0] sm:$0xff] }
0x3285   :  { %5346 = vmatpush3.msra.mxu0 %v3552_v14 }
0x3286   :  { %5347 = vmatprep.subr.mxu0 %v5888_v1 }
0x3287   :  { %5348 = vmatpush3.msra.mxu0 %v3551_v4 }
0x3288   :  { %5363 = vmatprep.subr.mxu0 %v5888_v1 }
0x328f   :  { %v5629_v15 = vpop.eup %5628 }
0x3290   :  { %v3441_v18 = vmul.f32 %v6645_v17, %v5629_v15  ;;  %v3549_v15 = vld [vmem:[#allocation9 + $0xb8] sm:$0xff] }
0x3291   :  { %v5631_v28 = vpop.eup %5630  ;;  %5353 = vmatpush3.msra.mxu1 %v3549_v15 }
0x3292   :  { %v3443_v19 = vsel %vm179_vm1, %v3441_v18, 0.0  ;;  %v3442_v27 = vmul.f32 %v6645_v17, %v5631_v28  ;;  %v3548_v18 = vld [vmem:[#allocation9 + $0xb0] sm:$0xff]  ;;  %5354 = vmatprep.subr.mxu1 %v5888_v1 }
0x3293   :  { %3444 = vadd.xlane.f32.xlu1 %v3443_v19  ;;  %v3547_v19 = vld [vmem:[#allocation9 + $0xa8] sm:$0xff]  ;;  %5355 = vmatpush3.msra.mxu1 %v3548_v18 }
0x3294   :  { %v3446_v60 = vsel %vm179_vm1, %v3442_v27, 0.0  ;;  %5356 = vmatprep.subr.mxu1 %v5888_v1 }
0x3295   :  { %3447 = vadd.xlane.f32.xlu0 %v3446_v60  ;;  %v3546_v60 = vld [vmem:[#allocation9 + $0xa0] sm:$0xff]  ;;  %5357 = vmatpush3.msra.mxu1 %v3547_v19 }
0x3296   :  { %5358 = vmatprep.subr.mxu1 %v5888_v1 }
0x3297   :  { %5359 = vmatpush3.msra.mxu1 %v3546_v60 }
0x3298   :  { %5374 = vmatprep.subr.mxu1 %v5888_v1 }
0x331c   :  { %v3445_v22 = vpop.xlane.xlu1 %3444 }
0x331d   :  { %v3449_v24 = vadd.f32 %v3445_v22, %v6311_v44 }
0x331e   :  { %v3448_v25 = vpop.xlane.xlu0 %3447 }
0x331f   :  { %v3450_v16 = vadd.f32 %v3448_v25, %v6311_v44  ;;  %v3456_v56 = vrot.slane %v3449_v24, %v6309_v42 }
0x3321   :  { %v3460_v26 = vrot.slane %v3450_v16, %v6309_v42 }
0x3323   :  { %v3461_v57 = vsel %vm1830_vm9, %v3460_v26, %v3456_v56 }
0x3324   :  { %v3463_v33 = vsel %vm1833_vm10, %v3461_v57, -inf }
0x3325   :  { %3464 = vmax.xlane.f32.xlu1 %v3463_v33 }
0x33ae   :  { %v3465_v59 = vpop.xlane.xlu1 %3464 }
0x33af   :  { %v3470_v34 = vrot.slane %v3465_v59, %v6038_v12  ;;  %v3474_v36 = vrot.slane %v3465_v59, %v6058_v41 }
0x33b1   :  { %v3477_v38 = vsub.f32 %v3449_v24, %v3470_v34  ;;  %v3478_v40 = vsub.f32 %v3450_v16, %v3474_v36 }
0x33b3   :  { %v3479_v3 = vmul.f32 1.442695, %v3477_v38  ;;  %v3481_v45 = vmul.f32 1.442695, %v3478_v40 }
0x33b5   :  { %5632 = vpow2.f32 %v3479_v3 }
0x33b6   :  { %5634 = vpow2.f32 %v3481_v45 }
0x33c2   :  { %v5633_v46 = vpop.eup %5632 }
0x33c3   :  { %v5635_v5 = vpop.eup %5634  ;;  %3486 = vperm.xlu1 %5477, %v5633_v46  }
0x33c4   :  { %3489 = vperm.xlu0 %5476, %v5635_v5  }
0x343e   :  { %v3487_v48 = vpop.permute.xlu1 %3486 }
0x343f   :  { %v3490_v49 = vpop.permute.xlu0 %3489  ;;  %v3494_v51 = vrot.slane %v3487_v48, %v6309_v42 }
0x3440   :  { %v3498_v21 = vrot.slane %v3490_v49, %v6309_v42 }
0x3442   :  { %v3499_v47 = vsel %vm1830_vm9, %v3498_v21, %v3494_v51 }
0x3443   :  { %v3501_v52 = vsel %vm1833_vm10, %v3499_v47, 0.0 }
0x3444   :  { %3502 = vadd.xlane.f32.xlu1 %v3501_v52 }
0x34cd   :  { %v3503_v39 = vpop.xlane.xlu1 %3502 }
0x34ce   :  { %v3508_v13 = vrot.slane %v3503_v39, %v6038_v12  ;;  %v3512_v43 = vrot.slane %v3503_v39, %v6058_v41 }
0x34d0   :  { %5636 = vrcp.f32 %v3508_v13 }
0x34d1   :  { %5638 = vrcp.f32 %v3512_v43  ;;  %v3710_v43 = vrot.slane %v6610_v35, %v861_v29 }
0x34d2   :  { %5640 = vtanh.f32 %v6622_v53 }
0x34dd   :  { %v5637_v55 = vpop.eup %5636 }
0x34de   :  { %v3516_v11 = vmul.f32 %v5637_v55, %v5633_v46  ;;  %v5639_v61 = vpop.eup %5638 }
0x34df   :  { %v3518_v62 = vmul.f32 %v5639_v61, %v5635_v5  ;;  %v5641_v63 = vpop.eup %5640 }
0x34e0   :  { %3521 = vperm.xlu0 %5476, %v3516_v11  }
0x34e4   :  { %3526 = vperm.xlu0 %5476, %v3518_v62  }
0x34e8   :  { %3325 = vrot.lane.b32.xlu0 %v5641_v63, %s5891_s0 }
0x355b   :  { %v3522_v28 = vpop.permute.xlu0 %3521 }
0x355c   :  { %v3529_v27 = vmul.f32 %v3522_v28, %v6217_v31  ;;  %v4777_v16 = vrot.slane %v3522_v28, %v6309_v42 }
0x355e   :  { %v3531_v22 = vsel %vm1902_vm11, %v3529_v27, 0.0 }
0x355f   :  { %v3532_v24 = vrot.slane %v3531_v22, 4  ;;  %v3527_v25 = vpop.permute.xlu0 %3526 }
0x3560   :  { %v3530_v56 = vmul.f32 %v3527_v25, %v6222_v32  ;;  %v4781_v26 = vrot.slane %v3527_v25, %v6309_v42 }
0x3561   :  { %v3533_v57 = vadd.f32 %v3532_v24, %v3531_v22 }
0x3562   :  { %v3538_v33 = vsel %vm1902_vm11, %v3530_v56, 0.0  ;;  %v4810_v59 = vsel %vm1830_vm9, %v4781_v26, %v4777_v16 }
0x3563   :  { %v3534_v34 = vrot.slane %v3533_v57, 2  ;;  %v3539_v36 = vrot.slane %v3538_v33, 4  ;;  %4826 = vst.msk [vmem:[#allocation15 + $0x8] sm:$0x3] %vm1833_vm10, %v4810_v59  ;;  %v3326_v38 = vpop.permute.xlu0 %3325 }
0x3564   :  { %v3328_v40 = vmul.f32 %v6616_v8, %v3326_v38 }
0x3565   :  { %v3535_v3 = vadd.f32 %v3534_v34, %v3533_v57  ;;  %v3540_v45 = vadd.f32 %v3539_v36, %v3538_v33 }
0x3566   :  { %3556 = vrot.lane.b32.xlu0 %v3328_v40, %s5892_s30 }
0x3567   :  { %v3541_v46 = vrot.slane %v3540_v45, 2  ;;  %v3536_v5 = vrot.slane %v3535_v3, 1 }
0x3569   :  { %v3542_v48 = vadd.f32 %v3541_v46, %v3540_v45  ;;  %v3537_v51 = vadd.f32 %v3536_v5, %v3535_v3 }
0x356b   :  { %v3543_v49 = vrot.slane %v3542_v48, 1 }
0x356d   :  { %v3544_v21 = vadd.f32 %v3543_v49, %v3542_v48 }
0x356f   :  { %v3632_v47 = vsel %vm1830_vm9, %v3544_v21, %v3537_v51 }
0x3570   :  { %3633 = vrot.lane.b32.xlu0 %v3632_v47, %s5892_s30 }
0x35d8   :  { %v3557_v52 = vpop.permute.xlu0 %3556 }
0x35d9   :  { %5350 = vmatmul.mubr.msk.f32.vlgmr.msra.gmra.mxu0 %vm179_vm1, %v3557_v52 }
0x35da   :  { %5364 = vmatpush3.msra.mxu0 %v6586_v30  ;;  %5371 = vmatprep.mubr.msk.f32.mxu0 %vm5889_vm0, %v5888_v1 }
0x35db   :  { %5365 = vmatprep.subr.mxu0 %v5888_v1 }
0x35dc   :  { %5366 = vmatpush3.msra.mxu0 %v6592_v37 }
0x35dd   :  { %5367 = vmatprep.subr.mxu0 %v5888_v1 }
0x35de   :  { %5368 = vmatpush3.msra.mxu0 %v6596_v58 }
0x35df   :  { %5369 = vmatprep.subr.mxu0 %v5888_v1 }
0x35e0   :  { %5370 = vmatpush3.msra.mxu0 %v6600_v2 }
0x35e1   :  { %5385 = vmatprep.subr.mxu0 %v5888_v1 }
0x35e2   :  { %v3634_v8 = vpop.permute.xlu0 %3633 }
0x35e3   :  { %5361 = vmatmul.mubr.msk.f32.vlgmr.msra.gmra.mxu1 %vm179_vm1, %v3634_v8 }
0x35e4   :  { %5382 = vmatprep.mubr.msk.f32.mxu1 %vm5889_vm0, %v5888_v1 }
0x3699   :  { %v3626_v39 = vpop.f32.mrf.mxu0 }
0x369b   :  { %v5351_v13 = vpop.f32.mrf.mxu0 }
0x36a3   :  { %v3703_v55 = vpop.f32.mrf.mxu1 }
0x36a4   :  { %v3704_v11 = vadd.f32 %v3703_v55, %v3626_v39 }
0x36a5   :  { %v5362_v61 = vpop.f32.mrf.mxu1 }
0x36a6   :  { %v3711_v62 = vadd.f32 %v3710_v43, %v3704_v11 }
0x36a8   :  { %5642 = vtanh.f32 %v3711_v62  ;;  %v4901_v0 = vmul.f32 -1.442695, %v3711_v62 }
0x36aa   :  { %5644 = vpow2.f32 %v4901_v0 }
0x36b5   :  { %v5643_v63 = vpop.eup %5642 }
0x36b6   :  { %3721 = vrot.lane.b32.xlu1 %v5643_v63, %s5891_s0 }
0x36b7   :  { %v5645_v7 = vpop.eup %5644 }
0x36b8   :  { %v3715_v14 = vadd.f32 1.0, %v5645_v7 }
0x36ba   :  { %5646 = vrcp.f32 %v3715_v14 }
0x36c7   :  { %v6705_v4 = vpop.eup %5646 }
0x36c8   :  { %v3719_v29 = vmul.f32 %v6705_v4, %v6622_v53 }
0x3728   :  { %v3722_v15 = vpop.permute.xlu1 %3721 }
0x3729   :  { %v3724_v18 = vmul.f32 %v6705_v4, %v3722_v15 }
0x372b   :  { %3726 = vrot.lane.b32.xlu0 %v3724_v18, %s5892_s30 }
0x379d   :  { %v3727_v28 = vpop.permute.xlu0 %3726 }
0x379e   :  { %v6711_v19 = vadd.f32 %v3727_v28, %v3719_v29 }
0x37a0   :  { %3737 = vrot.lane.b32.xlu0 %v6711_v19, %s5902_s27 }
0x3812   :  { %v3738_v27 = vpop.permute.xlu0 %3737 }
0x3813   :  { %5372 = vmatmul.mubr.msk.f32.vlgmr.msra.gmra.mxu0 %vm179_vm1, %v3738_v27 }
0x3814   :  { %5393 = vmatprep.mubr.msk.f32.mxu0 %vm5889_vm0, %v5888_v1 }
0x38d3   :  { %v3807_v60 = vpop.f32.mrf.mxu0 }
0x38d4   :  { %v3808_v22 = vadd.f32 %v6632_v54, %v3807_v60 }
0x38d5   :  { %v5373_v24 = vpop.f32.mrf.mxu0 }
0x38d6   :  { %v3818_v25 = vrot.slane %v3808_v22, %v6074_v6 }
0x38d8   :  { %v3819_v16 = vcombine.high %v3818_v25, %v3818_v25  ;;  %v3826_v53 = vrot.slane %v3818_v25, %v6074_v6 }
0x38da   :  { %v3833_v56 = vrot.slane %v3819_v16, %v6074_v6  ;;  %v3837_v26 = vrot.slane %v3826_v53, %v6038_v12 }
0x38dc   :  { %v3841_v57 = vrot.slane %v3833_v56, %v6038_v12  ;;  %v3844_v33 = vadd.f32 %v3837_v26, %v6289_v20  ;;  %v3961_v56 = vld [vmem:[#allocation11 + $0xd8] sm:$0xff]  ;;  %v3960_v26 = vld [vmem:[#allocation11 + $0xd0] sm:$0xff] }
0x38dd   :  { %5375 = vmatpush3.msra.mxu1 %v3961_v56 }
0x38de   :  { %v3845_v59 = vadd.f32 %v3841_v57, %v6293_v23  ;;  %5648 = vtanh.f32 %v3844_v33  ;;  %5376 = vmatprep.subr.mxu1 %v5888_v1  ;;  %v3959_v57 = vld [vmem:[#allocation11 + $0xc8] sm:$0xff]  ;;  %v3958_v33 = vld [vmem:[#allocation11 + $0xc0] sm:$0xff] }
0x38df   :  { %5377 = vmatpush3.msra.mxu1 %v3960_v26 }
0x38e0   :  { %5650 = vtanh.f32 %v3845_v59  ;;  %5378 = vmatprep.subr.mxu1 %v5888_v1  ;;  %v3956_v59 = vld [vmem:[#allocation9 + $0xd8] sm:$0xff] }
0x38e1   :  { %5379 = vmatpush3.msra.mxu1 %v3959_v57  ;;  %5386 = vmatpush3.msra.mxu0 %v3956_v59 }
0x38e2   :  { %5380 = vmatprep.subr.mxu1 %v5888_v1  ;;  %5387 = vmatprep.subr.mxu0 %v5888_v1 }
0x38e3   :  { %5381 = vmatpush3.msra.mxu1 %v3958_v33 }
0x38e4   :  { %5396 = vmatprep.subr.mxu1 %v5888_v1 }
0x38eb   :  { %v5649_v34 = vpop.eup %5648 }
0x38ec   :  { %v3848_v36 = vmul.f32 %v6645_v17, %v5649_v34  ;;  %v3955_v34 = vld [vmem:[#allocation9 + $0xd0] sm:$0xff] }
0x38ed   :  { %v5651_v38 = vpop.eup %5650  ;;  %5388 = vmatpush3.msra.mxu0 %v3955_v34 }
0x38ee   :  { %v3850_v40 = vsel %vm179_vm1, %v3848_v36, 0.0  ;;  %v3849_v3 = vmul.f32 %v6645_v17, %v5651_v38  ;;  %v3954_v38 = vld [vmem:[#allocation9 + $0xc8] sm:$0xff]  ;;  %5389 = vmatprep.subr.mxu0 %v5888_v1 }
0x38ef   :  { %3851 = vadd.xlane.f32.xlu0 %v3850_v40  ;;  %5390 = vmatpush3.msra.mxu0 %v3954_v38 }
0x38f0   :  { %v3853_v45 = vsel %vm179_vm1, %v3849_v3, 0.0  ;;  %v3953_v3 = vld [vmem:[#allocation9 + $0xc0] sm:$0xff]  ;;  %5391 = vmatprep.subr.mxu0 %v5888_v1 }
0x38f1   :  { %3854 = vadd.xlane.f32.xlu1 %v3853_v45  ;;  %5392 = vmatpush3.msra.mxu0 %v3953_v3 }
0x38f2   :  { %5407 = vmatprep.subr.mxu0 %v5888_v1 }
0x3978   :  { %v3852_v46 = vpop.xlane.xlu0 %3851 }
0x3979   :  { %v3856_v5 = vadd.f32 %v3852_v46, %v6311_v44 }
0x397a   :  { %v3855_v48 = vpop.xlane.xlu1 %3854 }
0x397b   :  { %v3857_v49 = vadd.f32 %v3855_v48, %v6311_v44  ;;  %v3863_v51 = vrot.slane %v3856_v5, %v6309_v42 }
0x397d   :  { %v3867_v21 = vrot.slane %v3857_v49, %v6309_v42 }
0x397f   :  { %v3868_v47 = vsel %vm1830_vm9, %v3867_v21, %v3863_v51 }
0x3980   :  { %v3870_v52 = vsel %vm1833_vm10, %v3868_v47, -inf }
0x3981   :  { %3871 = vmax.xlane.f32.xlu0 %v3870_v52 }
0x3a0a   :  { %v3872_v8 = vpop.xlane.xlu0 %3871 }
0x3a0b   :  { %v3877_v39 = vrot.slane %v3872_v8, %v6038_v12  ;;  %v3881_v13 = vrot.slane %v3872_v8, %v6058_v41 }
0x3a0d   :  { %v3884_v43 = vsub.f32 %v3856_v5, %v3877_v39  ;;  %v3885_v55 = vsub.f32 %v3857_v49, %v3881_v13 }
0x3a0f   :  { %v3886_v11 = vmul.f32 1.442695, %v3884_v43  ;;  %v3888_v61 = vmul.f32 1.442695, %v3885_v55 }
0x3a11   :  { %5652 = vpow2.f32 %v3886_v11 }
0x3a12   :  { %5654 = vpow2.f32 %v3888_v61 }
0x3a1e   :  { %v5653_v62 = vpop.eup %5652 }
0x3a1f   :  { %v5655_v63 = vpop.eup %5654  ;;  %3893 = vperm.xlu0 %5476, %v5653_v62  }
0x3a20   :  { %3896 = vperm.xlu1 %5477, %v5655_v63  }
0x3a9a   :  { %v3894_v0 = vpop.permute.xlu0 %3893 }
0x3a9b   :  { %v3897_v7 = vpop.permute.xlu1 %3896  ;;  %v3901_v14 = vrot.slane %v3894_v0, %v6309_v42 }
0x3a9c   :  { %v3905_v15 = vrot.slane %v3897_v7, %v6309_v42 }
0x3a9e   :  { %v3906_v18 = vsel %vm1830_vm9, %v3905_v15, %v3901_v14 }
0x3a9f   :  { %v3908_v29 = vsel %vm1833_vm10, %v3906_v18, 0.0 }
0x3aa0   :  { %3909 = vadd.xlane.f32.xlu0 %v3908_v29 }
0x3b29   :  { %v3910_v28 = vpop.xlane.xlu0 %3909 }
0x3b2a   :  { %v3915_v27 = vrot.slane %v3910_v28, %v6038_v12  ;;  %v3919_v60 = vrot.slane %v3910_v28, %v6058_v41 }
0x3b2c   :  { %5656 = vrcp.f32 %v3915_v27  ;;  %v4117_v27 = vrot.slane %v6610_v35, %v982_v10 }
0x3b2d   :  { %5658 = vrcp.f32 %v3919_v60 }
0x3b2e   :  { %5660 = vtanh.f32 %v6711_v19 }
0x3b39   :  { %v5657_v22 = vpop.eup %5656 }
0x3b3a   :  { %v3923_v24 = vmul.f32 %v5657_v22, %v5653_v62  ;;  %v5659_v25 = vpop.eup %5658 }
0x3b3b   :  { %v3925_v16 = vmul.f32 %v5659_v25, %v5655_v63  ;;  %v5661_v53 = vpop.eup %5660 }
0x3b3c   :  { %3928 = vperm.xlu1 %5477, %v3923_v24  }
0x3b40   :  { %3933 = vperm.xlu1 %5477, %v3925_v16  }
0x3b44   :  { %3732 = vrot.lane.b32.xlu1 %v5661_v53, %s5891_s0 }
0x3bb7   :  { %v3929_v36 = vpop.permute.xlu1 %3928 }
0x3bb8   :  { %v3936_v40 = vmul.f32 %v3929_v36, %v6217_v31  ;;  %v4785_v48 = vrot.slane %v3929_v36, %v6309_v42 }
0x3bba   :  { %v3938_v45 = vsel %vm1902_vm11, %v3936_v40, 0.0 }
0x3bbb   :  { %v3939_v46 = vrot.slane %v3938_v45, 4  ;;  %v3934_v5 = vpop.permute.xlu1 %3933 }
0x3bbc   :  { %v3937_v49 = vmul.f32 %v3934_v5, %v6222_v32  ;;  %v4789_v51 = vrot.slane %v3934_v5, %v6309_v42 }
0x3bbd   :  { %v3940_v21 = vadd.f32 %v3939_v46, %v3938_v45 }
0x3bbe   :  { %v3945_v47 = vsel %vm1902_vm11, %v3937_v49, 0.0  ;;  %v4811_v52 = vsel %vm1830_vm9, %v4789_v51, %v4785_v48 }
0x3bbf   :  { %v3941_v8 = vrot.slane %v3940_v21, 2  ;;  %v3946_v39 = vrot.slane %v3945_v47, 4  ;;  %4827 = vst.msk [vmem:[#allocation15 + $0xa] sm:$0x3] %vm1833_vm10, %v4811_v52  ;;  %v3733_v13 = vpop.permute.xlu1 %3732 }
0x3bc0   :  { %v3735_v43 = vmul.f32 %v6705_v4, %v3733_v13 }
0x3bc1   :  { %v3942_v55 = vadd.f32 %v3941_v8, %v3940_v21  ;;  %v3947_v11 = vadd.f32 %v3946_v39, %v3945_v47 }
0x3bc2   :  { %3963 = vrot.lane.b32.xlu1 %v3735_v43, %s5892_s30 }
0x3bc3   :  { %v3948_v61 = vrot.slane %v3947_v11, 2  ;;  %v3943_v62 = vrot.slane %v3942_v55, 1 }
0x3bc5   :  { %v3949_v63 = vadd.f32 %v3948_v61, %v3947_v11  ;;  %v3944_v7 = vadd.f32 %v3943_v62, %v3942_v55 }
0x3bc7   :  { %v3950_v0 = vrot.slane %v3949_v63, 1 }
0x3bc9   :  { %v3951_v14 = vadd.f32 %v3950_v0, %v3949_v63 }
0x3bcb   :  { %v4039_v15 = vsel %vm1830_vm9, %v3951_v14, %v3944_v7 }
0x3bcc   :  { %4040 = vrot.lane.b32.xlu1 %v4039_v15, %s5892_s30 }
0x3c34   :  { %v3964_v18 = vpop.permute.xlu1 %3963 }
0x3c35   :  { %5383 = vmatmul.mubr.msk.f32.vlgmr.msra.gmra.mxu1 %vm179_vm1, %v3964_v18 }
0x3c36   :  { %5397 = vmatpush3.msra.mxu1 %v6586_v30  ;;  %5404 = vmatprep.mubr.msk.f32.mxu1 %vm5889_vm0, %v5888_v1 }
0x3c37   :  { %5398 = vmatprep.subr.mxu1 %v5888_v1 }
0x3c38   :  { %5399 = vmatpush3.msra.mxu1 %v6592_v37 }
0x3c39   :  { %5400 = vmatprep.subr.mxu1 %v5888_v1 }
0x3c3a   :  { %5401 = vmatpush3.msra.mxu1 %v6596_v58 }
0x3c3b   :  { %5402 = vmatprep.subr.mxu1 %v5888_v1 }
0x3c3c   :  { %5403 = vmatpush3.msra.mxu1 %v6600_v2 }
0x3c3d   :  { %5418 = vmatprep.subr.mxu1 %v5888_v1 }
0x3c3e   :  { %v4041_v4 = vpop.permute.xlu1 %4040 }
0x3c3f   :  { %5394 = vmatmul.mubr.msk.f32.vlgmr.msra.gmra.mxu0 %vm179_vm1, %v4041_v4 }
0x3c40   :  { %5415 = vmatprep.mubr.msk.f32.mxu0 %vm5889_vm0, %v5888_v1 }
0x3cf5   :  { %v4033_v29 = vpop.f32.mrf.mxu1 }
0x3cf7   :  { %v5384_v28 = vpop.f32.mrf.mxu1 }
0x3cff   :  { %v4110_v60 = vpop.f32.mrf.mxu0 }
0x3d00   :  { %v4111_v22 = vadd.f32 %v4110_v60, %v4033_v29 }
0x3d01   :  { %v5395_v24 = vpop.f32.mrf.mxu0 }
0x3d02   :  { %v4118_v25 = vadd.f32 %v4117_v27, %v4111_v22 }
0x3d04   :  { %5662 = vtanh.f32 %v4118_v25  ;;  %v4905_v53 = vmul.f32 -1.442695, %v4118_v25 }
0x3d06   :  { %5664 = vpow2.f32 %v4905_v53 }
0x3d11   :  { %v5663_v16 = vpop.eup %5662 }
0x3d12   :  { %4128 = vrot.lane.b32.xlu1 %v5663_v16, %s5891_s0 }
0x3d13   :  { %v5665_v56 = vpop.eup %5664 }
0x3d14   :  { %v4122_v26 = vadd.f32 1.0, %v5665_v56 }
0x3d16   :  { %5666 = vrcp.f32 %v4122_v26 }
0x3d23   :  { %v6784_v57 = vpop.eup %5666 }
0x3d24   :  { %v4126_v10 = vmul.f32 %v6784_v57, %v6711_v19 }
0x3d84   :  { %v4129_v33 = vpop.permute.xlu1 %4128 }
0x3d85   :  { %v4131_v59 = vmul.f32 %v6784_v57, %v4129_v33 }
0x3d87   :  { %4133 = vrot.lane.b32.xlu1 %v4131_v59, %s5892_s30 }
0x3df9   :  { %v4134_v34 = vpop.permute.xlu1 %4133 }
0x3dfa   :  { %v6790_v36 = vadd.f32 %v4134_v34, %v4126_v10 }
0x3dfc   :  { %4144 = vrot.lane.b32.xlu0 %v6790_v36, %s5902_s27 }
0x3e6e   :  { %v4145_v38 = vpop.permute.xlu0 %4144 }
0x3e6f   :  { %5405 = vmatmul.mubr.msk.f32.vlgmr.msra.gmra.mxu1 %vm179_vm1, %v4145_v38 }
0x3e70   :  { %5426 = vmatprep.mubr.msk.f32.mxu1 %vm5889_vm0, %v5888_v1 }
0x3f2f   :  { %v4214_v40 = vpop.f32.mrf.mxu1 }
0x3f30   :  { %v4215_v3 = vadd.f32 %v6632_v54, %v4214_v40 }
0x3f31   :  { %v5406_v45 = vpop.f32.mrf.mxu1 }
0x3f32   :  { %v4225_v46 = vrot.slane %v4215_v3, %v6074_v6 }
0x3f34   :  { %v4226_v5 = vcombine.high %v4225_v46, %v4225_v46  ;;  %v4233_v19 = vrot.slane %v4225_v46, %v6074_v6 }
0x3f36   :  { %v4240_v48 = vrot.slane %v4226_v5, %v6074_v6  ;;  %v4244_v49 = vrot.slane %v4233_v19, %v6038_v12  ;;  %v4368_v19 = vld [vmem:[#allocation11 + $0xf8] sm:$0xff] }
0x3f37   :  { %5408 = vmatpush3.msra.mxu0 %v4368_v19 }
0x3f38   :  { %v4248_v51 = vrot.slane %v4240_v48, %v6038_v12  ;;  %v4251_v21 = vadd.f32 %v4244_v49, %v6289_v20  ;;  %v4367_v48 = vld [vmem:[#allocation11 + $0xf0] sm:$0xff]  ;;  %5409 = vmatprep.subr.mxu0 %v5888_v1  ;;  %v4366_v49 = vld [vmem:[#allocation11 + $0xe8] sm:$0xff] }
0x3f39   :  { %5410 = vmatpush3.msra.mxu0 %v4367_v48 }
0x3f3a   :  { %v4252_v47 = vadd.f32 %v4248_v51, %v6293_v23  ;;  %5668 = vtanh.f32 %v4251_v21  ;;  %5411 = vmatprep.subr.mxu0 %v5888_v1  ;;  %v4365_v51 = vld [vmem:[#allocation11 + $0xe0] sm:$0xff]  ;;  %v4363_v21 = vld [vmem:[#allocation9 + $0xf8] sm:$0xff] }
0x3f3b   :  { %5412 = vmatpush3.msra.mxu0 %v4366_v49  ;;  %5419 = vmatpush3.msra.mxu1 %v4363_v21 }
0x3f3c   :  { %5670 = vtanh.f32 %v4252_v47  ;;  %5413 = vmatprep.subr.mxu0 %v5888_v1  ;;  %v4362_v47 = vld [vmem:[#allocation9 + $0xf0] sm:$0xff]  ;;  %5420 = vmatprep.subr.mxu1 %v5888_v1 }
0x3f3d   :  { %5414 = vmatpush3.msra.mxu0 %v4365_v51  ;;  %5421 = vmatpush3.msra.mxu1 %v4362_v47 }
0x3f3e   :  { %5429 = vmatprep.subr.mxu0 %v5888_v1  ;;  %5422 = vmatprep.subr.mxu1 %v5888_v1 }
0x3f47   :  { %v5669_v52 = vpop.eup %5668 }
0x3f48   :  { %v4255_v8 = vmul.f32 %v6645_v17, %v5669_v52 }
0x3f49   :  { %v5671_v39 = vpop.eup %5670 }
0x3f4a   :  { %v4257_v13 = vsel %vm179_vm1, %v4255_v8, 0.0  ;;  %v4256_v43 = vmul.f32 %v6645_v17, %v5671_v39  ;;  %v4361_v8 = vld [vmem:[#allocation9 + $0xe8] sm:$0xff] }
0x3f4b   :  { %4258 = vadd.xlane.f32.xlu1 %v4257_v13  ;;  %v4360_v13 = vld [vmem:[#allocation9 + $0xe0] sm:$0xff]  ;;  %5423 = vmatpush3.msra.mxu1 %v4361_v8 }
0x3f4c   :  { %v4260_v55 = vsel %vm179_vm1, %v4256_v43, 0.0  ;;  %5424 = vmatprep.subr.mxu1 %v5888_v1 }
0x3f4d   :  { %4261 = vadd.xlane.f32.xlu0 %v4260_v55  ;;  %5425 = vmatpush3.msra.mxu1 %v4360_v13 }
0x3fd4   :  { %v4259_v11 = vpop.xlane.xlu1 %4258 }
0x3fd5   :  { %v4263_v61 = vadd.f32 %v4259_v11, %v6311_v44 }
0x3fd6   :  { %v4262_v62 = vpop.xlane.xlu0 %4261 }
0x3fd7   :  { %v4264_v63 = vadd.f32 %v4262_v62, %v6311_v44  ;;  %v4270_v0 = vrot.slane %v4263_v61, %v6309_v42 }
0x3fd9   :  { %v4274_v7 = vrot.slane %v4264_v63, %v6309_v42 }
0x3fdb   :  { %v4275_v14 = vsel %vm1830_vm9, %v4274_v7, %v4270_v0 }
0x3fdc   :  { %v4277_v15 = vsel %vm1833_vm10, %v4275_v14, -inf }
0x3fdd   :  { %4278 = vmax.xlane.f32.xlu1 %v4277_v15 }
0x4066   :  { %v4279_v18 = vpop.xlane.xlu1 %4278 }
0x4067   :  { %v4284_v4 = vrot.slane %v4279_v18, %v6038_v12  ;;  %v4288_v29 = vrot.slane %v4279_v18, %v6058_v41 }
0x4069   :  { %v4291_v28 = vsub.f32 %v4263_v61, %v4284_v4  ;;  %v4292_v27 = vsub.f32 %v4264_v63, %v4288_v29 }
0x406b   :  { %v4293_v60 = vmul.f32 1.442695, %v4291_v28  ;;  %v4295_v22 = vmul.f32 1.442695, %v4292_v27 }
0x406d   :  { %5672 = vpow2.f32 %v4293_v60 }
0x406e   :  { %5674 = vpow2.f32 %v4295_v22 }
0x407a   :  { %v5673_v24 = vpop.eup %5672 }
0x407b   :  { %v5675_v25 = vpop.eup %5674  ;;  %4300 = vperm.xlu1 %5477, %v5673_v24  }
0x407c   :  { %4303 = vperm.xlu0 %5476, %v5675_v25  }
0x40f6   :  { %v4301_v16 = vpop.permute.xlu1 %4300 }
0x40f7   :  { %v4304_v53 = vpop.permute.xlu0 %4303  ;;  %v4308_v56 = vrot.slane %v4301_v16, %v6309_v42 }
0x40f8   :  { %v4312_v26 = vrot.slane %v4304_v53, %v6309_v42 }
0x40fa   :  { %v4313_v33 = vsel %vm1830_vm9, %v4312_v26, %v4308_v56  ;;  %v4524_v26 = vrot.slane %v6610_v35, %v1103_v50 }
0x40fb   :  { %v4315_v59 = vsel %vm1833_vm10, %v4313_v33, 0.0 }
0x40fc   :  { %4316 = vadd.xlane.f32.xlu1 %v4315_v59 }
0x4185   :  { %v4317_v10 = vpop.xlane.xlu1 %4316 }
0x4186   :  { %v4322_v34 = vrot.slane %v4317_v10, %v6038_v12  ;;  %v4326_v38 = vrot.slane %v4317_v10, %v6058_v41 }
0x4188   :  { %5676 = vrcp.f32 %v4322_v34 }
0x4189   :  { %5678 = vrcp.f32 %v4326_v38 }
0x418a   :  { %5680 = vtanh.f32 %v6790_v36 }
0x4195   :  { %v5677_v40 = vpop.eup %5676 }
0x4196   :  { %v4330_v3 = vmul.f32 %v5677_v40, %v5673_v24  ;;  %v5679_v45 = vpop.eup %5678 }
0x4197   :  { %v4332_v46 = vmul.f32 %v5679_v45, %v5675_v25  ;;  %v5681_v5 = vpop.eup %5680 }
0x4198   :  { %4335 = vperm.xlu0 %5476, %v4330_v3  }
0x419c   :  { %4340 = vperm.xlu0 %5476, %v4332_v46  }
0x41a0   :  { %4139 = vrot.lane.b32.xlu0 %v5681_v5, %s5891_s0 }
0x4213   :  { %v4336_v52 = vpop.permute.xlu0 %4335 }
0x4214   :  { %v4343_v39 = vmul.f32 %v4336_v52, %v6217_v31  ;;  %v4793_v61 = vrot.slane %v4336_v52, %v6309_v42 }
0x4216   :  { %v4345_v43 = vsel %vm1902_vm11, %v4343_v39, 0.0 }
0x4217   :  { %v4346_v55 = vrot.slane %v4345_v43, 4  ;;  %v4341_v11 = vpop.permute.xlu0 %4340 }
0x4218   :  { %v4344_v62 = vmul.f32 %v4341_v11, %v6222_v32  ;;  %v4797_v63 = vrot.slane %v4341_v11, %v6309_v42 }
0x4219   :  { %v4347_v0 = vadd.f32 %v4346_v55, %v4345_v43 }
0x421a   :  { %v4352_v31 = vsel %vm1902_vm11, %v4344_v62, 0.0  ;;  %v4812_v7 = vsel %vm1830_vm9, %v4797_v63, %v4793_v61 }
0x421b   :  { %v4348_v14 = vrot.slane %v4347_v0, 2  ;;  %v4353_v15 = vrot.slane %v4352_v31, 4  ;;  %4828 = vst.msk [vmem:[#allocation15 + $0xc] sm:$0x3] %vm1833_vm10, %v4812_v7  ;;  %v4140_v18 = vpop.permute.xlu0 %4139 }
0x421c   :  { %v4142_v4 = vmul.f32 %v6784_v57, %v4140_v18 }
0x421d   :  { %v4349_v29 = vadd.f32 %v4348_v14, %v4347_v0  ;;  %v4354_v28 = vadd.f32 %v4353_v15, %v4352_v31 }
0x421e   :  { %4370 = vrot.lane.b32.xlu0 %v4142_v4, %s5892_s30 }
0x421f   :  { %v4355_v32 = vrot.slane %v4354_v28, 2  ;;  %v4350_v27 = vrot.slane %v4349_v29, 1 }
0x4221   :  { %v4356_v60 = vadd.f32 %v4355_v32, %v4354_v28  ;;  %v4351_v24 = vadd.f32 %v4350_v27, %v4349_v29 }
0x4223   :  { %v4357_v22 = vrot.slane %v4356_v60, 1 }
0x4225   :  { %v4358_v25 = vadd.f32 %v4357_v22, %v4356_v60 }
0x4227   :  { %v4446_v16 = vsel %vm1830_vm9, %v4358_v25, %v4351_v24 }
0x4228   :  { %4447 = vrot.lane.b32.xlu0 %v4446_v16, %s5892_s30 }
0x4290   :  { %v4371_v53 = vpop.permute.xlu0 %4370 }
0x4291   :  { %5416 = vmatmul.mubr.msk.f32.vlgmr.msra.gmra.mxu0 %vm179_vm1, %v4371_v53 }
0x4292   :  { %5430 = vmatpush3.msra.mxu0 %v6586_v30  ;;  %5437 = vmatprep.mubr.msk.f32.mxu0 %vm5889_vm0, %v5888_v1 }
0x4293   :  { %5431 = vmatprep.subr.mxu0 %v5888_v1 }
0x4294   :  { %5432 = vmatpush3.msra.mxu0 %v6592_v37 }
0x4295   :  { %5433 = vmatprep.subr.mxu0 %v5888_v1 }
0x4296   :  { %5434 = vmatpush3.msra.mxu0 %v6596_v58 }
0x4297   :  { %5435 = vmatprep.subr.mxu0 %v5888_v1 }
0x4298   :  { %5436 = vmatpush3.msra.mxu0 %v6600_v2 }
0x429a   :  { %v4448_v57 = vpop.permute.xlu0 %4447 }
0x429b   :  { %5427 = vmatmul.mubr.msk.f32.vlgmr.msra.gmra.mxu1 %vm179_vm1, %v4448_v57 }
0x4351   :  { %v4440_v56 = vpop.f32.mrf.mxu0 }
0x4353   :  { %v5417_v30 = vpop.f32.mrf.mxu0 }
0x435b   :  { %v4517_v33 = vpop.f32.mrf.mxu1 }
0x435c   :  { %v4518_v59 = vadd.f32 %v4517_v33, %v4440_v56 }
0x435d   :  { %v5428_v37 = vpop.f32.mrf.mxu1 }
0x435e   :  { %v4525_v10 = vadd.f32 %v4524_v26, %v4518_v59 }
0x4360   :  { %5682 = vtanh.f32 %v4525_v10  ;;  %v4909_v1 = vmul.f32 -1.442695, %v4525_v10 }
0x4362   :  { %5684 = vpow2.f32 %v4909_v1 }
0x436d   :  { %v5683_v34 = vpop.eup %5682 }
0x436e   :  { %4535 = vrot.lane.b32.xlu1 %v5683_v34, %s5891_s0 }
0x436f   :  { %v5685_v58 = vpop.eup %5684 }
0x4370   :  { %v4529_v2 = vadd.f32 1.0, %v5685_v58 }
0x4372   :  { %5686 = vrcp.f32 %v4529_v2 }
0x437f   :  { %v5687_v38 = vpop.eup %5686 }
0x4380   :  { %v4533_v9 = vmul.f32 %v5687_v38, %v6790_v36 }
0x43e0   :  { %v4536_v40 = vpop.permute.xlu1 %4535 }
0x43e1   :  { %v4538_v3 = vmul.f32 %v5687_v38, %v4536_v40 }
0x43e3   :  { %4540 = vrot.lane.b32.xlu0 %v4538_v3, %s5892_s30 }
0x4455   :  { %v4541_v50 = vpop.permute.xlu0 %4540 }
0x4456   :  { %v4543_v35 = vadd.f32 %v4541_v50, %v4533_v9 }
0x4458   :  { %4545 = vrot.lane.b32.xlu0 %v4543_v35, %s5902_s27 }
0x44ca   :  { %v4546_v45 = vpop.permute.xlu0 %4545 }
0x44cb   :  { %5438 = vmatmul.mubr.msk.f32.vlgmr.msra.gmra.mxu0 %vm179_vm1, %v4546_v45 }
0x458b   :  { %v4615_v46 = vpop.f32.mrf.mxu0 }
0x458c   :  { %v4616_v5 = vadd.f32 %v6632_v54, %v4615_v46 }
0x458d   :  { %v5439_v19 = vpop.f32.mrf.mxu0 }
0x458e   :  { %v4626_v48 = vrot.slane %v4616_v5, %v6074_v6 }
0x4590   :  { %v4627_v49 = vcombine.high %v4626_v48, %v4626_v48  ;;  %v4634_v51 = vrot.slane %v4626_v48, %v6074_v6 }
0x4592   :  { %v4641_v21 = vrot.slane %v4627_v49, %v6074_v6  ;;  %v4645_v36 = vrot.slane %v4634_v51, %v6038_v12 }
0x4594   :  { %v4649_v47 = vrot.slane %v4641_v21, %v6038_v12  ;;  %v4652_v52 = vadd.f32 %v4645_v36, %v6289_v20 }
0x4596   :  { %v4653_v8 = vadd.f32 %v4649_v47, %v6293_v23  ;;  %5688 = vtanh.f32 %v4652_v52 }
0x4598   :  { %5690 = vtanh.f32 %v4653_v8 }
0x45a3   :  { %v5689_v39 = vpop.eup %5688 }
0x45a4   :  { %v4656_v54 = vmul.f32 %v6645_v17, %v5689_v39 }
0x45a5   :  { %v5691_v13 = vpop.eup %5690 }
0x45a6   :  { %v4658_v43 = vsel %vm179_vm1, %v4656_v54, 0.0  ;;  %v4657_v55 = vmul.f32 %v6645_v17, %v5691_v13 }
0x45a7   :  { %4659 = vadd.xlane.f32.xlu0 %v4658_v43 }
0x45a8   :  { %v4661_v6 = vsel %vm179_vm1, %v4657_v55, 0.0 }
0x45a9   :  { %4662 = vadd.xlane.f32.xlu1 %v4661_v6 }
0x4630   :  { %v4660_v11 = vpop.xlane.xlu0 %4659 }
0x4631   :  { %v4664_v61 = vadd.f32 %v4660_v11, %v6311_v44 }
0x4632   :  { %v4663_v20 = vpop.xlane.xlu1 %4662 }
0x4633   :  { %v4665_v23 = vadd.f32 %v4663_v20, %v6311_v44  ;;  %v4671_v62 = vrot.slane %v4664_v61, %v6309_v42 }
0x4635   :  { %v4675_v63 = vrot.slane %v4665_v23, %v6309_v42 }
0x4637   :  { %v4676_v0 = vsel %vm1830_vm9, %v4675_v63, %v4671_v62 }
0x4638   :  { %v4678_v31 = vsel %vm1833_vm10, %v4676_v0, -inf }
0x4639   :  { %4679 = vmax.xlane.f32.xlu0 %v4678_v31 }
0x46c2   :  { %v4680_v17 = vpop.xlane.xlu0 %4679 }
0x46c3   :  { %v4685_v7 = vrot.slane %v4680_v17, %v6038_v12  ;;  %v4689_v14 = vrot.slane %v4680_v17, %v6058_v41 }
0x46c5   :  { %v4692_v15 = vsub.f32 %v4664_v61, %v4685_v7  ;;  %v4693_v18 = vsub.f32 %v4665_v23, %v4689_v14 }
0x46c7   :  { %v4694_v4 = vmul.f32 1.442695, %v4692_v15  ;;  %v4696_v29 = vmul.f32 1.442695, %v4693_v18 }
0x46c9   :  { %5692 = vpow2.f32 %v4694_v4 }
0x46ca   :  { %5694 = vpow2.f32 %v4696_v29 }
0x46d6   :  { %v5693_v44 = vpop.eup %5692 }
0x46d7   :  { %v5695_v28 = vpop.eup %5694  ;;  %4701 = vperm.xlu0 %5476, %v5693_v44  }
0x46d8   :  { %4704 = vperm.xlu1 %5477, %v5695_v28  }
0x4752   :  { %v4702_v32 = vpop.permute.xlu0 %4701 }
0x4753   :  { %v4705_v27 = vpop.permute.xlu1 %4704  ;;  %v4709_v60 = vrot.slane %v4702_v32, %v6309_v42 }
0x4754   :  { %v4713_v22 = vrot.slane %v4705_v27, %v6309_v42 }
0x4756   :  { %v4714_v24 = vsel %vm1830_vm9, %v4713_v22, %v4709_v60 }
0x4757   :  { %v4716_v25 = vsel %vm1833_vm10, %v4714_v24, 0.0 }
0x4758   :  { %4717 = vadd.xlane.f32.xlu0 %v4716_v25 }
0x47e1   :  { %v4718_v16 = vpop.xlane.xlu0 %4717 }
0x47e2   :  { %v4723_v53 = vrot.slane %v4718_v16, %v6038_v12  ;;  %v4727_v57 = vrot.slane %v4718_v16, %v6058_v41 }
0x47e4   :  { %5696 = vrcp.f32 %v4723_v53 }
0x47e5   :  { %5698 = vrcp.f32 %v4727_v57 }
0x47f1   :  { %v5697_v56 = vpop.eup %5696 }
0x47f2   :  { %v4731_v30 = vmul.f32 %v5697_v56, %v5693_v44  ;;  %v5699_v26 = vpop.eup %5698 }
0x47f3   :  { %v4733_v33 = vmul.f32 %v5699_v26, %v5695_v28 }
0x47f4   :  { %4737 = vperm.xlu1 %5477, %v4731_v30  }
0x47f8   :  { %4740 = vperm.xlu1 %5477, %v4733_v33  }
0x486f   :  { %v4738_v59 = vpop.permute.xlu1 %4737 }
0x4870   :  { %v4801_v10 = vrot.slane %v4738_v59, %v6309_v42 }
0x4873   :  { %v4741_v37 = vpop.permute.xlu1 %4740 }
0x4874   :  { %v4805_v34 = vrot.slane %v4741_v37, %v6309_v42 }
0x4876   :  { %v4813_v12 = vsel %vm1830_vm9, %v4805_v34, %v4801_v10 }
0x4877   :  { %4829 = vst.msk [vmem:[#allocation15 + $0xe] sm:$0x3] %vm1833_vm10, %v4813_v12 }
0x4878   :  { %5858 = shalt.err (!%p5855_p11)
}
0x4879   :  { %s5904_s21 = smov 2  }
0x487a   :  { %4841 = dma.vmem_to_hbm [thread:$0]  %s4836_s19, 256, %s6911_s13, [#allocation5], %s5892_s30, %s5892_s30, %s5904_s21  }
0x487b   :  { %5875 = dma.done.wait [#allocation5], 256  }
0x487c   :  { %5876 = vsyncadd [#allocation5], 4294967040 }
0x487d   :  { %4845 = vsyncpa [#allocation4], 1 }
0x487e   :  { %4846 = vsyncpa [#allocation7], 1 }
0x487f   :  { %4847 = vsyncpa [#allocation10], 1 }
0x4880   :  { %4848 = vsyncpa [#allocation13], 1 }
0x4881   :  { %4849 = vsyncpa [#allocation5], 1 }

</bundles_post_ra>
